<compile_context>
chip_gen: v5e
topology: v5e:2x2
jax: 0.10.0
libtpu: 0.0.40
codegen_flags: <defaults>
</compile_context>

<pallas_src>
import math
import jax
import jax.numpy as jnp
from jax import lax
from jax.experimental import pallas as pl
from jax.experimental.pallas import tpu as pltpu


def _round_up(x, m):
    return ((x + m - 1) // m) * m


def _make_lstm_kernel(num_layers, T, Bb, I, Hp, Cp, mxu_dtype, unroll):
    """Kernel refs: x, (w_ih, w_hh, b) * num_layers, fc_w, fc_b, out, seq_scr, xw_scr."""

    def kernel(*refs):
        x_ref = refs[0]                                   # (1, T*Bb, I)   mxu_dtype
        layer_refs = refs[1:1 + 3 * num_layers]
        fcw_ref = refs[1 + 3 * num_layers]                # (Hp, Cp)       f32
        fcb_ref = refs[2 + 3 * num_layers]                # (1, Cp)        f32
        out_ref = refs[3 + 3 * num_layers]                # (1, Bb, Cp)    f32
        seq_scr, xw_scr = refs[4 + 3 * num_layers:]       # (T*Bb, Hp) mxu, (T*Bb, 4Hp) f32

        h_final = jnp.zeros((Bb, Hp), jnp.float32)

        for l in range(num_layers):  # layers are sequential; static Python unroll
            w_ih = layer_refs[3 * l][...]      # (in_l, 4Hp)  bf16/f32, i/f/o cols pre-scaled by 0.5
            w_hh = layer_refs[3 * l + 1][...]  # (Hp, 4Hp)
            b = layer_refs[3 * l + 2][...]     # (1, 4Hp)     f32, = b_ih + b_hh (pre-scaled)

            # ---- Hoisted input projection: one batched MXU matmul per layer ----
            x_flat = x_ref[0] if l == 0 else seq_scr[...]
            xw_scr[...] = (
                jnp.dot(x_flat, w_ih, preferred_element_type=jnp.float32) + b
            )

            last_layer = (l == num_layers - 1)

            # ---- Serial recurrence: h/c live in the fori_loop carry (vregs) ----
            def step(t, carry, w_hh=w_hh, last_layer=last_layer):
                h, c = carry
                row = pl.multiple_of(t * Bb, Bb)
                gates = xw_scr[pl.ds(row, Bb), :] + jnp.dot(
                    h.astype(mxu_dtype), w_hh, preferred_element_type=jnp.float32)
                # Single full-width tanh (EUP); sigmoids recovered with a VPU fma
                # because the i/f/o gate columns were pre-scaled by 0.5.
                th = jnp.tanh(gates)
                i_g = 0.5 * th[:, 0:Hp] + 0.5
                f_g = 0.5 * th[:, Hp:2 * Hp] + 0.5
                g_g = th[:, 2 * Hp:3 * Hp]
                o_g = 0.5 * th[:, 3 * Hp:4 * Hp] + 0.5
                c_new = f_g * c + i_g * g_g
                h_new = o_g * jnp.tanh(c_new)
                if not last_layer:
                    # Only non-final layers feed a next layer; skip the store otherwise.
                    seq_scr[pl.ds(row, Bb), :] = h_new.astype(seq_scr.dtype)
                return (h_new, c_new)

            h0 = jnp.zeros((Bb, Hp), jnp.float32)
            c0 = jnp.zeros((Bb, Hp), jnp.float32)
            h_final, _ = lax.fori_loop(0, T, step, (h0, c0), unroll=unroll)

        # Dropout is identity in eval; final Linear (lane-dense, 128 padded cols).
        out_ref[0] = (
            jnp.dot(h_final, fcw_ref[...], preferred_element_type=jnp.float32)
            + fcb_ref[...]
        )

    return kernel


def lstm_model_forward(x, params, *, hidden_size, num_layers, num_classes,
                       matmul_dtype=jnp.bfloat16, num_batch_blocks=None):
    """x: (B, T, input_size) float32, batch_first like the PyTorch module."""
    B, T, I = x.shape
    H = hidden_size
    Hp = _round_up(H, 128)             # lane-aligned hidden size
    Cp = _round_up(num_classes, 128)   # lane-dense FC head
    B_pad = _round_up(B, 8)            # sublane-aligned batch

    if num_batch_blocks is None:
        # Batch-parallel grid axis only pays off with >=2 TensorCores (v7x) and
        # when each half still fills >= 8 sublanes.
        num_batch_blocks = 1
        try:
            info = pltpu.get_tpu_info()
            if getattr(info, "num_cores", 1) >= 2 and (B_pad // 2) % 8 == 0:
                num_batch_blocks = 2
        except Exception:
            pass
    NB = num_batch_blocks
    assert B_pad % NB == 0 and (B_pad // NB) % 8 == 0
    Bb = B_pad // NB

    def pad_gates(w):
        # (rows, 4H) -> (rows, 4Hp), per-gate column blocks; i/f/o pre-scaled by 0.5
        blocks = []
        for g in range(4):
            blk = w[:, g * H:(g + 1) * H]
            if g != 2:                       # gates i, f, o (sigmoid) -> tanh trick
                blk = blk * 0.5
            blocks.append(jnp.pad(blk, ((0, 0), (0, Hp - H))))
        return jnp.concatenate(blocks, axis=1)

    # ---- Layout plumbing (all outside the kernel) ----
    x_p = jnp.pad(x, ((0, B_pad - B), (0, 0), (0, 0)))                 # (B_pad, T, I)
    x_tm = jnp.transpose(x_p, (1, 0, 2))                               # (T, B_pad, I)
    x_blk = (x_tm.reshape(T, NB, Bb, I)
                 .transpose(1, 0, 2, 3)
                 .reshape(NB, T * Bb, I)).astype(matmul_dtype)         # (NB, T*Bb, I)

    kargs = [x_blk]
    for l in range(num_layers):
        w_ih = pad_gates(params[f"w_ih_{l}"])                          # (in_l, 4Hp)
        if l > 0:
            w_ih = jnp.pad(w_ih, ((0, Hp - H), (0, 0)))                # pad input rows to Hp
        w_hh = jnp.pad(pad_gates(params[f"w_hh_{l}"]), ((0, Hp - H), (0, 0)))
        b = pad_gates(params[f"b_{l}"])
        kargs += [w_ih.astype(matmul_dtype), w_hh.astype(matmul_dtype),
                  b.astype(jnp.float32)]
    fc_w = jnp.pad(params["fc_w"], ((0, Hp - H), (0, Cp - num_classes))).astype(jnp.float32)
    fc_b = jnp.pad(params["fc_b"], ((0, 0), (0, Cp - num_classes))).astype(jnp.float32)
    kargs += [fc_w, fc_b]

    in_specs = [pl.BlockSpec((1, T * Bb, I), lambda g: (g, 0, 0))]
    for a in kargs[1:]:
        in_specs.append(pl.BlockSpec(a.shape, lambda g: (0, 0)))       # whole 2-D weight

    kernel = _make_lstm_kernel(num_layers, T, Bb, I, Hp, Cp, matmul_dtype,
                               unroll=min(T, 8))

    out = pl.pallas_call(
        kernel,
        out_shape=jax.ShapeDtypeStruct((NB, Bb, Cp), jnp.float32),
        grid=(NB,),
        in_specs=in_specs,
        out_specs=pl.BlockSpec((1, Bb, Cp), lambda g: (g, 0, 0)),
        scratch_shapes=[
            pltpu.VMEM((T * Bb, Hp), matmul_dtype),      # inter-layer hidden sequence
            pltpu.VMEM((T * Bb, 4 * Hp), jnp.float32),   # hoisted input projection + bias
        ],
        compiler_params=pltpu.CompilerParams(
            dimension_semantics=("parallel",)),
    )(*kargs)

    return out.reshape(B_pad, Cp)[:B, :num_classes]


def init_params(key, input_size, hidden_size, num_layers, num_classes):
    """Deterministic PyTorch-style uniform(-1/sqrt(H), 1/sqrt(H)) init. Weights stored transposed
    relative to PyTorch so the kernel can use x @ W directly; gate order (i, f, g, o) preserved."""
    params = {}
    k = 1.0 / math.sqrt(hidden_size)
    keys = jax.random.split(key, 4 * num_layers + 2)
    idx = 0
    for l in range(num_layers):
        in_l = input_size if l == 0 else hidden_size
        params[f"w_ih_{l}"] = jax.random.uniform(
            keys[idx], (in_l, 4 * hidden_size), jnp.float32, -k, k); idx += 1
        params[f"w_hh_{l}"] = jax.random.uniform(
            keys[idx], (hidden_size, 4 * hidden_size), jnp.float32, -k, k); idx += 1
        b_ih = jax.random.uniform(keys[idx], (4 * hidden_size,), jnp.float32, -k, k); idx += 1
        b_hh = jax.random.uniform(keys[idx], (4 * hidden_size,), jnp.float32, -k, k); idx += 1
        params[f"b_{l}"] = (b_ih + b_hh).reshape(1, 4 * hidden_size)
    kf = 1.0 / math.sqrt(hidden_size)
    params["fc_w"] = jax.random.uniform(
        keys[idx], (hidden_size, num_classes), jnp.float32, -kf, kf); idx += 1
    params["fc_b"] = jax.random.uniform(
        keys[idx], (1, num_classes), jnp.float32, -kf, kf)
    return params


def lstm_model_reference(x, params, *, hidden_size, num_layers):
    """Pure-JAX reference of the same forward pass (for correctness check)."""
    B, T, _ = x.shape
    H = hidden_size
    inp = x
    h = jnp.zeros((B, H), jnp.float32)
    for l in range(num_layers):
        w_ih, w_hh, b = params[f"w_ih_{l}"], params[f"w_hh_{l}"], params[f"b_{l}"]
        h = jnp.zeros((B, H), jnp.float32)
        c = jnp.zeros((B, H), jnp.float32)
        outs = []
        for t in range(T):
            gates = inp[:, t, :] @ w_ih + h @ w_hh + b
            i_g = jax.nn.sigmoid(gates[:, 0:H])
            f_g = jax.nn.sigmoid(gates[:, H:2 * H])
            g_g = jnp.tanh(gates[:, 2 * H:3 * H])
            o_g = jax.nn.sigmoid(gates[:, 3 * H:4 * H])
            c = f_g * c + i_g * g_g
            h = o_g * jnp.tanh(c)
            outs.append(h)
        inp = jnp.stack(outs, axis=1)
    return h @ params["fc_w"] + params["fc_b"]


if __name__ == "__main__":
    # Small shapes consistent with the module's forward: x is (batch, seq, input_size)
    B, T, INPUT, HIDDEN, LAYERS, CLASSES = 16, 8, 16, 32, 2, 4

    key = jax.random.PRNGKey(0)
    kx, kp = jax.random.split(key)
    x = jax.random.normal(kx, (B, T, INPUT), jnp.float32)
    params = init_params(kp, INPUT, HIDDEN, LAYERS, CLASSES)

    ref = lstm_model_reference(x, params, hidden_size=HIDDEN, num_layers=LAYERS)

    # f32 MXU operands: tight check vs pure-JAX reference.
    out_f32 = lstm_model_forward(x, params, hidden_size=HIDDEN, num_layers=LAYERS,
                                 num_classes=CLASSES, matmul_dtype=jnp.float32)
    out_f32 = jax.block_until_ready(out_f32)
    assert out_f32.shape == (B, CLASSES)
    assert jnp.allclose(out_f32, ref, atol=1e-4, rtol=1e-4), "f32 mismatch vs reference"

    # bf16 MXU operands (default / production path): looser tolerance.
    out_bf16 = lstm_model_forward(x, params, hidden_size=HIDDEN, num_layers=LAYERS,
                                  num_classes=CLASSES)
    out_bf16 = jax.block_until_ready(out_bf16)
    assert out_bf16.shape == (B, CLASSES)
    assert jnp.allclose(out_bf16, ref, atol=5e-2, rtol=5e-2), "bf16 mismatch vs reference"

    print("KERNEL_OK")
</pallas_src>

<mosaic_0001>
module attributes {stable_mosaic.version = 11 : i64} {
  func.func @kernel(%arg0: i32, %arg1: memref<1x128x16xf32, #tpu.memory_space<vmem>>, %arg2: memref<16x512xf32, #tpu.memory_space<vmem>>, %arg3: memref<128x512xf32, #tpu.memory_space<vmem>>, %arg4: memref<1x512xf32, #tpu.memory_space<vmem>>, %arg5: memref<128x512xf32, #tpu.memory_space<vmem>>, %arg6: memref<128x512xf32, #tpu.memory_space<vmem>>, %arg7: memref<1x512xf32, #tpu.memory_space<vmem>>, %arg8: memref<128x128xf32, #tpu.memory_space<vmem>>, %arg9: memref<1x128xf32, #tpu.memory_space<vmem>>, %arg10: memref<1x16x128xf32, #tpu.memory_space<vmem>>, %arg11: memref<128x128xf32, #tpu.memory_space<vmem>>, %arg12: memref<128x512xf32, #tpu.memory_space<vmem>>) attributes {dimension_semantics = [#tpu.dimension_semantics<parallel>], iteration_bounds = array<i64: 1>, scalar_prefetch = 0 : i64, scratch_operands = 2 : i64, tpu.core_type = #tpu.core_type<tc>, window_params = [{transform_indices = @transform_0, window_bounds = array<i64: 1, 128, 16>}, {pipeline_mode = #tpu.pipeline_mode<synchronous>, transform_indices = @transform_1, window_bounds = array<i64: 16, 512>}, {pipeline_mode = #tpu.pipeline_mode<synchronous>, transform_indices = @transform_2, window_bounds = array<i64: 128, 512>}, {pipeline_mode = #tpu.pipeline_mode<synchronous>, transform_indices = @transform_3, window_bounds = array<i64: 1, 512>}, {pipeline_mode = #tpu.pipeline_mode<synchronous>, transform_indices = @transform_4, window_bounds = array<i64: 128, 512>}, {pipeline_mode = #tpu.pipeline_mode<synchronous>, transform_indices = @transform_5, window_bounds = array<i64: 128, 512>}, {pipeline_mode = #tpu.pipeline_mode<synchronous>, transform_indices = @transform_6, window_bounds = array<i64: 1, 512>}, {pipeline_mode = #tpu.pipeline_mode<synchronous>, transform_indices = @transform_7, window_bounds = array<i64: 128, 128>}, {pipeline_mode = #tpu.pipeline_mode<synchronous>, transform_indices = @transform_8, window_bounds = array<i64: 1, 128>}, {transform_indices = @transform_9, window_bounds = array<i64: 1, 16, 128>}]} {
    %c0 = arith.constant 0 : index
    %c0_0 = arith.constant 0 : index
    %0 = vector.load %arg2[%c0, %c0_0] : memref<16x512xf32, #tpu.memory_space<vmem>>, vector<16x512xf32>
    %c0_1 = arith.constant 0 : index
    %c0_2 = arith.constant 0 : index
    %1 = vector.load %arg3[%c0_1, %c0_2] : memref<128x512xf32, #tpu.memory_space<vmem>>, vector<128x512xf32>
    %c0_3 = arith.constant 0 : index
    %c0_4 = arith.constant 0 : index
    %2 = vector.load %arg4[%c0_3, %c0_4] : memref<1x512xf32, #tpu.memory_space<vmem>>, vector<1x512xf32>
    %c0_5 = arith.constant 0 : index
    %c0_6 = arith.constant 0 : index
    %c0_7 = arith.constant 0 : index
    %3 = vector.load %arg1[%c0_5, %c0_6, %c0_7] : memref<1x128x16xf32, #tpu.memory_space<vmem>>, vector<1x128x16xf32>
    %4 = vector.shape_cast %3 : vector<1x128x16xf32> to vector<128x16xf32>
    %cst = arith.constant dense<0.000000e+00> : vector<128x512xf32>
    %5 = tpu.matmul %4, %0, %cst {dimension_numbers = #tpu.dot_dimension_numbers<[1], [0], [0], [1], [0, 0, 1, 1], [], []>} : vector<128x16xf32>, vector<16x512xf32>, vector<128x512xf32> -> vector<128x512xf32>
    %6 = vector.broadcast %2 : vector<1x512xf32> to vector<128x512xf32>
    %7 = arith.addf %5, %6 : vector<128x512xf32>
    %c0_8 = arith.constant 0 : index
    %c0_9 = arith.constant 0 : index
    %8 = vector.load %arg12[%c0_8, %c0_9] : memref<128x512xf32, #tpu.memory_space<vmem>>, vector<128x512xf32>
    tpu.vector_store %arg12[%c0_8, %c0_9], %7 {strides = array<i32>} : memref<128x512xf32, #tpu.memory_space<vmem>>, vector<128x512xf32>,
    %cst_10 = arith.constant 0.000000e+00 : f32
    %9 = vector.broadcast %cst_10 : f32 to vector<16x128xf32>
    %cst_11 = arith.constant 0.000000e+00 : f32
    %10 = vector.broadcast %cst_11 : f32 to vector<16x128xf32>
    %c0_i32 = arith.constant 0 : i32
    %c16_i32 = arith.constant 16 : i32
    %11 = arith.muli %c0_i32, %c16_i32 : i32
    %12 = tpu.assume_multiple %11, 16 : i32
    %13 = arith.index_cast %12 : i32 to index
    %c0_12 = arith.constant 0 : index
    %14 = vector.load %arg12[%13, %c0_12] : memref<128x512xf32, #tpu.memory_space<vmem>>, vector<16x512xf32>
    %cst_13 = arith.constant dense<0.000000e+00> : vector<16x512xf32>
    %15 = tpu.matmul %9, %1, %cst_13 {dimension_numbers = #tpu.dot_dimension_numbers<[1], [0], [0], [1], [0, 0, 1, 1], [], []>} : vector<16x128xf32>, vector<128x512xf32>, vector<16x512xf32> -> vector<16x512xf32>
    %16 = arith.addf %14, %15 : vector<16x512xf32>
    %17 = math.tanh %16 : vector<16x512xf32>
    %18 = vector.extract_strided_slice %17 {offsets = [0, 0], sizes = [16, 128], strides = [1, 1]} : vector<16x512xf32> to vector<16x128xf32>
    %cst_14 = arith.constant 5.000000e-01 : f32
    %19 = vector.broadcast %cst_14 : f32 to vector<16x128xf32>
    %20 = arith.mulf %19, %18 : vector<16x128xf32>
    %cst_15 = arith.constant 5.000000e-01 : f32
    %21 = vector.broadcast %cst_15 : f32 to vector<16x128xf32>
    %22 = arith.addf %20, %21 : vector<16x128xf32>
    %23 = vector.extract_strided_slice %17 {offsets = [0, 128], sizes = [16, 128], strides = [1, 1]} : vector<16x512xf32> to vector<16x128xf32>
    %cst_16 = arith.constant 5.000000e-01 : f32
    %24 = vector.broadcast %cst_16 : f32 to vector<16x128xf32>
    %25 = arith.mulf %24, %23 : vector<16x128xf32>
    %cst_17 = arith.constant 5.000000e-01 : f32
    %26 = vector.broadcast %cst_17 : f32 to vector<16x128xf32>
    %27 = arith.addf %25, %26 : vector<16x128xf32>
    %28 = vector.extract_strided_slice %17 {offsets = [0, 256], sizes = [16, 128], strides = [1, 1]} : vector<16x512xf32> to vector<16x128xf32>
    %29 = vector.extract_strided_slice %17 {offsets = [0, 384], sizes = [16, 128], strides = [1, 1]} : vector<16x512xf32> to vector<16x128xf32>
    %cst_18 = arith.constant 5.000000e-01 : f32
    %30 = vector.broadcast %cst_18 : f32 to vector<16x128xf32>
    %31 = arith.mulf %30, %29 : vector<16x128xf32>
    %cst_19 = arith.constant 5.000000e-01 : f32
    %32 = vector.broadcast %cst_19 : f32 to vector<16x128xf32>
    %33 = arith.addf %31, %32 : vector<16x128xf32>
    %34 = arith.mulf %27, %10 : vector<16x128xf32>
    %35 = arith.mulf %22, %28 : vector<16x128xf32>
    %36 = arith.addf %34, %35 : vector<16x128xf32>
    %37 = math.tanh %36 : vector<16x128xf32>
    %38 = arith.mulf %33, %37 : vector<16x128xf32>
    %39 = arith.index_cast %12 : i32 to index
    %c0_20 = arith.constant 0 : index
    %40 = vector.load %arg11[%39, %c0_20] : memref<128x128xf32, #tpu.memory_space<vmem>>, vector<16x128xf32>
    tpu.vector_store %arg11[%39, %c0_20], %38 {strides = array<i32>} : memref<128x128xf32, #tpu.memory_space<vmem>>, vector<16x128xf32>,
    %c1_i32 = arith.constant 1 : i32
    %c16_i32_21 = arith.constant 16 : i32
    %41 = arith.muli %c1_i32, %c16_i32_21 : i32
    %42 = tpu.assume_multiple %41, 16 : i32
    %43 = arith.index_cast %42 : i32 to index
    %c0_22 = arith.constant 0 : index
    %44 = vector.load %arg12[%43, %c0_22] : memref<128x512xf32, #tpu.memory_space<vmem>>, vector<16x512xf32>
    %cst_23 = arith.constant dense<0.000000e+00> : vector<16x512xf32>
    %45 = tpu.matmul %38, %1, %cst_23 {dimension_numbers = #tpu.dot_dimension_numbers<[1], [0], [0], [1], [0, 0, 1, 1], [], []>} : vector<16x128xf32>, vector<128x512xf32>, vector<16x512xf32> -> vector<16x512xf32>
    %46 = arith.addf %44, %45 : vector<16x512xf32>
    %47 = math.tanh %46 : vector<16x512xf32>
    %48 = vector.extract_strided_slice %47 {offsets = [0, 0], sizes = [16, 128], strides = [1, 1]} : vector<16x512xf32> to vector<16x128xf32>
    %cst_24 = arith.constant 5.000000e-01 : f32
    %49 = vector.broadcast %cst_24 : f32 to vector<16x128xf32>
    %50 = arith.mulf %49, %48 : vector<16x128xf32>
    %cst_25 = arith.constant 5.000000e-01 : f32
    %51 = vector.broadcast %cst_25 : f32 to vector<16x128xf32>
    %52 = arith.addf %50, %51 : vector<16x128xf32>
    %53 = vector.extract_strided_slice %47 {offsets = [0, 128], sizes = [16, 128], strides = [1, 1]} : vector<16x512xf32> to vector<16x128xf32>
    %cst_26 = arith.constant 5.000000e-01 : f32
    %54 = vector.broadcast %cst_26 : f32 to vector<16x128xf32>
    %55 = arith.mulf %54, %53 : vector<16x128xf32>
    %cst_27 = arith.constant 5.000000e-01 : f32
    %56 = vector.broadcast %cst_27 : f32 to vector<16x128xf32>
    %57 = arith.addf %55, %56 : vector<16x128xf32>
    %58 = vector.extract_strided_slice %47 {offsets = [0, 256], sizes = [16, 128], strides = [1, 1]} : vector<16x512xf32> to vector<16x128xf32>
    %59 = vector.extract_strided_slice %47 {offsets = [0, 384], sizes = [16, 128], strides = [1, 1]} : vector<16x512xf32> to vector<16x128xf32>
    %cst_28 = arith.constant 5.000000e-01 : f32
    %60 = vector.broadcast %cst_28 : f32 to vector<16x128xf32>
    %61 = arith.mulf %60, %59 : vector<16x128xf32>
    %cst_29 = arith.constant 5.000000e-01 : f32
    %62 = vector.broadcast %cst_29 : f32 to vector<16x128xf32>
    %63 = arith.addf %61, %62 : vector<16x128xf32>
    %64 = arith.mulf %57, %36 : vector<16x128xf32>
    %65 = arith.mulf %52, %58 : vector<16x128xf32>
    %66 = arith.addf %64, %65 : vector<16x128xf32>
    %67 = math.tanh %66 : vector<16x128xf32>
    %68 = arith.mulf %63, %67 : vector<16x128xf32>
    %69 = arith.index_cast %42 : i32 to index
    %c0_30 = arith.constant 0 : index
    %70 = vector.load %arg11[%69, %c0_30] : memref<128x128xf32, #tpu.memory_space<vmem>>, vector<16x128xf32>
    tpu.vector_store %arg11[%69, %c0_30], %68 {strides = array<i32>} : memref<128x128xf32, #tpu.memory_space<vmem>>, vector<16x128xf32>,
    %c2_i32 = arith.constant 2 : i32
    %c16_i32_31 = arith.constant 16 : i32
    %71 = arith.muli %c2_i32, %c16_i32_31 : i32
    %72 = tpu.assume_multiple %71, 16 : i32
    %73 = arith.index_cast %72 : i32 to index
    %c0_32 = arith.constant 0 : index
    %74 = vector.load %arg12[%73, %c0_32] : memref<128x512xf32, #tpu.memory_space<vmem>>, vector<16x512xf32>
    %cst_33 = arith.constant dense<0.000000e+00> : vector<16x512xf32>
    %75 = tpu.matmul %68, %1, %cst_33 {dimension_numbers = #tpu.dot_dimension_numbers<[1], [0], [0], [1], [0, 0, 1, 1], [], []>} : vector<16x128xf32>, vector<128x512xf32>, vector<16x512xf32> -> vector<16x512xf32>
    %76 = arith.addf %74, %75 : vector<16x512xf32>
    %77 = math.tanh %76 : vector<16x512xf32>
    %78 = vector.extract_strided_slice %77 {offsets = [0, 0], sizes = [16, 128], strides = [1, 1]} : vector<16x512xf32> to vector<16x128xf32>
    %cst_34 = arith.constant 5.000000e-01 : f32
    %79 = vector.broadcast %cst_34 : f32 to vector<16x128xf32>
    %80 = arith.mulf %79, %78 : vector<16x128xf32>
    %cst_35 = arith.constant 5.000000e-01 : f32
    %81 = vector.broadcast %cst_35 : f32 to vector<16x128xf32>
    %82 = arith.addf %80, %81 : vector<16x128xf32>
    %83 = vector.extract_strided_slice %77 {offsets = [0, 128], sizes = [16, 128], strides = [1, 1]} : vector<16x512xf32> to vector<16x128xf32>
    %cst_36 = arith.constant 5.000000e-01 : f32
    %84 = vector.broadcast %cst_36 : f32 to vector<16x128xf32>
    %85 = arith.mulf %84, %83 : vector<16x128xf32>
    %cst_37 = arith.constant 5.000000e-01 : f32
    %86 = vector.broadcast %cst_37 : f32 to vector<16x128xf32>
    %87 = arith.addf %85, %86 : vector<16x128xf32>
    %88 = vector.extract_strided_slice %77 {offsets = [0, 256], sizes = [16, 128], strides = [1, 1]} : vector<16x512xf32> to vector<16x128xf32>
    %89 = vector.extract_strided_slice %77 {offsets = [0, 384], sizes = [16, 128], strides = [1, 1]} : vector<16x512xf32> to vector<16x128xf32>
    %cst_38 = arith.constant 5.000000e-01 : f32
    %90 = vector.broadcast %cst_38 : f32 to vector<16x128xf32>
    %91 = arith.mulf %90, %89 : vector<16x128xf32>
    %cst_39 = arith.constant 5.000000e-01 : f32
    %92 = vector.broadcast %cst_39 : f32 to vector<16x128xf32>
    %93 = arith.addf %91, %92 : vector<16x128xf32>
    %94 = arith.mulf %87, %66 : vector<16x128xf32>
    %95 = arith.mulf %82, %88 : vector<16x128xf32>
    %96 = arith.addf %94, %95 : vector<16x128xf32>
    %97 = math.tanh %96 : vector<16x128xf32>
    %98 = arith.mulf %93, %97 : vector<16x128xf32>
    %99 = arith.index_cast %72 : i32 to index
    %c0_40 = arith.constant 0 : index
    %100 = vector.load %arg11[%99, %c0_40] : memref<128x128xf32, #tpu.memory_space<vmem>>, vector<16x128xf32>
    tpu.vector_store %arg11[%99, %c0_40], %98 {strides = array<i32>} : memref<128x128xf32, #tpu.memory_space<vmem>>, vector<16x128xf32>,
    %c3_i32 = arith.constant 3 : i32
    %c16_i32_41 = arith.constant 16 : i32
    %101 = arith.muli %c3_i32, %c16_i32_41 : i32
    %102 = tpu.assume_multiple %101, 16 : i32
    %103 = arith.index_cast %102 : i32 to index
    %c0_42 = arith.constant 0 : index
    %104 = vector.load %arg12[%103, %c0_42] : memref<128x512xf32, #tpu.memory_space<vmem>>, vector<16x512xf32>
    %cst_43 = arith.constant dense<0.000000e+00> : vector<16x512xf32>
    %105 = tpu.matmul %98, %1, %cst_43 {dimension_numbers = #tpu.dot_dimension_numbers<[1], [0], [0], [1], [0, 0, 1, 1], [], []>} : vector<16x128xf32>, vector<128x512xf32>, vector<16x512xf32> -> vector<16x512xf32>
    %106 = arith.addf %104, %105 : vector<16x512xf32>
    %107 = math.tanh %106 : vector<16x512xf32>
    %108 = vector.extract_strided_slice %107 {offsets = [0, 0], sizes = [16, 128], strides = [1, 1]} : vector<16x512xf32> to vector<16x128xf32>
    %cst_44 = arith.constant 5.000000e-01 : f32
    %109 = vector.broadcast %cst_44 : f32 to vector<16x128xf32>
    %110 = arith.mulf %109, %108 : vector<16x128xf32>
    %cst_45 = arith.constant 5.000000e-01 : f32
    %111 = vector.broadcast %cst_45 : f32 to vector<16x128xf32>
    %112 = arith.addf %110, %111 : vector<16x128xf32>
    %113 = vector.extract_strided_slice %107 {offsets = [0, 128], sizes = [16, 128], strides = [1, 1]} : vector<16x512xf32> to vector<16x128xf32>
    %cst_46 = arith.constant 5.000000e-01 : f32
    %114 = vector.broadcast %cst_46 : f32 to vector<16x128xf32>
    %115 = arith.mulf %114, %113 : vector<16x128xf32>
    %cst_47 = arith.constant 5.000000e-01 : f32
    %116 = vector.broadcast %cst_47 : f32 to vector<16x128xf32>
    %117 = arith.addf %115, %116 : vector<16x128xf32>
    %118 = vector.extract_strided_slice %107 {offsets = [0, 256], sizes = [16, 128], strides = [1, 1]} : vector<16x512xf32> to vector<16x128xf32>
    %119 = vector.extract_strided_slice %107 {offsets = [0, 384], sizes = [16, 128], strides = [1, 1]} : vector<16x512xf32> to vector<16x128xf32>
    %cst_48 = arith.constant 5.000000e-01 : f32
    %120 = vector.broadcast %cst_48 : f32 to vector<16x128xf32>
    %121 = arith.mulf %120, %119 : vector<16x128xf32>
    %cst_49 = arith.constant 5.000000e-01 : f32
    %122 = vector.broadcast %cst_49 : f32 to vector<16x128xf32>
    %123 = arith.addf %121, %122 : vector<16x128xf32>
    %124 = arith.mulf %117, %96 : vector<16x128xf32>
    %125 = arith.mulf %112, %118 : vector<16x128xf32>
    %126 = arith.addf %124, %125 : vector<16x128xf32>
    %127 = math.tanh %126 : vector<16x128xf32>
    %128 = arith.mulf %123, %127 : vector<16x128xf32>
    %129 = arith.index_cast %102 : i32 to index
    %c0_50 = arith.constant 0 : index
    %130 = vector.load %arg11[%129, %c0_50] : memref<128x128xf32, #tpu.memory_space<vmem>>, vector<16x128xf32>
    tpu.vector_store %arg11[%129, %c0_50], %128 {strides = array<i32>} : memref<128x128xf32, #tpu.memory_space<vmem>>, vector<16x128xf32>,
    %c4_i32 = arith.constant 4 : i32
    %c16_i32_51 = arith.constant 16 : i32
    %131 = arith.muli %c4_i32, %c16_i32_51 : i32
    %132 = tpu.assume_multiple %131, 16 : i32
    %133 = arith.index_cast %132 : i32 to index
    %c0_52 = arith.constant 0 : index
    %134 = vector.load %arg12[%133, %c0_52] : memref<128x512xf32, #tpu.memory_space<vmem>>, vector<16x512xf32>
    %cst_53 = arith.constant dense<0.000000e+00> : vector<16x512xf32>
    %135 = tpu.matmul %128, %1, %cst_53 {dimension_numbers = #tpu.dot_dimension_numbers<[1], [0], [0], [1], [0, 0, 1, 1], [], []>} : vector<16x128xf32>, vector<128x512xf32>, vector<16x512xf32> -> vector<16x512xf32>
    %136 = arith.addf %134, %135 : vector<16x512xf32>
    %137 = math.tanh %136 : vector<16x512xf32>
    %138 = vector.extract_strided_slice %137 {offsets = [0, 0], sizes = [16, 128], strides = [1, 1]} : vector<16x512xf32> to vector<16x128xf32>
    %cst_54 = arith.constant 5.000000e-01 : f32
    %139 = vector.broadcast %cst_54 : f32 to vector<16x128xf32>
    %140 = arith.mulf %139, %138 : vector<16x128xf32>
    %cst_55 = arith.constant 5.000000e-01 : f32
    %141 = vector.broadcast %cst_55 : f32 to vector<16x128xf32>
    %142 = arith.addf %140, %141 : vector<16x128xf32>
    %143 = vector.extract_strided_slice %137 {offsets = [0, 128], sizes = [16, 128], strides = [1, 1]} : vector<16x512xf32> to vector<16x128xf32>
    %cst_56 = arith.constant 5.000000e-01 : f32
    %144 = vector.broadcast %cst_56 : f32 to vector<16x128xf32>
    %145 = arith.mulf %144, %143 : vector<16x128xf32>
    %cst_57 = arith.constant 5.000000e-01 : f32
    %146 = vector.broadcast %cst_57 : f32 to vector<16x128xf32>
    %147 = arith.addf %145, %146 : vector<16x128xf32>
    %148 = vector.extract_strided_slice %137 {offsets = [0, 256], sizes = [16, 128], strides = [1, 1]} : vector<16x512xf32> to vector<16x128xf32>
    %149 = vector.extract_strided_slice %137 {offsets = [0, 384], sizes = [16, 128], strides = [1, 1]} : vector<16x512xf32> to vector<16x128xf32>
    %cst_58 = arith.constant 5.000000e-01 : f32
    %150 = vector.broadcast %cst_58 : f32 to vector<16x128xf32>
    %151 = arith.mulf %150, %149 : vector<16x128xf32>
    %cst_59 = arith.constant 5.000000e-01 : f32
    %152 = vector.broadcast %cst_59 : f32 to vector<16x128xf32>
    %153 = arith.addf %151, %152 : vector<16x128xf32>
    %154 = arith.mulf %147, %126 : vector<16x128xf32>
    %155 = arith.mulf %142, %148 : vector<16x128xf32>
    %156 = arith.addf %154, %155 : vector<16x128xf32>
    %157 = math.tanh %156 : vector<16x128xf32>
    %158 = arith.mulf %153, %157 : vector<16x128xf32>
    %159 = arith.index_cast %132 : i32 to index
    %c0_60 = arith.constant 0 : index
    %160 = vector.load %arg11[%159, %c0_60] : memref<128x128xf32, #tpu.memory_space<vmem>>, vector<16x128xf32>
    tpu.vector_store %arg11[%159, %c0_60], %158 {strides = array<i32>} : memref<128x128xf32, #tpu.memory_space<vmem>>, vector<16x128xf32>,
    %c5_i32 = arith.constant 5 : i32
    %c16_i32_61 = arith.constant 16 : i32
    %161 = arith.muli %c5_i32, %c16_i32_61 : i32
    %162 = tpu.assume_multiple %161, 16 : i32
    %163 = arith.index_cast %162 : i32 to index
    %c0_62 = arith.constant 0 : index
    %164 = vector.load %arg12[%163, %c0_62] : memref<128x512xf32, #tpu.memory_space<vmem>>, vector<16x512xf32>
    %cst_63 = arith.constant dense<0.000000e+00> : vector<16x512xf32>
    %165 = tpu.matmul %158, %1, %cst_63 {dimension_numbers = #tpu.dot_dimension_numbers<[1], [0], [0], [1], [0, 0, 1, 1], [], []>} : vector<16x128xf32>, vector<128x512xf32>, vector<16x512xf32> -> vector<16x512xf32>
    %166 = arith.addf %164, %165 : vector<16x512xf32>
    %167 = math.tanh %166 : vector<16x512xf32>
    %168 = vector.extract_strided_slice %167 {offsets = [0, 0], sizes = [16, 128], strides = [1, 1]} : vector<16x512xf32> to vector<16x128xf32>
    %cst_64 = arith.constant 5.000000e-01 : f32
    %169 = vector.broadcast %cst_64 : f32 to vector<16x128xf32>
    %170 = arith.mulf %169, %168 : vector<16x128xf32>
    %cst_65 = arith.constant 5.000000e-01 : f32
    %171 = vector.broadcast %cst_65 : f32 to vector<16x128xf32>
    %172 = arith.addf %170, %171 : vector<16x128xf32>
    %173 = vector.extract_strided_slice %167 {offsets = [0, 128], sizes = [16, 128], strides = [1, 1]} : vector<16x512xf32> to vector<16x128xf32>
    %cst_66 = arith.constant 5.000000e-01 : f32
    %174 = vector.broadcast %cst_66 : f32 to vector<16x128xf32>
    %175 = arith.mulf %174, %173 : vector<16x128xf32>
    %cst_67 = arith.constant 5.000000e-01 : f32
    %176 = vector.broadcast %cst_67 : f32 to vector<16x128xf32>
    %177 = arith.addf %175, %176 : vector<16x128xf32>
    %178 = vector.extract_strided_slice %167 {offsets = [0, 256], sizes = [16, 128], strides = [1, 1]} : vector<16x512xf32> to vector<16x128xf32>
    %179 = vector.extract_strided_slice %167 {offsets = [0, 384], sizes = [16, 128], strides = [1, 1]} : vector<16x512xf32> to vector<16x128xf32>
    %cst_68 = arith.constant 5.000000e-01 : f32
    %180 = vector.broadcast %cst_68 : f32 to vector<16x128xf32>
    %181 = arith.mulf %180, %179 : vector<16x128xf32>
    %cst_69 = arith.constant 5.000000e-01 : f32
    %182 = vector.broadcast %cst_69 : f32 to vector<16x128xf32>
    %183 = arith.addf %181, %182 : vector<16x128xf32>
    %184 = arith.mulf %177, %156 : vector<16x128xf32>
    %185 = arith.mulf %172, %178 : vector<16x128xf32>
    %186 = arith.addf %184, %185 : vector<16x128xf32>
    %187 = math.tanh %186 : vector<16x128xf32>
    %188 = arith.mulf %183, %187 : vector<16x128xf32>
    %189 = arith.index_cast %162 : i32 to index
    %c0_70 = arith.constant 0 : index
    %190 = vector.load %arg11[%189, %c0_70] : memref<128x128xf32, #tpu.memory_space<vmem>>, vector<16x128xf32>
    tpu.vector_store %arg11[%189, %c0_70], %188 {strides = array<i32>} : memref<128x128xf32, #tpu.memory_space<vmem>>, vector<16x128xf32>,
    %c6_i32 = arith.constant 6 : i32
    %c16_i32_71 = arith.constant 16 : i32
    %191 = arith.muli %c6_i32, %c16_i32_71 : i32
    %192 = tpu.assume_multiple %191, 16 : i32
    %193 = arith.index_cast %192 : i32 to index
    %c0_72 = arith.constant 0 : index
    %194 = vector.load %arg12[%193, %c0_72] : memref<128x512xf32, #tpu.memory_space<vmem>>, vector<16x512xf32>
    %cst_73 = arith.constant dense<0.000000e+00> : vector<16x512xf32>
    %195 = tpu.matmul %188, %1, %cst_73 {dimension_numbers = #tpu.dot_dimension_numbers<[1], [0], [0], [1], [0, 0, 1, 1], [], []>} : vector<16x128xf32>, vector<128x512xf32>, vector<16x512xf32> -> vector<16x512xf32>
    %196 = arith.addf %194, %195 : vector<16x512xf32>
    %197 = math.tanh %196 : vector<16x512xf32>
    %198 = vector.extract_strided_slice %197 {offsets = [0, 0], sizes = [16, 128], strides = [1, 1]} : vector<16x512xf32> to vector<16x128xf32>
    %cst_74 = arith.constant 5.000000e-01 : f32
    %199 = vector.broadcast %cst_74 : f32 to vector<16x128xf32>
    %200 = arith.mulf %199, %198 : vector<16x128xf32>
    %cst_75 = arith.constant 5.000000e-01 : f32
    %201 = vector.broadcast %cst_75 : f32 to vector<16x128xf32>
    %202 = arith.addf %200, %201 : vector<16x128xf32>
    %203 = vector.extract_strided_slice %197 {offsets = [0, 128], sizes = [16, 128], strides = [1, 1]} : vector<16x512xf32> to vector<16x128xf32>
    %cst_76 = arith.constant 5.000000e-01 : f32
    %204 = vector.broadcast %cst_76 : f32 to vector<16x128xf32>
    %205 = arith.mulf %204, %203 : vector<16x128xf32>
    %cst_77 = arith.constant 5.000000e-01 : f32
    %206 = vector.broadcast %cst_77 : f32 to vector<16x128xf32>
    %207 = arith.addf %205, %206 : vector<16x128xf32>
    %208 = vector.extract_strided_slice %197 {offsets = [0, 256], sizes = [16, 128], strides = [1, 1]} : vector<16x512xf32> to vector<16x128xf32>
    %209 = vector.extract_strided_slice %197 {offsets = [0, 384], sizes = [16, 128], strides = [1, 1]} : vector<16x512xf32> to vector<16x128xf32>
    %cst_78 = arith.constant 5.000000e-01 : f32
    %210 = vector.broadcast %cst_78 : f32 to vector<16x128xf32>
    %211 = arith.mulf %210, %209 : vector<16x128xf32>
    %cst_79 = arith.constant 5.000000e-01 : f32
    %212 = vector.broadcast %cst_79 : f32 to vector<16x128xf32>
    %213 = arith.addf %211, %212 : vector<16x128xf32>
    %214 = arith.mulf %207, %186 : vector<16x128xf32>
    %215 = arith.mulf %202, %208 : vector<16x128xf32>
    %216 = arith.addf %214, %215 : vector<16x128xf32>
    %217 = math.tanh %216 : vector<16x128xf32>
    %218 = arith.mulf %213, %217 : vector<16x128xf32>
    %219 = arith.index_cast %192 : i32 to index
    %c0_80 = arith.constant 0 : index
    %220 = vector.load %arg11[%219, %c0_80] : memref<128x128xf32, #tpu.memory_space<vmem>>, vector<16x128xf32>
    tpu.vector_store %arg11[%219, %c0_80], %218 {strides = array<i32>} : memref<128x128xf32, #tpu.memory_space<vmem>>, vector<16x128xf32>,
    %c7_i32 = arith.constant 7 : i32
    %c16_i32_81 = arith.constant 16 : i32
    %221 = arith.muli %c7_i32, %c16_i32_81 : i32
    %222 = tpu.assume_multiple %221, 16 : i32
    %223 = arith.index_cast %222 : i32 to index
    %c0_82 = arith.constant 0 : index
    %224 = vector.load %arg12[%223, %c0_82] : memref<128x512xf32, #tpu.memory_space<vmem>>, vector<16x512xf32>
    %cst_83 = arith.constant dense<0.000000e+00> : vector<16x512xf32>
    %225 = tpu.matmul %218, %1, %cst_83 {dimension_numbers = #tpu.dot_dimension_numbers<[1], [0], [0], [1], [0, 0, 1, 1], [], []>} : vector<16x128xf32>, vector<128x512xf32>, vector<16x512xf32> -> vector<16x512xf32>
    %226 = arith.addf %224, %225 : vector<16x512xf32>
    %227 = math.tanh %226 : vector<16x512xf32>
    %228 = vector.extract_strided_slice %227 {offsets = [0, 0], sizes = [16, 128], strides = [1, 1]} : vector<16x512xf32> to vector<16x128xf32>
    %cst_84 = arith.constant 5.000000e-01 : f32
    %229 = vector.broadcast %cst_84 : f32 to vector<16x128xf32>
    %230 = arith.mulf %229, %228 : vector<16x128xf32>
    %cst_85 = arith.constant 5.000000e-01 : f32
    %231 = vector.broadcast %cst_85 : f32 to vector<16x128xf32>
    %232 = arith.addf %230, %231 : vector<16x128xf32>
    %233 = vector.extract_strided_slice %227 {offsets = [0, 128], sizes = [16, 128], strides = [1, 1]} : vector<16x512xf32> to vector<16x128xf32>
    %cst_86 = arith.constant 5.000000e-01 : f32
    %234 = vector.broadcast %cst_86 : f32 to vector<16x128xf32>
    %235 = arith.mulf %234, %233 : vector<16x128xf32>
    %cst_87 = arith.constant 5.000000e-01 : f32
    %236 = vector.broadcast %cst_87 : f32 to vector<16x128xf32>
    %237 = arith.addf %235, %236 : vector<16x128xf32>
    %238 = vector.extract_strided_slice %227 {offsets = [0, 256], sizes = [16, 128], strides = [1, 1]} : vector<16x512xf32> to vector<16x128xf32>
    %239 = vector.extract_strided_slice %227 {offsets = [0, 384], sizes = [16, 128], strides = [1, 1]} : vector<16x512xf32> to vector<16x128xf32>
    %cst_88 = arith.constant 5.000000e-01 : f32
    %240 = vector.broadcast %cst_88 : f32 to vector<16x128xf32>
    %241 = arith.mulf %240, %239 : vector<16x128xf32>
    %cst_89 = arith.constant 5.000000e-01 : f32
    %242 = vector.broadcast %cst_89 : f32 to vector<16x128xf32>
    %243 = arith.addf %241, %242 : vector<16x128xf32>
    %244 = arith.mulf %237, %216 : vector<16x128xf32>
    %245 = arith.mulf %232, %238 : vector<16x128xf32>
    %246 = arith.addf %244, %245 : vector<16x128xf32>
    %247 = math.tanh %246 : vector<16x128xf32>
    %248 = arith.mulf %243, %247 : vector<16x128xf32>
    %249 = arith.index_cast %222 : i32 to index
    %c0_90 = arith.constant 0 : index
    %250 = vector.load %arg11[%249, %c0_90] : memref<128x128xf32, #tpu.memory_space<vmem>>, vector<16x128xf32>
    tpu.vector_store %arg11[%249, %c0_90], %248 {strides = array<i32>} : memref<128x128xf32, #tpu.memory_space<vmem>>, vector<16x128xf32>,
    %c8_i32 = arith.constant 8 : i32
    %c0_91 = arith.constant 0 : index
    %c0_92 = arith.constant 0 : index
    %251 = vector.load %arg5[%c0_91, %c0_92] : memref<128x512xf32, #tpu.memory_space<vmem>>, vector<128x512xf32>
    %c0_93 = arith.constant 0 : index
    %c0_94 = arith.constant 0 : index
    %252 = vector.load %arg6[%c0_93, %c0_94] : memref<128x512xf32, #tpu.memory_space<vmem>>, vector<128x512xf32>
    %c0_95 = arith.constant 0 : index
    %c0_96 = arith.constant 0 : index
    %253 = vector.load %arg7[%c0_95, %c0_96] : memref<1x512xf32, #tpu.memory_space<vmem>>, vector<1x512xf32>
    %c0_97 = arith.constant 0 : index
    %c0_98 = arith.constant 0 : index
    %254 = vector.load %arg11[%c0_97, %c0_98] : memref<128x128xf32, #tpu.memory_space<vmem>>, vector<128x128xf32>
    %cst_99 = arith.constant dense<0.000000e+00> : vector<128x512xf32>
    %255 = tpu.matmul %254, %251, %cst_99 {dimension_numbers = #tpu.dot_dimension_numbers<[1], [0], [0], [1], [0, 0, 1, 1], [], []>} : vector<128x128xf32>, vector<128x512xf32>, vector<128x512xf32> -> vector<128x512xf32>
    %256 = vector.broadcast %253 : vector<1x512xf32> to vector<128x512xf32>
    %257 = arith.addf %255, %256 : vector<128x512xf32>
    %c0_100 = arith.constant 0 : index
    %c0_101 = arith.constant 0 : index
    %258 = vector.load %arg12[%c0_100, %c0_101] : memref<128x512xf32, #tpu.memory_space<vmem>>, vector<128x512xf32>
    tpu.vector_store %arg12[%c0_100, %c0_101], %257 {strides = array<i32>} : memref<128x512xf32, #tpu.memory_space<vmem>>, vector<128x512xf32>,
    %cst_102 = arith.constant 0.000000e+00 : f32
    %259 = vector.broadcast %cst_102 : f32 to vector<16x128xf32>
    %cst_103 = arith.constant 0.000000e+00 : f32
    %260 = vector.broadcast %cst_103 : f32 to vector<16x128xf32>
    %c0_i32_104 = arith.constant 0 : i32
    %c16_i32_105 = arith.constant 16 : i32
    %261 = arith.muli %c0_i32_104, %c16_i32_105 : i32
    %262 = tpu.assume_multiple %261, 16 : i32
    %263 = arith.index_cast %262 : i32 to index
    %c0_106 = arith.constant 0 : index
    %264 = vector.load %arg12[%263, %c0_106] : memref<128x512xf32, #tpu.memory_space<vmem>>, vector<16x512xf32>
    %cst_107 = arith.constant dense<0.000000e+00> : vector<16x512xf32>
    %265 = tpu.matmul %259, %252, %cst_107 {dimension_numbers = #tpu.dot_dimension_numbers<[1], [0], [0], [1], [0, 0, 1, 1], [], []>} : vector<16x128xf32>, vector<128x512xf32>, vector<16x512xf32> -> vector<16x512xf32>
    %266 = arith.addf %264, %265 : vector<16x512xf32>
    %267 = math.tanh %266 : vector<16x512xf32>
    %268 = vector.extract_strided_slice %267 {offsets = [0, 0], sizes = [16, 128], strides = [1, 1]} : vector<16x512xf32> to vector<16x128xf32>
    %cst_108 = arith.constant 5.000000e-01 : f32
    %269 = vector.broadcast %cst_108 : f32 to vector<16x128xf32>
    %270 = arith.mulf %269, %268 : vector<16x128xf32>
    %cst_109 = arith.constant 5.000000e-01 : f32
    %271 = vector.broadcast %cst_109 : f32 to vector<16x128xf32>
    %272 = arith.addf %270, %271 : vector<16x128xf32>
    %273 = vector.extract_strided_slice %267 {offsets = [0, 128], sizes = [16, 128], strides = [1, 1]} : vector<16x512xf32> to vector<16x128xf32>
    %cst_110 = arith.constant 5.000000e-01 : f32
    %274 = vector.broadcast %cst_110 : f32 to vector<16x128xf32>
    %275 = arith.mulf %274, %273 : vector<16x128xf32>
    %cst_111 = arith.constant 5.000000e-01 : f32
    %276 = vector.broadcast %cst_111 : f32 to vector<16x128xf32>
    %277 = arith.addf %275, %276 : vector<16x128xf32>
    %278 = vector.extract_strided_slice %267 {offsets = [0, 256], sizes = [16, 128], strides = [1, 1]} : vector<16x512xf32> to vector<16x128xf32>
    %279 = vector.extract_strided_slice %267 {offsets = [0, 384], sizes = [16, 128], strides = [1, 1]} : vector<16x512xf32> to vector<16x128xf32>
    %cst_112 = arith.constant 5.000000e-01 : f32
    %280 = vector.broadcast %cst_112 : f32 to vector<16x128xf32>
    %281 = arith.mulf %280, %279 : vector<16x128xf32>
    %cst_113 = arith.constant 5.000000e-01 : f32
    %282 = vector.broadcast %cst_113 : f32 to vector<16x128xf32>
    %283 = arith.addf %281, %282 : vector<16x128xf32>
    %284 = arith.mulf %277, %260 : vector<16x128xf32>
    %285 = arith.mulf %272, %278 : vector<16x128xf32>
    %286 = arith.addf %284, %285 : vector<16x128xf32>
    %287 = math.tanh %286 : vector<16x128xf32>
    %288 = arith.mulf %283, %287 : vector<16x128xf32>
    %c1_i32_114 = arith.constant 1 : i32
    %c16_i32_115 = arith.constant 16 : i32
    %289 = arith.muli %c1_i32_114, %c16_i32_115 : i32
    %290 = tpu.assume_multiple %289, 16 : i32
    %291 = arith.index_cast %290 : i32 to index
    %c0_116 = arith.constant 0 : index
    %292 = vector.load %arg12[%291, %c0_116] : memref<128x512xf32, #tpu.memory_space<vmem>>, vector<16x512xf32>
    %cst_117 = arith.constant dense<0.000000e+00> : vector<16x512xf32>
    %293 = tpu.matmul %288, %252, %cst_117 {dimension_numbers = #tpu.dot_dimension_numbers<[1], [0], [0], [1], [0, 0, 1, 1], [], []>} : vector<16x128xf32>, vector<128x512xf32>, vector<16x512xf32> -> vector<16x512xf32>
    %294 = arith.addf %292, %293 : vector<16x512xf32>
    %295 = math.tanh %294 : vector<16x512xf32>
    %296 = vector.extract_strided_slice %295 {offsets = [0, 0], sizes = [16, 128], strides = [1, 1]} : vector<16x512xf32> to vector<16x128xf32>
    %cst_118 = arith.constant 5.000000e-01 : f32
    %297 = vector.broadcast %cst_118 : f32 to vector<16x128xf32>
    %298 = arith.mulf %297, %296 : vector<16x128xf32>
    %cst_119 = arith.constant 5.000000e-01 : f32
    %299 = vector.broadcast %cst_119 : f32 to vector<16x128xf32>
    %300 = arith.addf %298, %299 : vector<16x128xf32>
    %301 = vector.extract_strided_slice %295 {offsets = [0, 128], sizes = [16, 128], strides = [1, 1]} : vector<16x512xf32> to vector<16x128xf32>
    %cst_120 = arith.constant 5.000000e-01 : f32
    %302 = vector.broadcast %cst_120 : f32 to vector<16x128xf32>
    %303 = arith.mulf %302, %301 : vector<16x128xf32>
    %cst_121 = arith.constant 5.000000e-01 : f32
    %304 = vector.broadcast %cst_121 : f32 to vector<16x128xf32>
    %305 = arith.addf %303, %304 : vector<16x128xf32>
    %306 = vector.extract_strided_slice %295 {offsets = [0, 256], sizes = [16, 128], strides = [1, 1]} : vector<16x512xf32> to vector<16x128xf32>
    %307 = vector.extract_strided_slice %295 {offsets = [0, 384], sizes = [16, 128], strides = [1, 1]} : vector<16x512xf32> to vector<16x128xf32>
    %cst_122 = arith.constant 5.000000e-01 : f32
    %308 = vector.broadcast %cst_122 : f32 to vector<16x128xf32>
    %309 = arith.mulf %308, %307 : vector<16x128xf32>
    %cst_123 = arith.constant 5.000000e-01 : f32
    %310 = vector.broadcast %cst_123 : f32 to vector<16x128xf32>
    %311 = arith.addf %309, %310 : vector<16x128xf32>
    %312 = arith.mulf %305, %286 : vector<16x128xf32>
    %313 = arith.mulf %300, %306 : vector<16x128xf32>
    %314 = arith.addf %312, %313 : vector<16x128xf32>
    %315 = math.tanh %314 : vector<16x128xf32>
    %316 = arith.mulf %311, %315 : vector<16x128xf32>
    %c2_i32_124 = arith.constant 2 : i32
    %c16_i32_125 = arith.constant 16 : i32
    %317 = arith.muli %c2_i32_124, %c16_i32_125 : i32
    %318 = tpu.assume_multiple %317, 16 : i32
    %319 = arith.index_cast %318 : i32 to index
    %c0_126 = arith.constant 0 : index
    %320 = vector.load %arg12[%319, %c0_126] : memref<128x512xf32, #tpu.memory_space<vmem>>, vector<16x512xf32>
    %cst_127 = arith.constant dense<0.000000e+00> : vector<16x512xf32>
    %321 = tpu.matmul %316, %252, %cst_127 {dimension_numbers = #tpu.dot_dimension_numbers<[1], [0], [0], [1], [0, 0, 1, 1], [], []>} : vector<16x128xf32>, vector<128x512xf32>, vector<16x512xf32> -> vector<16x512xf32>
    %322 = arith.addf %320, %321 : vector<16x512xf32>
    %323 = math.tanh %322 : vector<16x512xf32>
    %324 = vector.extract_strided_slice %323 {offsets = [0, 0], sizes = [16, 128], strides = [1, 1]} : vector<16x512xf32> to vector<16x128xf32>
    %cst_128 = arith.constant 5.000000e-01 : f32
    %325 = vector.broadcast %cst_128 : f32 to vector<16x128xf32>
    %326 = arith.mulf %325, %324 : vector<16x128xf32>
    %cst_129 = arith.constant 5.000000e-01 : f32
    %327 = vector.broadcast %cst_129 : f32 to vector<16x128xf32>
    %328 = arith.addf %326, %327 : vector<16x128xf32>
    %329 = vector.extract_strided_slice %323 {offsets = [0, 128], sizes = [16, 128], strides = [1, 1]} : vector<16x512xf32> to vector<16x128xf32>
    %cst_130 = arith.constant 5.000000e-01 : f32
    %330 = vector.broadcast %cst_130 : f32 to vector<16x128xf32>
    %331 = arith.mulf %330, %329 : vector<16x128xf32>
    %cst_131 = arith.constant 5.000000e-01 : f32
    %332 = vector.broadcast %cst_131 : f32 to vector<16x128xf32>
    %333 = arith.addf %331, %332 : vector<16x128xf32>
    %334 = vector.extract_strided_slice %323 {offsets = [0, 256], sizes = [16, 128], strides = [1, 1]} : vector<16x512xf32> to vector<16x128xf32>
    %335 = vector.extract_strided_slice %323 {offsets = [0, 384], sizes = [16, 128], strides = [1, 1]} : vector<16x512xf32> to vector<16x128xf32>
    %cst_132 = arith.constant 5.000000e-01 : f32
    %336 = vector.broadcast %cst_132 : f32 to vector<16x128xf32>
    %337 = arith.mulf %336, %335 : vector<16x128xf32>
    %cst_133 = arith.constant 5.000000e-01 : f32
    %338 = vector.broadcast %cst_133 : f32 to vector<16x128xf32>
    %339 = arith.addf %337, %338 : vector<16x128xf32>
    %340 = arith.mulf %333, %314 : vector<16x128xf32>
    %341 = arith.mulf %328, %334 : vector<16x128xf32>
    %342 = arith.addf %340, %341 : vector<16x128xf32>
    %343 = math.tanh %342 : vector<16x128xf32>
    %344 = arith.mulf %339, %343 : vector<16x128xf32>
    %c3_i32_134 = arith.constant 3 : i32
    %c16_i32_135 = arith.constant 16 : i32
    %345 = arith.muli %c3_i32_134, %c16_i32_135 : i32
    %346 = tpu.assume_multiple %345, 16 : i32
    %347 = arith.index_cast %346 : i32 to index
    %c0_136 = arith.constant 0 : index
    %348 = vector.load %arg12[%347, %c0_136] : memref<128x512xf32, #tpu.memory_space<vmem>>, vector<16x512xf32>
    %cst_137 = arith.constant dense<0.000000e+00> : vector<16x512xf32>
    %349 = tpu.matmul %344, %252, %cst_137 {dimension_numbers = #tpu.dot_dimension_numbers<[1], [0], [0], [1], [0, 0, 1, 1], [], []>} : vector<16x128xf32>, vector<128x512xf32>, vector<16x512xf32> -> vector<16x512xf32>
    %350 = arith.addf %348, %349 : vector<16x512xf32>
    %351 = math.tanh %350 : vector<16x512xf32>
    %352 = vector.extract_strided_slice %351 {offsets = [0, 0], sizes = [16, 128], strides = [1, 1]} : vector<16x512xf32> to vector<16x128xf32>
    %cst_138 = arith.constant 5.000000e-01 : f32
    %353 = vector.broadcast %cst_138 : f32 to vector<16x128xf32>
    %354 = arith.mulf %353, %352 : vector<16x128xf32>
    %cst_139 = arith.constant 5.000000e-01 : f32
    %355 = vector.broadcast %cst_139 : f32 to vector<16x128xf32>
    %356 = arith.addf %354, %355 : vector<16x128xf32>
    %357 = vector.extract_strided_slice %351 {offsets = [0, 128], sizes = [16, 128], strides = [1, 1]} : vector<16x512xf32> to vector<16x128xf32>
    %cst_140 = arith.constant 5.000000e-01 : f32
    %358 = vector.broadcast %cst_140 : f32 to vector<16x128xf32>
    %359 = arith.mulf %358, %357 : vector<16x128xf32>
    %cst_141 = arith.constant 5.000000e-01 : f32
    %360 = vector.broadcast %cst_141 : f32 to vector<16x128xf32>
    %361 = arith.addf %359, %360 : vector<16x128xf32>
    %362 = vector.extract_strided_slice %351 {offsets = [0, 256], sizes = [16, 128], strides = [1, 1]} : vector<16x512xf32> to vector<16x128xf32>
    %363 = vector.extract_strided_slice %351 {offsets = [0, 384], sizes = [16, 128], strides = [1, 1]} : vector<16x512xf32> to vector<16x128xf32>
    %cst_142 = arith.constant 5.000000e-01 : f32
    %364 = vector.broadcast %cst_142 : f32 to vector<16x128xf32>
    %365 = arith.mulf %364, %363 : vector<16x128xf32>
    %cst_143 = arith.constant 5.000000e-01 : f32
    %366 = vector.broadcast %cst_143 : f32 to vector<16x128xf32>
    %367 = arith.addf %365, %366 : vector<16x128xf32>
    %368 = arith.mulf %361, %342 : vector<16x128xf32>
    %369 = arith.mulf %356, %362 : vector<16x128xf32>
    %370 = arith.addf %368, %369 : vector<16x128xf32>
    %371 = math.tanh %370 : vector<16x128xf32>
    %372 = arith.mulf %367, %371 : vector<16x128xf32>
    %c4_i32_144 = arith.constant 4 : i32
    %c16_i32_145 = arith.constant 16 : i32
    %373 = arith.muli %c4_i32_144, %c16_i32_145 : i32
    %374 = tpu.assume_multiple %373, 16 : i32
    %375 = arith.index_cast %374 : i32 to index
    %c0_146 = arith.constant 0 : index
    %376 = vector.load %arg12[%375, %c0_146] : memref<128x512xf32, #tpu.memory_space<vmem>>, vector<16x512xf32>
    %cst_147 = arith.constant dense<0.000000e+00> : vector<16x512xf32>
    %377 = tpu.matmul %372, %252, %cst_147 {dimension_numbers = #tpu.dot_dimension_numbers<[1], [0], [0], [1], [0, 0, 1, 1], [], []>} : vector<16x128xf32>, vector<128x512xf32>, vector<16x512xf32> -> vector<16x512xf32>
    %378 = arith.addf %376, %377 : vector<16x512xf32>
    %379 = math.tanh %378 : vector<16x512xf32>
    %380 = vector.extract_strided_slice %379 {offsets = [0, 0], sizes = [16, 128], strides = [1, 1]} : vector<16x512xf32> to vector<16x128xf32>
    %cst_148 = arith.constant 5.000000e-01 : f32
    %381 = vector.broadcast %cst_148 : f32 to vector<16x128xf32>
    %382 = arith.mulf %381, %380 : vector<16x128xf32>
    %cst_149 = arith.constant 5.000000e-01 : f32
    %383 = vector.broadcast %cst_149 : f32 to vector<16x128xf32>
    %384 = arith.addf %382, %383 : vector<16x128xf32>
    %385 = vector.extract_strided_slice %379 {offsets = [0, 128], sizes = [16, 128], strides = [1, 1]} : vector<16x512xf32> to vector<16x128xf32>
    %cst_150 = arith.constant 5.000000e-01 : f32
    %386 = vector.broadcast %cst_150 : f32 to vector<16x128xf32>
    %387 = arith.mulf %386, %385 : vector<16x128xf32>
    %cst_151 = arith.constant 5.000000e-01 : f32
    %388 = vector.broadcast %cst_151 : f32 to vector<16x128xf32>
    %389 = arith.addf %387, %388 : vector<16x128xf32>
    %390 = vector.extract_strided_slice %379 {offsets = [0, 256], sizes = [16, 128], strides = [1, 1]} : vector<16x512xf32> to vector<16x128xf32>
    %391 = vector.extract_strided_slice %379 {offsets = [0, 384], sizes = [16, 128], strides = [1, 1]} : vector<16x512xf32> to vector<16x128xf32>
    %cst_152 = arith.constant 5.000000e-01 : f32
    %392 = vector.broadcast %cst_152 : f32 to vector<16x128xf32>
    %393 = arith.mulf %392, %391 : vector<16x128xf32>
    %cst_153 = arith.constant 5.000000e-01 : f32
    %394 = vector.broadcast %cst_153 : f32 to vector<16x128xf32>
    %395 = arith.addf %393, %394 : vector<16x128xf32>
    %396 = arith.mulf %389, %370 : vector<16x128xf32>
    %397 = arith.mulf %384, %390 : vector<16x128xf32>
    %398 = arith.addf %396, %397 : vector<16x128xf32>
    %399 = math.tanh %398 : vector<16x128xf32>
    %400 = arith.mulf %395, %399 : vector<16x128xf32>
    %c5_i32_154 = arith.constant 5 : i32
    %c16_i32_155 = arith.constant 16 : i32
    %401 = arith.muli %c5_i32_154, %c16_i32_155 : i32
    %402 = tpu.assume_multiple %401, 16 : i32
    %403 = arith.index_cast %402 : i32 to index
    %c0_156 = arith.constant 0 : index
    %404 = vector.load %arg12[%403, %c0_156] : memref<128x512xf32, #tpu.memory_space<vmem>>, vector<16x512xf32>
    %cst_157 = arith.constant dense<0.000000e+00> : vector<16x512xf32>
    %405 = tpu.matmul %400, %252, %cst_157 {dimension_numbers = #tpu.dot_dimension_numbers<[1], [0], [0], [1], [0, 0, 1, 1], [], []>} : vector<16x128xf32>, vector<128x512xf32>, vector<16x512xf32> -> vector<16x512xf32>
    %406 = arith.addf %404, %405 : vector<16x512xf32>
    %407 = math.tanh %406 : vector<16x512xf32>
    %408 = vector.extract_strided_slice %407 {offsets = [0, 0], sizes = [16, 128], strides = [1, 1]} : vector<16x512xf32> to vector<16x128xf32>
    %cst_158 = arith.constant 5.000000e-01 : f32
    %409 = vector.broadcast %cst_158 : f32 to vector<16x128xf32>
    %410 = arith.mulf %409, %408 : vector<16x128xf32>
    %cst_159 = arith.constant 5.000000e-01 : f32
    %411 = vector.broadcast %cst_159 : f32 to vector<16x128xf32>
    %412 = arith.addf %410, %411 : vector<16x128xf32>
    %413 = vector.extract_strided_slice %407 {offsets = [0, 128], sizes = [16, 128], strides = [1, 1]} : vector<16x512xf32> to vector<16x128xf32>
    %cst_160 = arith.constant 5.000000e-01 : f32
    %414 = vector.broadcast %cst_160 : f32 to vector<16x128xf32>
    %415 = arith.mulf %414, %413 : vector<16x128xf32>
    %cst_161 = arith.constant 5.000000e-01 : f32
    %416 = vector.broadcast %cst_161 : f32 to vector<16x128xf32>
    %417 = arith.addf %415, %416 : vector<16x128xf32>
    %418 = vector.extract_strided_slice %407 {offsets = [0, 256], sizes = [16, 128], strides = [1, 1]} : vector<16x512xf32> to vector<16x128xf32>
    %419 = vector.extract_strided_slice %407 {offsets = [0, 384], sizes = [16, 128], strides = [1, 1]} : vector<16x512xf32> to vector<16x128xf32>
    %cst_162 = arith.constant 5.000000e-01 : f32
    %420 = vector.broadcast %cst_162 : f32 to vector<16x128xf32>
    %421 = arith.mulf %420, %419 : vector<16x128xf32>
    %cst_163 = arith.constant 5.000000e-01 : f32
    %422 = vector.broadcast %cst_163 : f32 to vector<16x128xf32>
    %423 = arith.addf %421, %422 : vector<16x128xf32>
    %424 = arith.mulf %417, %398 : vector<16x128xf32>
    %425 = arith.mulf %412, %418 : vector<16x128xf32>
    %426 = arith.addf %424, %425 : vector<16x128xf32>
    %427 = math.tanh %426 : vector<16x128xf32>
    %428 = arith.mulf %423, %427 : vector<16x128xf32>
    %c6_i32_164 = arith.constant 6 : i32
    %c16_i32_165 = arith.constant 16 : i32
    %429 = arith.muli %c6_i32_164, %c16_i32_165 : i32
    %430 = tpu.assume_multiple %429, 16 : i32
    %431 = arith.index_cast %430 : i32 to index
    %c0_166 = arith.constant 0 : index
    %432 = vector.load %arg12[%431, %c0_166] : memref<128x512xf32, #tpu.memory_space<vmem>>, vector<16x512xf32>
    %cst_167 = arith.constant dense<0.000000e+00> : vector<16x512xf32>
    %433 = tpu.matmul %428, %252, %cst_167 {dimension_numbers = #tpu.dot_dimension_numbers<[1], [0], [0], [1], [0, 0, 1, 1], [], []>} : vector<16x128xf32>, vector<128x512xf32>, vector<16x512xf32> -> vector<16x512xf32>
    %434 = arith.addf %432, %433 : vector<16x512xf32>
    %435 = math.tanh %434 : vector<16x512xf32>
    %436 = vector.extract_strided_slice %435 {offsets = [0, 0], sizes = [16, 128], strides = [1, 1]} : vector<16x512xf32> to vector<16x128xf32>
    %cst_168 = arith.constant 5.000000e-01 : f32
    %437 = vector.broadcast %cst_168 : f32 to vector<16x128xf32>
    %438 = arith.mulf %437, %436 : vector<16x128xf32>
    %cst_169 = arith.constant 5.000000e-01 : f32
    %439 = vector.broadcast %cst_169 : f32 to vector<16x128xf32>
    %440 = arith.addf %438, %439 : vector<16x128xf32>
    %441 = vector.extract_strided_slice %435 {offsets = [0, 128], sizes = [16, 128], strides = [1, 1]} : vector<16x512xf32> to vector<16x128xf32>
    %cst_170 = arith.constant 5.000000e-01 : f32
    %442 = vector.broadcast %cst_170 : f32 to vector<16x128xf32>
    %443 = arith.mulf %442, %441 : vector<16x128xf32>
    %cst_171 = arith.constant 5.000000e-01 : f32
    %444 = vector.broadcast %cst_171 : f32 to vector<16x128xf32>
    %445 = arith.addf %443, %444 : vector<16x128xf32>
    %446 = vector.extract_strided_slice %435 {offsets = [0, 256], sizes = [16, 128], strides = [1, 1]} : vector<16x512xf32> to vector<16x128xf32>
    %447 = vector.extract_strided_slice %435 {offsets = [0, 384], sizes = [16, 128], strides = [1, 1]} : vector<16x512xf32> to vector<16x128xf32>
    %cst_172 = arith.constant 5.000000e-01 : f32
    %448 = vector.broadcast %cst_172 : f32 to vector<16x128xf32>
    %449 = arith.mulf %448, %447 : vector<16x128xf32>
    %cst_173 = arith.constant 5.000000e-01 : f32
    %450 = vector.broadcast %cst_173 : f32 to vector<16x128xf32>
    %451 = arith.addf %449, %450 : vector<16x128xf32>
    %452 = arith.mulf %445, %426 : vector<16x128xf32>
    %453 = arith.mulf %440, %446 : vector<16x128xf32>
    %454 = arith.addf %452, %453 : vector<16x128xf32>
    %455 = math.tanh %454 : vector<16x128xf32>
    %456 = arith.mulf %451, %455 : vector<16x128xf32>
    %c7_i32_174 = arith.constant 7 : i32
    %c16_i32_175 = arith.constant 16 : i32
    %457 = arith.muli %c7_i32_174, %c16_i32_175 : i32
    %458 = tpu.assume_multiple %457, 16 : i32
    %459 = arith.index_cast %458 : i32 to index
    %c0_176 = arith.constant 0 : index
    %460 = vector.load %arg12[%459, %c0_176] : memref<128x512xf32, #tpu.memory_space<vmem>>, vector<16x512xf32>
    %cst_177 = arith.constant dense<0.000000e+00> : vector<16x512xf32>
    %461 = tpu.matmul %456, %252, %cst_177 {dimension_numbers = #tpu.dot_dimension_numbers<[1], [0], [0], [1], [0, 0, 1, 1], [], []>} : vector<16x128xf32>, vector<128x512xf32>, vector<16x512xf32> -> vector<16x512xf32>
    %462 = arith.addf %460, %461 : vector<16x512xf32>
    %463 = math.tanh %462 : vector<16x512xf32>
    %464 = vector.extract_strided_slice %463 {offsets = [0, 0], sizes = [16, 128], strides = [1, 1]} : vector<16x512xf32> to vector<16x128xf32>
    %cst_178 = arith.constant 5.000000e-01 : f32
    %465 = vector.broadcast %cst_178 : f32 to vector<16x128xf32>
    %466 = arith.mulf %465, %464 : vector<16x128xf32>
    %cst_179 = arith.constant 5.000000e-01 : f32
    %467 = vector.broadcast %cst_179 : f32 to vector<16x128xf32>
    %468 = arith.addf %466, %467 : vector<16x128xf32>
    %469 = vector.extract_strided_slice %463 {offsets = [0, 128], sizes = [16, 128], strides = [1, 1]} : vector<16x512xf32> to vector<16x128xf32>
    %cst_180 = arith.constant 5.000000e-01 : f32
    %470 = vector.broadcast %cst_180 : f32 to vector<16x128xf32>
    %471 = arith.mulf %470, %469 : vector<16x128xf32>
    %cst_181 = arith.constant 5.000000e-01 : f32
    %472 = vector.broadcast %cst_181 : f32 to vector<16x128xf32>
    %473 = arith.addf %471, %472 : vector<16x128xf32>
    %474 = vector.extract_strided_slice %463 {offsets = [0, 256], sizes = [16, 128], strides = [1, 1]} : vector<16x512xf32> to vector<16x128xf32>
    %475 = vector.extract_strided_slice %463 {offsets = [0, 384], sizes = [16, 128], strides = [1, 1]} : vector<16x512xf32> to vector<16x128xf32>
    %cst_182 = arith.constant 5.000000e-01 : f32
    %476 = vector.broadcast %cst_182 : f32 to vector<16x128xf32>
    %477 = arith.mulf %476, %475 : vector<16x128xf32>
    %cst_183 = arith.constant 5.000000e-01 : f32
    %478 = vector.broadcast %cst_183 : f32 to vector<16x128xf32>
    %479 = arith.addf %477, %478 : vector<16x128xf32>
    %480 = arith.mulf %473, %454 : vector<16x128xf32>
    %481 = arith.mulf %468, %474 : vector<16x128xf32>
    %482 = arith.addf %480, %481 : vector<16x128xf32>
    %483 = math.tanh %482 : vector<16x128xf32>
    %484 = arith.mulf %479, %483 : vector<16x128xf32>
    %c8_i32_184 = arith.constant 8 : i32
    %c0_185 = arith.constant 0 : index
    %c0_186 = arith.constant 0 : index
    %485 = vector.load %arg8[%c0_185, %c0_186] : memref<128x128xf32, #tpu.memory_space<vmem>>, vector<128x128xf32>
    %cst_187 = arith.constant dense<0.000000e+00> : vector<16x128xf32>
    %486 = tpu.matmul %484, %485, %cst_187 {dimension_numbers = #tpu.dot_dimension_numbers<[1], [0], [0], [1], [0, 0, 1, 1], [], []>} : vector<16x128xf32>, vector<128x128xf32>, vector<16x128xf32> -> vector<16x128xf32>
    %c0_188 = arith.constant 0 : index
    %c0_189 = arith.constant 0 : index
    %487 = vector.load %arg9[%c0_188, %c0_189] : memref<1x128xf32, #tpu.memory_space<vmem>>, vector<1x128xf32>
    %488 = vector.broadcast %487 : vector<1x128xf32> to vector<16x128xf32>
    %489 = arith.addf %486, %488 : vector<16x128xf32>
    %c0_190 = arith.constant 0 : index
    %c0_191 = arith.constant 0 : index
    %c0_192 = arith.constant 0 : index
    %490 = vector.load %arg10[%c0_190, %c0_191, %c0_192] : memref<1x16x128xf32, #tpu.memory_space<vmem>>, vector<1x16x128xf32>
    %491 = vector.shape_cast %490 : vector<1x16x128xf32> to vector<16x128xf32>
    %492 = vector.shape_cast %489 : vector<16x128xf32> to vector<1x16x128xf32>
    tpu.vector_store %arg10[%c0_190, %c0_191, %c0_192], %492 {strides = array<i32>} : memref<1x16x128xf32, #tpu.memory_space<vmem>>, vector<1x16x128xf32>,
    return
  }
  func.func @transform_0(%arg0: i32) -> (i32, i32, i32) {
    %c0_i32 = arith.constant 0 : i32
    %c0_i32_0 = arith.constant 0 : i32
    %c0_i32_1 = arith.constant 0 : i32
    return %arg0, %c0_i32, %c0_i32_0 : i32, i32, i32
  }
  func.func @transform_1(%arg0: i32) -> (i32, i32) {
    %c0_i32 = arith.constant 0 : i32
    %c0_i32_0 = arith.constant 0 : i32
    %c0_i32_1 = arith.constant 0 : i32
    return %c0_i32, %c0_i32_0 : i32, i32
  }
  func.func @transform_2(%arg0: i32) -> (i32, i32) {
    %c0_i32 = arith.constant 0 : i32
    %c0_i32_0 = arith.constant 0 : i32
    %c0_i32_1 = arith.constant 0 : i32
    return %c0_i32, %c0_i32_0 : i32, i32
  }
  func.func @transform_3(%arg0: i32) -> (i32, i32) {
    %c0_i32 = arith.constant 0 : i32
    %c0_i32_0 = arith.constant 0 : i32
    %c0_i32_1 = arith.constant 0 : i32
    return %c0_i32, %c0_i32_0 : i32, i32
  }
  func.func @transform_4(%arg0: i32) -> (i32, i32) {
    %c0_i32 = arith.constant 0 : i32
    %c0_i32_0 = arith.constant 0 : i32
    %c0_i32_1 = arith.constant 0 : i32
    return %c0_i32, %c0_i32_0 : i32, i32
  }
  func.func @transform_5(%arg0: i32) -> (i32, i32) {
    %c0_i32 = arith.constant 0 : i32
    %c0_i32_0 = arith.constant 0 : i32
    %c0_i32_1 = arith.constant 0 : i32
    return %c0_i32, %c0_i32_0 : i32, i32
  }
  func.func @transform_6(%arg0: i32) -> (i32, i32) {
    %c0_i32 = arith.constant 0 : i32
    %c0_i32_0 = arith.constant 0 : i32
    %c0_i32_1 = arith.constant 0 : i32
    return %c0_i32, %c0_i32_0 : i32, i32
  }
  func.func @transform_7(%arg0: i32) -> (i32, i32) {
    %c0_i32 = arith.constant 0 : i32
    %c0_i32_0 = arith.constant 0 : i32
    %c0_i32_1 = arith.constant 0 : i32
    return %c0_i32, %c0_i32_0 : i32, i32
  }
  func.func @transform_8(%arg0: i32) -> (i32, i32) {
    %c0_i32 = arith.constant 0 : i32
    %c0_i32_0 = arith.constant 0 : i32
    %c0_i32_1 = arith.constant 0 : i32
    return %c0_i32, %c0_i32_0 : i32, i32
  }
  func.func @transform_9(%arg0: i32) -> (i32, i32, i32) {
    %c0_i32 = arith.constant 0 : i32
    %c0_i32_0 = arith.constant 0 : i32
    %c0_i32_1 = arith.constant 0 : i32
    return %arg0, %c0_i32, %c0_i32_0 : i32, i32, i32
  }
}

</mosaic_0001>

<bundles_post_ra>
// kernel: tpu_custom_call.1
= control target key start
LH: loop header
LB: loop body
LE: loop exit
PB: predicated region body
PF: predicated region fallthrough
CT: control target
= control target key end

     0   :  { %14 = vsyncpa [#allocation5], 0  ;;  %s6624_s0 = inlined_call_operand.vmem [shape: f32[1,128,16], index: 0, kind: input, shape index: {}]   ;;  %s6625_s1 = inlined_call_operand.hbm [shape: f32[16,512], index: 1, kind: input, shape index: {}]   ;;  %s6626_s2 = inlined_call_operand.hbm [shape: f32[128,512], index: 2, kind: input, shape index: {}]   ;;  %s6627_s3 = inlined_call_operand.vmem [shape: f32[1,512], index: 3, kind: input, shape index: {}]   ;;  %s6628_s4 = inlined_call_operand.hbm [shape: f32[128,512], index: 4, kind: input, shape index: {}]   ;;  %s6629_s5 = inlined_call_operand.hbm [shape: f32[128,512], index: 5, kind: input, shape index: {}]   ;;  %s6630_s6 = inlined_call_operand.vmem [shape: f32[1,512], index: 6, kind: input, shape index: {}]   ;;  %s6631_s7 = inlined_call_operand.vmem [shape: f32[128,128], index: 7, kind: input, shape index: {}]   ;;  %s6632_s8 = inlined_call_operand.vmem [shape: f32[1,128], index: 8, kind: input, shape index: {}]   ;;  %s6633_s9 = inlined_call_operand.hbm [shape: f32[1,16,128], index: 9, kind: output, shape index: {}]  }
   0x1   :  { %15 = vsyncpa [#allocation8], 0 }
   0x2   :  { %16 = vsyncpa [#allocation11], 0 }
   0x3   :  { %17 = vsyncpa [#allocation6], 0  ;;  %s37_s11 = sshll.u32 %s6626_s2, 4  ;;  %s4041_s12 = smov [#allocation7]   ;;  %s38_s11 = int_to_ptr.hbm [resolvable:$true] %s37_s11 }
   0x4   :  { %s39_s13 = sshll.u32 %s4041_s12, 4  ;;  %s24_s16 = sshll.u32 %s6625_s1, 4  ;;  %s40_s13 = int_to_ptr.vmem [resolvable:$true] %s39_s13  ;;  %s25_s16 = int_to_ptr.hbm [resolvable:$true] %s24_s16 }
   0x5   :  { %s4042_s17 = smov 512   ;;  %s4043_s18 = smov 32  }
   0x6   :  { %45 = dma.hbm_to_vmem [thread:$0]  %s38_s11, 8192, %s40_s13, [#allocation8], %s4042_s17, %s4042_s17, %s4043_s18  }
   0x7   :  { %s4044_s19 = smov [#allocation4]   ;;  %s52_s23 = sshll.u32 %s6628_s4, 4  ;;  %s53_s23 = int_to_ptr.hbm [resolvable:$true] %s52_s23 }
   0x8   :  { %s26_s20 = sshll.u32 %s4044_s19, 4  ;;  %s65_s25 = sshll.u32 %s6629_s5, 4  ;;  %s27_s20 = int_to_ptr.vmem [resolvable:$true] %s26_s20  ;;  %s66_s25 = int_to_ptr.hbm [resolvable:$true] %s65_s25 }
   0x9   :  { %32 = dma.hbm_to_vmem [thread:$0]  %s25_s16, 1024, %s27_s20, [#allocation5], %s4042_s17, %s4042_s17, %s4043_s18  }
   0xa   :  { %s4045_s26 = smov [#allocation9]   ;;  %s4046_s1 = smov [#allocation10]  }
   0xb   :  { %s54_s27 = sshll.u32 %s4045_s26, 4  ;;  %s67_s28 = sshll.u32 %s4046_s1, 4  ;;  %s55_s27 = int_to_ptr.vmem [resolvable:$true] %s54_s27  ;;  %s68_s28 = int_to_ptr.vmem [resolvable:$true] %s67_s28 }
   0xc   :  { %60 = dma.hbm_to_vmem [thread:$0]  %s53_s23, 8192, %s55_s27, [#allocation8], %s4042_s17, %s4042_s17, %s4043_s18  }
   0xd   :  { %73 = dma.hbm_to_vmem [thread:$0]  %s66_s25, 8192, %s68_s28, [#allocation11], %s4042_s17, %s4042_s17, %s4043_s18  }
   0xe   :  { %4033 = dma.done.wait [#allocation5], 1024  }
   0xf   :  { %4034 = vsyncadd [#allocation5], 4294966272 }
  0x10   :  { %4035 = dma.done.wait [#allocation8], 16384  }
  0x11   :  { %4036 = vsyncadd [#allocation8], 4294950912 }
  0x12   :  { %4037 = dma.done.wait [#allocation11], 8192  }
  0x13   :  { %4038 = vsyncadd [#allocation11], 4294959104  ;;  %v100_v0 = vld [vmem:[#allocation4 + $0x20] sm:$0xff]  ;;  %vm194_vm0 = vcmask 130048   ;;  %v4119_v3 = vld [vmem:[%s6624_s0 + $0x68] sm:$0xff]  ;;  %s4048_s19 = smov [#allocation12]  }
  0x14   :  { %v96_v1 = vld [vmem:[#allocation4] sm:$0xff]  ;;  %257 = vmatpush.msra.mxu0 %v100_v0  ;;  %3437 = vmatpush.msra.mxu1 %v100_v0  ;;  %v4124_v4 = vld [vmem:[%s6624_s0 + $0x70] sm:$0xff]  ;;  %v4129_v5 = vld [vmem:[%s6624_s0 + $0x78] sm:$0xff]  ;;  %s3349_s20 = sshll.u32 %s4048_s19, 4  ;;  %s3351_s23 = sshll.u32 %s6633_s9, 4  ;;  %s3350_s20 = int_to_ptr.vmem [resolvable:$true] %s3349_s20  ;;  %s3352_s23 = int_to_ptr.hbm [resolvable:$true] %s3351_s23 }
  0x15   :  { %3438 = vmatpush.msra.mxu2 %v100_v0  ;;  %3439 = vmatpush.msra.mxu3 %v100_v0  ;;  %v169_v2 = vld [vmem:[%s6624_s0] sm:$0xff]  ;;  %v102_v6 = vld [vmem:[#allocation4 + $0x30] sm:$0xff]  ;;  %v101_v7 = vld [vmem:[#allocation4 + $0x28] sm:$0xff]  ;;  %s4049_s2 = smov 128   ;;  %s4050_s24 = smov 8  }
  0x16   :  { %258 = vmatpush.msra.mxu0 %v96_v1  ;;  %3440 = vmatpush.msra.mxu1 %v96_v1  ;;  %v103_v8 = vld [vmem:[#allocation4 + $0x38] sm:$0xff]  ;;  %v98_v9 = vld [vmem:[#allocation4 + $0x10] sm:$0xff]  ;;  %v97_v10 = vld [vmem:[#allocation4 + $0x8] sm:$0xff] }
  0x17   :  { %3441 = vmatpush.msra.mxu2 %v96_v1  ;;  %3442 = vmatpush.msra.mxu3 %v96_v1  ;;  %v99_v11 = vld [vmem:[#allocation4 + $0x18] sm:$0xff]  ;;  %v4138_v12 = vld [vmem:[#allocation7 + $0x1f0] sm:$0xff]  ;;  %v4140_v13 = vld [vmem:[#allocation7 + $0x1e8] sm:$0xff] }
  0x18   :  { %3373 = vmatmul.msk.f32.vlgmr.msra.gmra.mxu0 %vm194_vm0, %v169_v2  ;;  %3386 = vmatmul.msk.f32.vlgmr.msra.gmra.mxu1 %vm194_vm0, %v4119_v3  ;;  %v4142_v14 = vld [vmem:[#allocation7 + $0x1f8] sm:$0xff]  ;;  %v4144_v15 = vld [vmem:[#allocation7 + $0x1d0] sm:$0xff]  ;;  %v4146_v16 = vld [vmem:[#allocation7 + $0x1e0] sm:$0xff] }
  0x19   :  { %3387 = vmatmul.msk.f32.vlgmr.msra.gmra.mxu2 %vm194_vm0, %v4124_v4  ;;  %3388 = vmatmul.msk.f32.vlgmr.msra.gmra.mxu3 %vm194_vm0, %v4129_v5  ;;  %6860 = vst [vmem:[#allocation17_spill] sm:$0xff] %v4146_v16  ;;  %v170_v17 = vld [vmem:[%s6624_s0 + $0x8] sm:$0xff]  ;;  %v4157_v19 = vld [vmem:[#allocation7 + $0x1d8] sm:$0xff]  ;;  %v4162_v20 = vld [vmem:[#allocation7 + $0x1b0] sm:$0xff] }
  0x1a   :  { %387 = vmatpush.msrb.mxu2 %v102_v6  ;;  %322 = vmatpush.msrb.mxu1 %v101_v7  ;;  %v4155_v18 = vld [vmem:[#allocation7 + $0x1c8] sm:$0xff]  ;;  %6861 = vst [vmem:[#allocation18_spill] sm:$0xff] %v4157_v19  ;;  %v4168_v22 = vld [vmem:[#allocation7 + $0x1b8] sm:$0xff]  ;;  %v4170_v23 = vld [vmem:[#allocation7 + $0x1c0] sm:$0xff] }
  0x1b   :  { %452 = vmatpush.msrb.mxu3 %v103_v8  ;;  %578 = vmatpush.msrb.mxu0 %v4146_v16  ;;  %6862 = vst [vmem:[#allocation19_spill] sm:$0xff] %v4162_v20  ;;  %v4166_v21 = vld [vmem:[#allocation7 + $0x1a8] sm:$0xff]  ;;  %v4174_v24 = vld [vmem:[#allocation7 + $0x190] sm:$0xff]  ;;  %v4176_v25 = vld [vmem:[#allocation7 + $0x1a0] sm:$0xff] }
  0x1c   :  { %388 = vmatpush.msrb.mxu2 %v98_v9  ;;  %323 = vmatpush.msrb.mxu1 %v97_v10  ;;  %6863 = vst [vmem:[#allocation20_spill] sm:$0xff] %v4170_v23  ;;  %v4179_v26 = vld [vmem:[#allocation7 + $0x188] sm:$0xff]  ;;  %v4181_v27 = vld [vmem:[#allocation7 + $0x198] sm:$0xff]  ;;  %v4186_v28 = vld [vmem:[#allocation7 + $0x170] sm:$0xff] }
  0x1d   :  { %453 = vmatpush.msrb.mxu3 %v99_v11  ;;  %6864 = vst [vmem:[#allocation21_spill] sm:$0xff] %v4176_v25  ;;  %579 = vmatpush.msrb.mxu0 %v4170_v23  ;;  %v171_v29 = vld [vmem:[%s6624_s0 + $0x10] sm:$0xff]  ;;  %v4196_v30 = vld [vmem:[#allocation7 + $0x168] sm:$0xff]  ;;  %v4198_v31 = vld [vmem:[#allocation7 + $0x178] sm:$0xff] }
  0x1e   :  { %624 = vmatpush.msra.mxu2 %v4138_v12  ;;  %601 = vmatpush.msra.mxu1 %v4140_v13  ;;  %v4204_v32 = vld [vmem:[#allocation7 + $0x150] sm:$0xff]  ;;  %v4206_v33 = vld [vmem:[#allocation7 + $0x148] sm:$0xff]  ;;  %v4208_v34 = vld [vmem:[#allocation7 + $0x180] sm:$0xff] }
  0x1f   :  { %647 = vmatpush.msra.mxu3 %v4142_v14  ;;  %580 = vmatpush.msrb.mxu0 %v4176_v25  ;;  %6865 = vst [vmem:[#allocation22_spill] sm:$0xff] %v4208_v34  ;;  %v4212_v35 = vld [vmem:[#allocation7 + $0x158] sm:$0xff]  ;;  %v4225_v37 = vld [vmem:[#allocation7 + $0x130] sm:$0xff]  ;;  %v4227_v38 = vld [vmem:[#allocation7 + $0x128] sm:$0xff] }
  0x20   :  { %625 = vmatpush.msra.mxu2 %v4144_v15  ;;  %3374 = vmatmul.msk.f32.gmra.mxu0 %vm194_vm0, %v170_v17  ;;  %v172_v36 = vld [vmem:[%s6624_s0 + $0x18] sm:$0xff]  ;;  %v4229_v39 = vld [vmem:[#allocation7 + $0x160] sm:$0xff]  ;;  %v4244_v42 = vld [vmem:[#allocation7 + $0x110] sm:$0xff] }
  0x21   :  { %3389 = vmatmul.msk.f32.vlgmr.msrb.gmra.mxu1 %vm194_vm0, %v169_v2  ;;  %3405 = vmatmul.msk.f32.vlgmr.msrb.gmra.mxu2 %vm194_vm0, %v169_v2  ;;  %6866 = vst [vmem:[#allocation23_spill] sm:$0xff] %v4229_v39  ;;  %v4233_v40 = vld [vmem:[#allocation7 + $0x138] sm:$0xff]  ;;  %v173_v41 = vld [vmem:[%s6624_s0 + $0x20] sm:$0xff]  ;;  %v4246_v43 = vld [vmem:[#allocation7 + $0x108] sm:$0xff] }
  0x22   :  { %3421 = vmatmul.msk.f32.vlgmr.msrb.gmra.mxu3 %vm194_vm0, %v169_v2  ;;  %602 = vmatpush.msra.mxu1 %v4155_v18  ;;  %v4248_v44 = vld [vmem:[#allocation7 + $0x140] sm:$0xff]  ;;  %v4252_v45 = vld [vmem:[#allocation7 + $0x118] sm:$0xff]  ;;  %v174_v46 = vld [vmem:[%s6624_s0 + $0x28] sm:$0xff] }
  0x23   :  { %648 = vmatpush.msra.mxu3 %v4157_v19  ;;  %626 = vmatpush.msra.mxu2 %v4162_v20  ;;  %6867 = vst [vmem:[#allocation24_spill] sm:$0xff] %v4248_v44  ;;  %v4263_v47 = vld [vmem:[#allocation7 + $0xf0] sm:$0xff]  ;;  %v4265_v48 = vld [vmem:[#allocation7 + $0x120] sm:$0xff]  ;;  %v4267_v49 = vld [vmem:[#allocation7 + $0xe8] sm:$0xff] }
  0x24   :  { %603 = vmatpush.msra.mxu1 %v4166_v21  ;;  %581 = vmatpush.msrb.mxu0 %v4208_v34  ;;  %6868 = vst [vmem:[#allocation25_spill] sm:$0xff] %v4265_v48  ;;  %v4271_v50 = vld [vmem:[#allocation7 + $0xf8] sm:$0xff]  ;;  %v175_v51 = vld [vmem:[%s6624_s0 + $0x30] sm:$0xff]  ;;  %v4282_v52 = vld [vmem:[#allocation7 + $0x100] sm:$0xff] }
  0x25   :  { %649 = vmatpush.msra.mxu3 %v4168_v22  ;;  %627 = vmatpush.msra.mxu2 %v4174_v24  ;;  %6869 = vst [vmem:[#allocation26_spill] sm:$0xff] %v4282_v52  ;;  %v4284_v53 = vld [vmem:[#allocation7 + $0xd0] sm:$0xff]  ;;  %v4286_v54 = vld [vmem:[#allocation7 + $0xc8] sm:$0xff]  ;;  %v4290_v55 = vld [vmem:[#allocation7 + $0xe0] sm:$0xff] }
  0x26   :  { %604 = vmatpush.msra.mxu1 %v4179_v26  ;;  %582 = vmatpush.msrb.mxu0 %v4229_v39  ;;  %v4292_v56 = vld [vmem:[#allocation7 + $0xd8] sm:$0xff]  ;;  %v4304_v58 = vld [vmem:[#allocation7 + $0xb0] sm:$0xff]  ;;  %v4306_v59 = vld [vmem:[#allocation7 + $0xa8] sm:$0xff] }
  0x27   :  { %650 = vmatpush.msra.mxu3 %v4181_v27  ;;  %628 = vmatpush.msra.mxu2 %v4186_v28  ;;  %v176_v57 = vld [vmem:[%s6624_s0 + $0x38] sm:$0xff]  ;;  %v4308_v60 = vld [vmem:[#allocation7 + $0xc0] sm:$0xff]  ;;  %v4329_v1 = vld [vmem:[#allocation7 + $0x90] sm:$0xff] }
  0x28   :  { %3375 = vmatmul.msk.f32.gmra.mxu0 %vm194_vm0, %v171_v29  ;;  %605 = vmatpush.msra.mxu1 %v4196_v30  ;;  %6870 = vst [vmem:[#allocation27_spill] sm:$0xff] %v4308_v60  ;;  %v4312_v61 = vld [vmem:[#allocation7 + $0xa0] sm:$0xff]  ;;  %v4314_v62 = vld [vmem:[#allocation7 + $0xb8] sm:$0xff]  ;;  %v4333_v6 = vld [vmem:[#allocation7 + $0x88] sm:$0xff] }
  0x29   :  { %3390 = vmatmul.msk.f32.gmra.mxu1 %vm194_vm0, %v170_v17  ;;  %3406 = vmatmul.msk.f32.gmra.mxu2 %vm194_vm0, %v170_v17  ;;  %v4318_v63 = vld [vmem:[#allocation7 + $0x80] sm:$0xff]  ;;  %v4342_v9 = vld [vmem:[#allocation7 + $0x98] sm:$0xff]  ;;  %v178_v10 = vld [vmem:[%s6624_s0 + $0x48] sm:$0xff] }
  0x2a   :  { %3422 = vmatmul.msk.f32.gmra.mxu3 %vm194_vm0, %v170_v17  ;;  %629 = vmatpush.msra.mxu2 %v4204_v32  ;;  %v177_v0 = vld [vmem:[%s6624_s0 + $0x40] sm:$0xff]  ;;  %v4356_v17 = vld [vmem:[#allocation7 + $0x70] sm:$0xff] }
  0x2b   :  { %651 = vmatpush.msra.mxu3 %v4198_v31  ;;  %606 = vmatpush.msra.mxu1 %v4206_v33  ;;  %v4331_v2 = vld [vmem:[#allocation7 + $0x60] sm:$0xff]  ;;  %6874 = vst [vmem:[#allocation31_spill] sm:$0xff] %v4356_v17 }
  0x2c   :  { %630 = vmatpush.msra.mxu2 %v4225_v37  ;;  %583 = vmatpush.msrb.mxu0 %v4248_v44  ;;  %v4337_v7 = vld [vmem:[#allocation7 + $0x40] sm:$0xff] }
  0x2d   :  { %652 = vmatpush.msra.mxu3 %v4212_v35  ;;  %607 = vmatpush.msra.mxu1 %v4227_v38  ;;  %6871 = vst [vmem:[#allocation28_spill] sm:$0xff] %v4337_v7  ;;  %v4340_v8 = vld [vmem:[#allocation7 + $0x20] sm:$0xff] }
  0x2e   :  { %631 = vmatpush.msra.mxu2 %v4244_v42  ;;  %584 = vmatpush.msrb.mxu0 %v4265_v48  ;;  %6872 = vst [vmem:[#allocation29_spill] sm:$0xff] %v4340_v8  ;;  %v4350_v11 = vld [vmem:[#allocation7] sm:$0xff] }
  0x2f   :  { %653 = vmatpush.msra.mxu3 %v4233_v40  ;;  %608 = vmatpush.msra.mxu1 %v4246_v43  ;;  %6873 = vst [vmem:[#allocation30_spill] sm:$0xff] %v4350_v11 }
  0x30   :  { %3376 = vmatmul.msk.f32.gmra.mxu0 %vm194_vm0, %v172_v36  ;;  %632 = vmatpush.msra.mxu2 %v4263_v47 }
  0x31   :  { %3391 = vmatmul.msk.f32.gmra.mxu1 %vm194_vm0, %v171_v29  ;;  %3407 = vmatmul.msk.f32.gmra.mxu2 %vm194_vm0, %v171_v29 }
  0x32   :  { %3423 = vmatmul.msk.f32.gmra.mxu3 %vm194_vm0, %v171_v29  ;;  %609 = vmatpush.msra.mxu1 %v4267_v49  ;;  %v4358_v29 = vld [vmem:[#allocation7 + $0x68] sm:$0xff] }
  0x33   :  { %654 = vmatpush.msra.mxu3 %v4252_v45  ;;  %585 = vmatpush.msrb.mxu0 %v4282_v52 }
  0x34   :  { %633 = vmatpush.msra.mxu2 %v4284_v53  ;;  %610 = vmatpush.msra.mxu1 %v4286_v54 }
  0x35   :  { %655 = vmatpush.msra.mxu3 %v4271_v50  ;;  %586 = vmatpush.msrb.mxu0 %v4290_v55 }
  0x36   :  { %634 = vmatpush.msra.mxu2 %v4304_v58  ;;  %611 = vmatpush.msra.mxu1 %v4306_v59 }
  0x37   :  { %656 = vmatpush.msra.mxu3 %v4292_v56  ;;  %587 = vmatpush.msrb.mxu0 %v4308_v60 }
  0x38   :  { %3377 = vmatmul.msk.f32.gmra.mxu0 %vm194_vm0, %v173_v41  ;;  %635 = vmatpush.msra.mxu2 %v4329_v1 }
  0x39   :  { %3392 = vmatmul.msk.f32.gmra.mxu1 %vm194_vm0, %v172_v36  ;;  %3408 = vmatmul.msk.f32.gmra.mxu2 %vm194_vm0, %v172_v36 }
  0x3a   :  { %3424 = vmatmul.msk.f32.gmra.mxu3 %vm194_vm0, %v172_v36  ;;  %588 = vmatpush.msrb.mxu0 %v4312_v61  ;;  %v4360_v36 = vld [vmem:[#allocation7 + $0x78] sm:$0xff] }
  0x3b   :  { %657 = vmatpush.msra.mxu3 %v4314_v62  ;;  %612 = vmatpush.msra.mxu1 %v4333_v6  ;;  %6875 = vst [vmem:[#allocation32_spill] sm:$0xff] %v4360_v36 }
  0x3c   :  { %589 = vmatpush.msrb.mxu0 %v4318_v63  ;;  %636 = vmatpush.msra.mxu2 %v4356_v17 }
  0x3d   :  { %658 = vmatpush.msra.mxu3 %v4342_v9  ;;  %613 = vmatpush.msra.mxu1 %v4358_v29 }
  0x3e   :  { %590 = vmatpush.msrb.mxu0 %v4331_v2 }
  0x3f   :  { %659 = vmatpush.msra.mxu3 %v4360_v36 }
  0x40   :  { %3378 = vmatmul.msk.f32.gmra.mxu0 %vm194_vm0, %v174_v46 }
  0x41   :  { %3393 = vmatmul.msk.f32.gmra.mxu1 %vm194_vm0, %v173_v41  ;;  %3409 = vmatmul.msk.f32.gmra.mxu2 %vm194_vm0, %v173_v41 }
  0x42   :  { %3425 = vmatmul.msk.f32.gmra.mxu3 %vm194_vm0, %v173_v41  ;;  %591 = vmatpush.msrb.mxu0 %v4337_v7  ;;  %v179_v41 = vld [vmem:[%s6624_s0 + $0x50] sm:$0xff] }
  0x44   :  { %592 = vmatpush.msrb.mxu0 %v4340_v8 }
  0x46   :  { %593 = vmatpush.msrb.mxu0 %v4350_v11 }
  0x48   :  { %3379 = vmatmul.msk.f32.gmra.mxu0 %vm194_vm0, %v175_v51 }
  0x49   :  { %3394 = vmatmul.msk.f32.gmra.mxu1 %vm194_vm0, %v174_v46  ;;  %3410 = vmatmul.msk.f32.gmra.mxu2 %vm194_vm0, %v174_v46 }
  0x4a   :  { %3426 = vmatmul.msk.f32.gmra.mxu3 %vm194_vm0, %v174_v46  ;;  %721 = vmatpush.msra.mxu0 %v4146_v16  ;;  %v4375_v46 = vld [vmem:[#allocation7 + $0x50] sm:$0xff] }
  0x4b   :  { %6876 = vst [vmem:[#allocation33_spill] sm:$0xff] %v4375_v46  ;;  %637 = vmatpush.msra.mxu2 %v4375_v46  ;;  %v181_v46 = vld [vmem:[%s6624_s0 + $0x60] sm:$0xff] }
  0x4c   :  { %722 = vmatpush.msra.mxu0 %v4170_v23 }
  0x4e   :  { %723 = vmatpush.msra.mxu0 %v4176_v25 }
  0x50   :  { %3380 = vmatmul.msk.f32.gmra.mxu0 %vm194_vm0, %v176_v57 }
  0x51   :  { %3395 = vmatmul.msk.f32.gmra.mxu1 %vm194_vm0, %v175_v51  ;;  %3411 = vmatmul.msk.f32.gmra.mxu2 %vm194_vm0, %v175_v51 }
  0x52   :  { %3427 = vmatmul.msk.f32.gmra.mxu3 %vm194_vm0, %v175_v51  ;;  %v4377_v51 = vld [vmem:[#allocation7 + $0x48] sm:$0xff]  ;;  %724 = vmatpush.msra.mxu0 %v4208_v34 }
  0x53   :  { %6877 = vst [vmem:[#allocation34_spill] sm:$0xff] %v4377_v51  ;;  %614 = vmatpush.msra.mxu1 %v4377_v51 }
  0x54   :  { %725 = vmatpush.msra.mxu0 %v4229_v39  ;;  %v4405_v39 = vld [vmem:[#allocation7 + $0x38] sm:$0xff] }
  0x55   :  { %6881 = vst [vmem:[#allocation38_spill] sm:$0xff] %v4405_v39 }
  0x56   :  { %726 = vmatpush.msra.mxu0 %v4248_v44 }
  0x58   :  { %3381 = vmatmul.msk.f32.gmra.mxu0 %vm194_vm0, %v177_v0 }
  0x59   :  { %3396 = vmatmul.msk.f32.gmra.mxu1 %vm194_vm0, %v176_v57  ;;  %3412 = vmatmul.msk.f32.gmra.mxu2 %vm194_vm0, %v176_v57 }
  0x5a   :  { %3428 = vmatmul.msk.f32.gmra.mxu3 %vm194_vm0, %v176_v57  ;;  %v4379_v57 = vld [vmem:[#allocation7 + $0x58] sm:$0xff]  ;;  %727 = vmatpush.msra.mxu0 %v4265_v48 }
  0x5b   :  { %6878 = vst [vmem:[#allocation35_spill] sm:$0xff] %v4379_v57  ;;  %660 = vmatpush.msra.mxu3 %v4379_v57  ;;  %v4396_v57 = vld [vmem:[#allocation7 + $0x28] sm:$0xff] }
  0x5c   :  { %6880 = vst [vmem:[#allocation37_spill] sm:$0xff] %v4396_v57  ;;  %615 = vmatpush.msra.mxu1 %v4396_v57  ;;  %728 = vmatpush.msra.mxu0 %v4282_v52  ;;  %v4424_v52 = vld [vmem:[#allocation7 + $0x18] sm:$0xff] }
  0x5d   :  { %661 = vmatpush.msra.mxu3 %v4405_v39  ;;  %6884 = vst [vmem:[#allocation41_spill] sm:$0xff] %v4424_v52 }
  0x5e   :  { %729 = vmatpush.msra.mxu0 %v4290_v55 }
  0x5f   :  { %662 = vmatpush.msra.mxu3 %v4424_v52 }
  0x60   :  { %3382 = vmatmul.msk.f32.gmra.mxu0 %vm194_vm0, %v178_v10 }
  0x61   :  { %3397 = vmatmul.msk.f32.gmra.mxu1 %vm194_vm0, %v177_v0  ;;  %3413 = vmatmul.msk.f32.gmra.mxu2 %vm194_vm0, %v177_v0 }
  0x62   :  { %3429 = vmatmul.msk.f32.gmra.mxu3 %vm194_vm0, %v177_v0  ;;  %v180_v0 = vld [vmem:[%s6624_s0 + $0x58] sm:$0xff]  ;;  %730 = vmatpush.msra.mxu0 %v4308_v60 }
  0x63   :  { %790 = vmatpush.msrb.mxu3 %v4142_v14 }
  0x64   :  { %731 = vmatpush.msra.mxu0 %v4312_v61 }
  0x65   :  { %791 = vmatpush.msrb.mxu3 %v4157_v19 }
  0x66   :  { %732 = vmatpush.msra.mxu0 %v4318_v63 }
  0x67   :  { %792 = vmatpush.msrb.mxu3 %v4168_v22 }
  0x68   :  { %3383 = vmatmul.msk.f32.gmra.mxu0 %vm194_vm0, %v179_v41 }
  0x69   :  { %3398 = vmatmul.msk.f32.gmra.mxu1 %vm194_vm0, %v178_v10  ;;  %3414 = vmatmul.msk.f32.gmra.mxu2 %vm194_vm0, %v178_v10 }
  0x6a   :  { %3430 = vmatmul.msk.f32.gmra.mxu3 %vm194_vm0, %v178_v10  ;;  %v4394_v10 = vld [vmem:[#allocation7 + $0x30] sm:$0xff]  ;;  %733 = vmatpush.msra.mxu0 %v4331_v2 }
  0x6b   :  { %6879 = vst [vmem:[#allocation36_spill] sm:$0xff] %v4394_v10  ;;  %638 = vmatpush.msra.mxu2 %v4394_v10  ;;  %v4415_v10 = vld [vmem:[#allocation7 + $0x8] sm:$0xff]  ;;  %793 = vmatpush.msrb.mxu3 %v4181_v27 }
  0x6c   :  { %6883 = vst [vmem:[#allocation40_spill] sm:$0xff] %v4415_v10  ;;  %616 = vmatpush.msra.mxu1 %v4415_v10  ;;  %734 = vmatpush.msra.mxu0 %v4337_v7 }
  0x6d   :  { %794 = vmatpush.msrb.mxu3 %v4198_v31 }
  0x6e   :  { %744 = vmatpush.msrb.mxu1 %v4140_v13  ;;  %735 = vmatpush.msra.mxu0 %v4340_v8 }
  0x6f   :  { %795 = vmatpush.msrb.mxu3 %v4212_v35 }
  0x70   :  { %3384 = vmatmul.msk.f32.gmra.mxu0 %vm194_vm0, %v180_v0  ;;  %745 = vmatpush.msrb.mxu1 %v4155_v18 }
  0x71   :  { %3399 = vmatmul.msk.f32.gmra.mxu1 %vm194_vm0, %v179_v41  ;;  %3415 = vmatmul.msk.f32.gmra.mxu2 %vm194_vm0, %v179_v41 }
  0x72   :  { %3431 = vmatmul.msk.f32.gmra.mxu3 %vm194_vm0, %v179_v41  ;;  %v4413_v41 = vld [vmem:[#allocation7 + $0x10] sm:$0xff]  ;;  %746 = vmatpush.msrb.mxu1 %v4166_v21 }
  0x73   :  { %6882 = vst [vmem:[#allocation39_spill] sm:$0xff] %v4413_v41  ;;  %639 = vmatpush.msra.mxu2 %v4413_v41  ;;  %736 = vmatpush.msra.mxu0 %v4350_v11 }
  0x74   :  { %747 = vmatpush.msrb.mxu1 %v4179_v26  ;;  %796 = vmatpush.msrb.mxu3 %v4233_v40 }
  0x75   :  { %767 = vmatpush.msrb.mxu2 %v4138_v12 }
  0x76   :  { %748 = vmatpush.msrb.mxu1 %v4196_v30  ;;  %797 = vmatpush.msrb.mxu3 %v4252_v45 }
  0x77   :  { %768 = vmatpush.msrb.mxu2 %v4144_v15 }
  0x78   :  { %3385 = vmatmul.msk.f32.gmra.mxu0 %vm194_vm0, %v181_v46  ;;  %749 = vmatpush.msrb.mxu1 %v4206_v33 }
  0x79   :  { %3400 = vmatmul.msk.f32.gmra.mxu1 %vm194_vm0, %v180_v0  ;;  %3416 = vmatmul.msk.f32.gmra.mxu2 %vm194_vm0, %v180_v0 }
  0x7a   :  { %3432 = vmatmul.msk.f32.gmra.mxu3 %vm194_vm0, %v180_v0  ;;  %v6644_v0 = vmov 0.0   ;;  %769 = vmatpush.msrb.mxu2 %v4162_v20 }
  0x7b   :  { %750 = vmatpush.msrb.mxu1 %v4227_v38  ;;  %798 = vmatpush.msrb.mxu3 %v4271_v50 }
  0x7c   :  { %770 = vmatpush.msrb.mxu2 %v4174_v24 }
  0x7d   :  { %751 = vmatpush.msrb.mxu1 %v4246_v43  ;;  %799 = vmatpush.msrb.mxu3 %v4292_v56 }
  0x7e   :  { %771 = vmatpush.msrb.mxu2 %v4186_v28 }
  0x7f   :  { %752 = vmatpush.msrb.mxu1 %v4267_v49  ;;  %800 = vmatpush.msrb.mxu3 %v4314_v62 }
  0x80   :  { %594 = vmatmul.f32.vlgmr.msrb.gmra.mxu0 %v6644_v0  ;;  %772 = vmatpush.msrb.mxu2 %v4204_v32 }
  0x81   :  { %3401 = vmatmul.msk.f32.gmra.mxu1 %vm194_vm0, %v181_v46  ;;  %3417 = vmatmul.msk.f32.gmra.mxu2 %vm194_vm0, %v181_v46 }
  0x82   :  { %3433 = vmatmul.msk.f32.gmra.mxu3 %vm194_vm0, %v181_v46  ;;  %773 = vmatpush.msrb.mxu2 %v4225_v37 }
  0x83   :  { %753 = vmatpush.msrb.mxu1 %v4286_v54  ;;  %865 = vmatpush.msrb.mxu0 %v4146_v16  ;;  %v6891_v16 = vld [vmem:[#allocation35_spill] sm:$0xff] }
  0x84   :  { %774 = vmatpush.msrb.mxu2 %v4244_v42  ;;  %801 = vmatpush.msrb.mxu3 %v4342_v9 }
  0x85   :  { %754 = vmatpush.msrb.mxu1 %v4306_v59  ;;  %866 = vmatpush.msrb.mxu0 %v4170_v23  ;;  %v6890_v23 = vld [vmem:[#allocation33_spill] sm:$0xff] }
  0x86   :  { %775 = vmatpush.msrb.mxu2 %v4263_v47  ;;  %802 = vmatpush.msrb.mxu3 %v4360_v36 }
  0x87   :  { %755 = vmatpush.msrb.mxu1 %v4333_v6  ;;  %867 = vmatpush.msrb.mxu0 %v4176_v25 }
  0x88   :  { %597 = vmatmul.f32.gmra.mxu0 %v6644_v0  ;;  %776 = vmatpush.msrb.mxu2 %v4284_v53 }
  0x89   :  { %3402 = vmatmul.msk.f32.gmra.mxu1 %vm194_vm0, %v4119_v3  ;;  %3418 = vmatmul.msk.f32.gmra.mxu2 %vm194_vm0, %v4119_v3 }
  0x8a   :  { %3434 = vmatmul.msk.f32.gmra.mxu3 %vm194_vm0, %v4119_v3  ;;  %777 = vmatpush.msrb.mxu2 %v4304_v58 }
  0x8b   :  { %756 = vmatpush.msrb.mxu1 %v4358_v29  ;;  %868 = vmatpush.msrb.mxu0 %v4208_v34 }
  0x8c   :  { %778 = vmatpush.msrb.mxu2 %v4329_v1  ;;  %803 = vmatpush.msrb.mxu3 %v6891_v16 }
  0x8d   :  { %757 = vmatpush.msrb.mxu1 %v4377_v51 }
  0x8e   :  { %779 = vmatpush.msrb.mxu2 %v4356_v17  ;;  %804 = vmatpush.msrb.mxu3 %v4405_v39 }
  0x8f   :  { %758 = vmatpush.msrb.mxu1 %v4396_v57 }
  0x90   :  { %780 = vmatpush.msrb.mxu2 %v6890_v23  ;;  %805 = vmatpush.msrb.mxu3 %v4424_v52 }
  0x91   :  { %3403 = vmatmul.msk.f32.gmra.mxu1 %vm194_vm0, %v4124_v4  ;;  %3419 = vmatmul.msk.f32.gmra.mxu2 %vm194_vm0, %v4124_v4 }
  0x92   :  { %3435 = vmatmul.msk.f32.gmra.mxu3 %vm194_vm0, %v4124_v4  ;;  %759 = vmatpush.msrb.mxu1 %v4415_v10 }
  0x95   :  { %v4477_v3 = vpop.f32.mrf.mxu0  ;;  %v4479_v46 = vpop.f32.mrf.mxu1 }
  0x96   :  { %6885 = vst [vmem:[#allocation42_spill] sm:$0xff] %v4479_v46 }
  0x99   :  { %3404 = vmatmul.msk.f32.gmra.mxu1 %vm194_vm0, %v4129_v5  ;;  %3420 = vmatmul.msk.f32.gmra.mxu2 %vm194_vm0, %v4129_v5 }
  0x9a   :  { %3436 = vmatmul.msk.f32.gmra.mxu3 %vm194_vm0, %v4129_v5  ;;  %v6889_v5 = vld [vmem:[#allocation23_spill] sm:$0xff] }
  0x9b   :  { %869 = vmatpush.msrb.mxu0 %v6889_v5 }
  0x9c   :  { %v4498_v4 = vpop.f32.mrf.mxu2  ;;  %v4500_v0 = vpop.f32.mrf.mxu3 }
  0x9d   :  { %6886 = vst [vmem:[#allocation43_spill] sm:$0xff] %v4498_v4  ;;  %v4504_v46 = vpop.f32.mrf.mxu0  ;;  %870 = vmatpush.msrb.mxu0 %v4248_v44  ;;  %v6893_v4 = vld [vmem:[#allocation36_spill] sm:$0xff] }
  0x9e   :  { %6887 = vst [vmem:[#allocation44_spill] sm:$0xff] %v4500_v0  ;;  %v4506_v25 = vpop.f32.mrf.mxu1  ;;  %v6892_v0 = vmov 0.0   ;;  %781 = vmatpush.msrb.mxu2 %v6893_v4 }
  0x9f   :  { %6888 = vst [vmem:[#allocation45_spill] sm:$0xff] %v4504_v46  ;;  %871 = vmatpush.msrb.mxu0 %v4265_v48  ;;  %v6895_v48 = vld [vmem:[#allocation26_spill] sm:$0xff] }
  0xa0   :  { %782 = vmatpush.msrb.mxu2 %v4413_v41 }
  0xa1   :  { %617 = vmatmul.f32.vlgmr.msra.gmra.mxu1 %v6892_v0  ;;  %640 = vmatmul.f32.vlgmr.msra.gmra.mxu2 %v6892_v0 }
  0xa2   :  { %663 = vmatmul.f32.vlgmr.msra.gmra.mxu3 %v6892_v0  ;;  %888 = vmatpush.msra.mxu1 %v4140_v13 }
  0xa3   :  { %911 = vmatpush.msra.mxu2 %v4138_v12  ;;  %934 = vmatpush.msra.mxu3 %v4142_v14 }
  0xa4   :  { %v4522_v5 = vpop.f32.mrf.mxu2  ;;  %889 = vmatpush.msra.mxu1 %v4155_v18  ;;  %872 = vmatpush.msrb.mxu0 %v6895_v48 }
  0xa5   :  { %v4524_v34 = vpop.f32.mrf.mxu3  ;;  %912 = vmatpush.msra.mxu2 %v4144_v15  ;;  %v4534_v46 = vpop.f32.mrf.mxu0  ;;  %935 = vmatpush.msra.mxu3 %v4157_v19 }
  0xa6   :  { %v4528_v44 = vpop.f32.mrf.mxu1  ;;  %6894 = vst [vmem:[#allocation46_spill] sm:$0xff] %v4534_v46  ;;  %890 = vmatpush.msra.mxu1 %v4166_v21  ;;  %873 = vmatpush.msrb.mxu0 %v4290_v55 }
  0xa7   :  { %913 = vmatpush.msra.mxu2 %v4162_v20  ;;  %936 = vmatpush.msra.mxu3 %v4168_v22 }
  0xa8   :  { %891 = vmatpush.msra.mxu1 %v4179_v26  ;;  %874 = vmatpush.msrb.mxu0 %v4308_v60 }
  0xa9   :  { %620 = vmatmul.f32.gmra.mxu1 %v6892_v0  ;;  %643 = vmatmul.f32.gmra.mxu2 %v6892_v0 }
  0xaa   :  { %666 = vmatmul.f32.gmra.mxu3 %v6892_v0  ;;  %914 = vmatpush.msra.mxu2 %v4174_v24 }
  0xab   :  { %937 = vmatpush.msra.mxu3 %v4181_v27  ;;  %892 = vmatpush.msra.mxu1 %v4196_v30 }
  0xac   :  { %v4546_v46 = vpop.f32.mrf.mxu2  ;;  %915 = vmatpush.msra.mxu2 %v4186_v28  ;;  %875 = vmatpush.msrb.mxu0 %v4312_v61 }
  0xad   :  { %v4548_v19 = vpop.f32.mrf.mxu3  ;;  %938 = vmatpush.msra.mxu3 %v4198_v31  ;;  %893 = vmatpush.msra.mxu1 %v4206_v33  ;;  %v4562_v0 = vpop.f32.mrf.mxu0 }
  0xae   :  { %v4552_v20 = vpop.f32.mrf.mxu1  ;;  %916 = vmatpush.msra.mxu2 %v4204_v32  ;;  %6897 = vst [vmem:[#allocation47_spill] sm:$0xff] %v4562_v0  ;;  %876 = vmatpush.msrb.mxu0 %v4318_v63 }
  0xaf   :  { %6896 = vst [vmem:[#allocation26_spill] sm:$0xff] %v4552_v20  ;;  %939 = vmatpush.msra.mxu3 %v4212_v35  ;;  %894 = vmatpush.msra.mxu1 %v4227_v38 }
  0xb0   :  { %917 = vmatpush.msra.mxu2 %v4225_v37  ;;  %877 = vmatpush.msrb.mxu0 %v4331_v2 }
  0xb1   :  { %940 = vmatpush.msra.mxu3 %v4233_v40  ;;  %895 = vmatpush.msra.mxu1 %v4246_v43 }
  0xb2   :  { %918 = vmatpush.msra.mxu2 %v4244_v42  ;;  %878 = vmatpush.msrb.mxu0 %v4337_v7 }
  0xb3   :  { %941 = vmatpush.msra.mxu3 %v4252_v45  ;;  %896 = vmatpush.msra.mxu1 %v4267_v49 }
  0xb4   :  { %v4570_v20 = vpop.f32.mrf.mxu2  ;;  %919 = vmatpush.msra.mxu2 %v4263_v47  ;;  %879 = vmatpush.msrb.mxu0 %v4340_v8 }
  0xb5   :  { %6898 = vst [vmem:[#allocation48_spill] sm:$0xff] %v4570_v20  ;;  %v4572_v60 = vpop.f32.mrf.mxu3  ;;  %942 = vmatpush.msra.mxu3 %v4271_v50  ;;  %897 = vmatpush.msra.mxu1 %v4286_v54 }
  0xb6   :  { %6899 = vst [vmem:[#allocation49_spill] sm:$0xff] %v4572_v60  ;;  %v4576_v0 = vpop.f32.mrf.mxu1  ;;  %920 = vmatpush.msra.mxu2 %v4284_v53  ;;  %880 = vmatpush.msrb.mxu0 %v4350_v11 }
  0xb7   :  { %6900 = vst [vmem:[#allocation50_spill] sm:$0xff] %v4576_v0  ;;  %943 = vmatpush.msra.mxu3 %v4292_v56  ;;  %898 = vmatpush.msra.mxu1 %v4306_v59  ;;  %v4590_v0 = vpop.f32.mrf.mxu0 }
  0xb8   :  { %921 = vmatpush.msra.mxu2 %v4304_v58  ;;  %6901 = vst [vmem:[#allocation51_spill] sm:$0xff] %v4590_v0 }
  0xb9   :  { %944 = vmatpush.msra.mxu3 %v4314_v62  ;;  %899 = vmatpush.msra.mxu1 %v4333_v6 }
  0xba   :  { %922 = vmatpush.msra.mxu2 %v4329_v1 }
  0xbb   :  { %945 = vmatpush.msra.mxu3 %v4342_v9  ;;  %900 = vmatpush.msra.mxu1 %v4358_v29 }
  0xbc   :  { %v4594_v60 = vpop.f32.mrf.mxu2  ;;  %923 = vmatpush.msra.mxu2 %v4356_v17 }
  0xbd   :  { %6902 = vst [vmem:[#allocation52_spill] sm:$0xff] %v4594_v60  ;;  %v4596_v20 = vpop.f32.mrf.mxu3  ;;  %946 = vmatpush.msra.mxu3 %v4360_v36  ;;  %901 = vmatpush.msra.mxu1 %v4377_v51 }
  0xbe   :  { %6903 = vst [vmem:[#allocation53_spill] sm:$0xff] %v4596_v20  ;;  %v4600_v7 = vpop.f32.mrf.mxu1  ;;  %924 = vmatpush.msra.mxu2 %v6890_v23  ;;  %v6950_v23 = vld [vmem:[#allocation45_spill] sm:$0xff] }
  0xbf   :  { %6904 = vst [vmem:[#allocation54_spill] sm:$0xff] %v4600_v7  ;;  %947 = vmatpush.msra.mxu3 %v6891_v16  ;;  %902 = vmatpush.msra.mxu1 %v4396_v57  ;;  %v4617_v20 = vpop.f32.mrf.mxu0 }
  0xc0   :  { %925 = vmatpush.msra.mxu2 %v6893_v4  ;;  %6907 = vst [vmem:[#allocation57_spill] sm:$0xff] %v4617_v20 }
  0xc1   :  { %948 = vmatpush.msra.mxu3 %v4405_v39  ;;  %903 = vmatpush.msra.mxu1 %v4415_v10 }
  0xc2   :  { %926 = vmatpush.msra.mxu2 %v4413_v41 }
  0xc3   :  { %949 = vmatpush.msra.mxu3 %v4424_v52 }
  0xc4   :  { %v4612_v7 = vpop.f32.mrf.mxu2 }
  0xc5   :  { %6905 = vst [vmem:[#allocation55_spill] sm:$0xff] %v4612_v7  ;;  %v4614_v0 = vpop.f32.mrf.mxu3 }
  0xc6   :  { %6906 = vst [vmem:[#allocation56_spill] sm:$0xff] %v4614_v0  ;;  %v4619_v60 = vpop.f32.mrf.mxu1 }
  0xc7   :  { %6908 = vst [vmem:[#allocation58_spill] sm:$0xff] %v4619_v60  ;;  %v4627_v39 = vpop.f32.mrf.mxu0 }
  0xc8   :  { %6912 = vst [vmem:[#allocation62_spill] sm:$0xff] %v4627_v39 }
  0xcc   :  { %v4621_v11 = vpop.f32.mrf.mxu2 }
  0xcd   :  { %6909 = vst [vmem:[#allocation59_spill] sm:$0xff] %v4621_v11  ;;  %v4623_v57 = vpop.f32.mrf.mxu3 }
  0xce   :  { %6910 = vst [vmem:[#allocation60_spill] sm:$0xff] %v4623_v57  ;;  %v4625_v4 = vpop.f32.mrf.mxu1 }
  0xcf   :  { %6911 = vst [vmem:[#allocation61_spill] sm:$0xff] %v4625_v4  ;;  %v4635_v0 = vpop.f32.mrf.mxu0 }
  0xd0   :  { %6916 = vst [vmem:[#allocation66_spill] sm:$0xff] %v4635_v0 }
  0xd4   :  { %v4629_v10 = vpop.f32.mrf.mxu2 }
  0xd5   :  { %6913 = vst [vmem:[#allocation63_spill] sm:$0xff] %v4629_v10  ;;  %v4631_v41 = vpop.f32.mrf.mxu3 }
  0xd6   :  { %6914 = vst [vmem:[#allocation64_spill] sm:$0xff] %v4631_v41  ;;  %v4633_v7 = vpop.f32.mrf.mxu1 }
  0xd7   :  { %6915 = vst [vmem:[#allocation65_spill] sm:$0xff] %v4633_v7  ;;  %v4643_v11 = vpop.f32.mrf.mxu0 }
  0xd8   :  { %6920 = vst [vmem:[#allocation70_spill] sm:$0xff] %v4643_v11 }
  0xdc   :  { %v4637_v52 = vpop.f32.mrf.mxu2 }
  0xdd   :  { %6917 = vst [vmem:[#allocation67_spill] sm:$0xff] %v4637_v52  ;;  %v4639_v20 = vpop.f32.mrf.mxu3 }
  0xde   :  { %6918 = vst [vmem:[#allocation68_spill] sm:$0xff] %v4639_v20  ;;  %v4641_v60 = vpop.f32.mrf.mxu1 }
  0xdf   :  { %6919 = vst [vmem:[#allocation69_spill] sm:$0xff] %v4641_v60  ;;  %v4655_v7 = vpop.f32.mrf.mxu0 }
  0xe0   :  { %6926 = vst [vmem:[#allocation76_spill] sm:$0xff] %v4655_v7 }
  0xe4   :  { %v4645_v57 = vpop.f32.mrf.mxu2 }
  0xe5   :  { %6921 = vst [vmem:[#allocation71_spill] sm:$0xff] %v4645_v57  ;;  %v4647_v4 = vpop.f32.mrf.mxu3 }
  0xe6   :  { %6922 = vst [vmem:[#allocation72_spill] sm:$0xff] %v4647_v4  ;;  %v4649_v39 = vpop.f32.mrf.mxu1 }
  0xe7   :  { %6923 = vst [vmem:[#allocation73_spill] sm:$0xff] %v4649_v39  ;;  %v4665_v11 = vpop.f32.mrf.mxu0 }
  0xe8   :  { %6931 = vst [vmem:[#allocation81_spill] sm:$0xff] %v4665_v11 }
  0xec   :  { %v4651_v10 = vpop.f32.mrf.mxu2 }
  0xed   :  { %6924 = vst [vmem:[#allocation74_spill] sm:$0xff] %v4651_v10  ;;  %v4653_v41 = vpop.f32.mrf.mxu3 }
  0xee   :  { %6925 = vst [vmem:[#allocation75_spill] sm:$0xff] %v4653_v41  ;;  %v4657_v0 = vpop.f32.mrf.mxu1 }
  0xef   :  { %6927 = vst [vmem:[#allocation77_spill] sm:$0xff] %v4657_v0  ;;  %v4673_v10 = vpop.f32.mrf.mxu0 }
  0xf0   :  { %6935 = vst [vmem:[#allocation85_spill] sm:$0xff] %v4673_v10 }
  0xf4   :  { %v4659_v52 = vpop.f32.mrf.mxu2 }
  0xf5   :  { %6928 = vst [vmem:[#allocation78_spill] sm:$0xff] %v4659_v52  ;;  %v4661_v20 = vpop.f32.mrf.mxu3 }
  0xf6   :  { %6929 = vst [vmem:[#allocation79_spill] sm:$0xff] %v4661_v20  ;;  %v4663_v60 = vpop.f32.mrf.mxu1 }
  0xf7   :  { %6930 = vst [vmem:[#allocation80_spill] sm:$0xff] %v4663_v60  ;;  %v4681_v52 = vpop.f32.mrf.mxu0 }
  0xf8   :  { %6939 = vst [vmem:[#allocation89_spill] sm:$0xff] %v4681_v52 }
  0xfc   :  { %v4667_v57 = vpop.f32.mrf.mxu2 }
  0xfd   :  { %6932 = vst [vmem:[#allocation82_spill] sm:$0xff] %v4667_v57  ;;  %v4669_v4 = vpop.f32.mrf.mxu3 }
  0xfe   :  { %6933 = vst [vmem:[#allocation83_spill] sm:$0xff] %v4669_v4  ;;  %v4671_v39 = vpop.f32.mrf.mxu1 }
  0xff   :  { %6934 = vst [vmem:[#allocation84_spill] sm:$0xff] %v4671_v39  ;;  %v168_v39 = vld [vmem:[%s6627_s3] sm:$0xf] }
 0x100   :  { %v4700_v52 = vperm.slane %v168_v39, 1  ;;  %v4710_v16 = vperm.slane %v168_v39, 2  ;;  %v4714_v36 = vperm.slane %v168_v39, 3 }
 0x102   :  { %6947 = vst [vmem:[#allocation97_spill] sm:$0xff] %v4700_v52 }
 0x103   :  { %6951 = vst [vmem:[#allocation45_spill] sm:$0xff] %v4714_v36 }
 0x104   :  { %v4675_v41 = vpop.f32.mrf.mxu2 }
 0x105   :  { %6936 = vst [vmem:[#allocation86_spill] sm:$0xff] %v4675_v41  ;;  %v4677_v7 = vpop.f32.mrf.mxu3  ;;  %v595_v41 = vpop.f32.mrf.mxu0 }
 0x106   :  { %6937 = vst [vmem:[#allocation87_spill] sm:$0xff] %v4677_v7  ;;  %v4679_v0 = vpop.f32.mrf.mxu1 }
 0x107   :  { %6938 = vst [vmem:[#allocation88_spill] sm:$0xff] %v4679_v0  ;;  %v4698_v0 = vperm.slane %v168_v39, 0 }
 0x109   :  { %6946 = vst [vmem:[#allocation96_spill] sm:$0xff] %v4698_v0  ;;  %v264_v51 = vadd.f32 %v6950_v23, %v4698_v0 }
 0x10c   :  { %v4683_v20 = vpop.f32.mrf.mxu2 }
 0x10d   :  { %6940 = vst [vmem:[#allocation90_spill] sm:$0xff] %v4683_v20  ;;  %v4685_v60 = vpop.f32.mrf.mxu3 }
 0x10e   :  { %6941 = vst [vmem:[#allocation91_spill] sm:$0xff] %v4685_v60  ;;  %v4687_v11 = vpop.f32.mrf.mxu1  ;;  %v261_v60 = vadd.f32 %v4477_v3, %v4698_v0 }
 0x10f   :  { %6942 = vst [vmem:[#allocation92_spill] sm:$0xff] %v4687_v11  ;;  %v326_v11 = vadd.f32 %v4506_v25, %v4700_v52  ;;  %v391_v25 = vadd.f32 %v4522_v5, %v4710_v16 }
 0x110   :  { %v670_v20 = vadd.f32 %v595_v41, %v261_v60  ;;  %v456_v41 = vadd.f32 %v4524_v34, %v4714_v36  ;;  %v394_v34 = vadd.f32 %v4546_v46, %v4710_v16 }
 0x112   :  { %3454 = vtanh.f32 %v670_v20 }
 0x114   :  { %v4692_v4 = vpop.f32.mrf.mxu2 }
 0x115   :  { %6943 = vst [vmem:[#allocation93_spill] sm:$0xff] %v4692_v4  ;;  %v4694_v57 = vpop.f32.mrf.mxu3 }
 0x116   :  { %6944 = vst [vmem:[#allocation94_spill] sm:$0xff] %v4694_v57  ;;  %v4696_v7 = vpop.f32.mrf.mxu1 }
 0x117   :  { %6945 = vst [vmem:[#allocation95_spill] sm:$0xff] %v4696_v7  ;;  %v598_v7 = vpop.f32.mrf.mxu0 }
 0x118   :  { %v674_v60 = vadd.f32 %v598_v7, %v264_v51  ;;  %v3455_v20 = vpop.eup %3454 }
 0x119   :  { %v686_v7 = vmul.f32 0.5, %v3455_v20 }
 0x11c   :  { %v4706_v10 = vpop.f32.mrf.mxu2 }
 0x11d   :  { %6948 = vst [vmem:[#allocation98_spill] sm:$0xff] %v4706_v10  ;;  %v4708_v8 = vpop.f32.mrf.mxu3 }
 0x11e   :  { %6949 = vst [vmem:[#allocation99_spill] sm:$0xff] %v4708_v8  ;;  %v618_v4 = vpop.f32.mrf.mxu1 }
 0x11f   :  { %v671_v57 = vadd.f32 %v618_v4, %v326_v11  ;;  %v329_v11 = vadd.f32 %v4528_v44, %v4700_v52  ;;  %v459_v44 = vadd.f32 %v4548_v19, %v4714_v36  ;;  %v688_v52 = vadd.f32 0.5, %v686_v7 }
 0x121   :  { %3456 = vtanh.f32 %v671_v57 }
 0x122   :  { %3458 = vtanh.f32 %v674_v60 }
 0x124   :  { %v641_v3 = vpop.f32.mrf.mxu2 }
 0x125   :  { %v664_v4 = vpop.f32.mrf.mxu3  ;;  %v672_v8 = vadd.f32 %v641_v3, %v391_v25 }
 0x126   :  { %v621_v10 = vpop.f32.mrf.mxu1  ;;  %v673_v23 = vadd.f32 %v664_v4, %v456_v41 }
 0x127   :  { %v3457_v17 = vpop.eup %3456  ;;  %v675_v39 = vadd.f32 %v621_v10, %v329_v11  ;;  %3460 = vtanh.f32 %v672_v8 }
 0x128   :  { %v690_v57 = vmul.f32 0.5, %v3457_v17  ;;  %v3459_v5 = vpop.eup %3458 }
 0x129   :  { %3462 = vtanh.f32 %v675_v39  ;;  %v687_v4 = vmul.f32 0.5, %v3459_v5 }
 0x12a   :  { %v692_v51 = vadd.f32 0.5, %v690_v57  ;;  %3464 = vtanh.f32 %v673_v23 }
 0x12b   :  { %v689_v39 = vadd.f32 0.5, %v687_v4 }
 0x12c   :  { %v644_v25 = vpop.f32.mrf.mxu2  ;;  %v698_v10 = vmul.f32 0.0, %v692_v51 }
 0x12d   :  { %v667_v3 = vpop.f32.mrf.mxu3  ;;  %v3461_v0 = vpop.eup %3460  ;;  %v676_v60 = vadd.f32 %v644_v25, %v394_v34  ;;  %v6953_v25 = vld [vmem:[#allocation17_spill] sm:$0xff] }
 0x12e   :  { %v677_v41 = vadd.f32 %v667_v3, %v459_v44  ;;  %v700_v17 = vmul.f32 %v3461_v0, %v688_v52  ;;  %v6954_v3 = vld [vmem:[#allocation20_spill] sm:$0xff] }
 0x12f   :  { %v3463_v8 = vpop.eup %3462  ;;  %3466 = vtanh.f32 %v676_v60 }
 0x130   :  { %v3465_v11 = vpop.eup %3464  ;;  %v4726_v20 = vadd.f32 %v700_v17, %v698_v10  ;;  %v691_v23 = vmul.f32 0.5, %v3463_v8  ;;  %3468 = vtanh.f32 %v677_v41  ;;  %v6955_v41 = vld [vmem:[#allocation18_spill] sm:$0xff]  ;;  %v6957_v17 = vld [vmem:[#allocation21_spill] sm:$0xff] }
 0x131   :  { %v694_v46 = vmul.f32 0.5, %v3465_v11 }
 0x132   :  { %3470 = vtanh.f32 %v4726_v20  ;;  %v693_v19 = vadd.f32 0.5, %v691_v23 }
 0x133   :  { %v696_v44 = vadd.f32 0.5, %v694_v46 }
 0x134   :  { %v699_v7 = vmul.f32 0.0, %v693_v19 }
 0x135   :  { %v3467_v57 = vpop.eup %3466 }
 0x136   :  { %v701_v36 = vmul.f32 %v3467_v57, %v689_v39  ;;  %v3469_v34 = vpop.eup %3468 }
 0x137   :  { %v695_v5 = vmul.f32 0.5, %v3469_v34 }
 0x138   :  { %v3471_v51 = vpop.eup %3470  ;;  %v4729_v52 = vadd.f32 %v701_v36, %v699_v7 }
 0x139   :  { %v4731_v0 = vmul.f32 %v3471_v51, %v696_v44  ;;  %v697_v36 = vadd.f32 0.5, %v695_v5  ;;  %v6987_v5 = vld [vmem:[#allocation52_spill] sm:$0xff] }
 0x13a   :  { %3472 = vtanh.f32 %v4729_v52 }
 0x13b   :  { %6952 = vst [vmem:[#allocation100_spill] sm:$0xff] %v4731_v0  ;;  %737 = vmatmul.f32.vlgmr.msra.gmra.mxu0 %v4731_v0  ;;  %760 = vmatmul.f32.vlgmr.msrb.gmra.mxu1 %v4731_v0 }
 0x13c   :  { %783 = vmatmul.f32.vlgmr.msrb.gmra.mxu2 %v4731_v0  ;;  %806 = vmatmul.f32.vlgmr.msrb.gmra.mxu3 %v4731_v0  ;;  %v4988_v0 = vld [vmem:[#allocation7 + $0x60] sm:$0xff] }
 0x13d   :  { %1009 = vmatpush.msra.mxu0 %v6953_v25  ;;  %1032 = vmatpush.msrb.mxu1 %v4140_v13  ;;  %v6958_v13 = vld [vmem:[#allocation19_spill] sm:$0xff]  ;;  %v400_v25 = vadd.f32 %v6987_v5, %v4710_v16 }
 0x13e   :  { %1055 = vmatpush.msrb.mxu2 %v4138_v12  ;;  %1078 = vmatpush.msrb.mxu3 %v4142_v14  ;;  %v6959_v12 = vld [vmem:[#allocation22_spill] sm:$0xff]  ;;  %v6960_v14 = vld [vmem:[#allocation23_spill] sm:$0xff] }
 0x13f   :  { %1010 = vmatpush.msra.mxu0 %v6954_v3  ;;  %1033 = vmatpush.msrb.mxu1 %v4155_v18  ;;  %v6962_v18 = vld [vmem:[#allocation25_spill] sm:$0xff]  ;;  %v4892_v5 = vld [vmem:[#allocation7 + $0x160] sm:$0xff] }
 0x140   :  { %v3473_v60 = vpop.eup %3472  ;;  %1056 = vmatpush.msrb.mxu2 %v4144_v15  ;;  %1079 = vmatpush.msrb.mxu3 %v6955_v41  ;;  %v6961_v15 = vld [vmem:[#allocation24_spill] sm:$0xff] }
 0x141   :  { %v4746_v10 = vmul.f32 %v3473_v60, %v697_v36  ;;  %1011 = vmatpush.msra.mxu0 %v6957_v17  ;;  %1034 = vmatpush.msrb.mxu1 %v4166_v21  ;;  %v6963_v21 = vld [vmem:[#allocation27_spill] sm:$0xff]  ;;  %v6988_v36 = vld [vmem:[#allocation53_spill] sm:$0xff] }
 0x142   :  { %1057 = vmatpush.msrb.mxu2 %v6958_v13  ;;  %1080 = vmatpush.msrb.mxu3 %v4168_v22  ;;  %v6964_v22 = vld [vmem:[#allocation31_spill] sm:$0xff] }
 0x143   :  { %6956 = vst [vmem:[#allocation17_spill] sm:$0xff] %v4746_v10  ;;  %740 = vmatmul.f32.gmra.mxu0 %v4746_v10  ;;  %763 = vmatmul.f32.gmra.mxu1 %v4746_v10 }
 0x144   :  { %786 = vmatmul.f32.gmra.mxu2 %v4746_v10  ;;  %809 = vmatmul.f32.gmra.mxu3 %v4746_v10  ;;  %v4985_v10 = vld [vmem:[#allocation7 + $0x98] sm:$0xff] }
 0x145   :  { %1012 = vmatpush.msra.mxu0 %v6959_v12  ;;  %1035 = vmatpush.msrb.mxu1 %v4179_v26  ;;  %v6966_v26 = vld [vmem:[#allocation28_spill] sm:$0xff] }
 0x146   :  { %1058 = vmatpush.msrb.mxu2 %v4174_v24  ;;  %1081 = vmatpush.msrb.mxu3 %v4181_v27  ;;  %v6965_v24 = vld [vmem:[#allocation32_spill] sm:$0xff]  ;;  %v6967_v27 = vld [vmem:[#allocation34_spill] sm:$0xff]  ;;  %7000 = vst [vmem:[#allocation28_spill] sm:$0xff] %v4988_v0 }
 0x147   :  { %1013 = vmatpush.msra.mxu0 %v6960_v14  ;;  %1036 = vmatpush.msrb.mxu1 %v4196_v30  ;;  %v6969_v30 = vld [vmem:[#allocation35_spill] sm:$0xff]  ;;  %6999 = vst [vmem:[#allocation32_spill] sm:$0xff] %v4985_v10 }
 0x148   :  { %1059 = vmatpush.msrb.mxu2 %v4186_v28  ;;  %1082 = vmatpush.msrb.mxu3 %v4198_v31  ;;  %v6968_v28 = vld [vmem:[#allocation33_spill] sm:$0xff] }
 0x149   :  { %1014 = vmatpush.msra.mxu0 %v6961_v15  ;;  %1037 = vmatpush.msrb.mxu1 %v4206_v33  ;;  %v6970_v31 = vld [vmem:[#allocation29_spill] sm:$0xff]  ;;  %v6972_v33 = vld [vmem:[#allocation36_spill] sm:$0xff] }
 0x14a   :  { %1060 = vmatpush.msrb.mxu2 %v4204_v32  ;;  %1083 = vmatpush.msrb.mxu3 %v4212_v35  ;;  %v6971_v32 = vld [vmem:[#allocation37_spill] sm:$0xff]  ;;  %v6973_v35 = vld [vmem:[#allocation38_spill] sm:$0xff] }
 0x14b   :  { %1015 = vmatpush.msra.mxu0 %v6962_v18  ;;  %1038 = vmatpush.msrb.mxu1 %v4227_v38  ;;  %v6975_v38 = vld [vmem:[#allocation40_spill] sm:$0xff] }
 0x14c   :  { %1061 = vmatpush.msrb.mxu2 %v4225_v37  ;;  %1084 = vmatpush.msrb.mxu3 %v4233_v40  ;;  %v6974_v37 = vld [vmem:[#allocation30_spill] sm:$0xff]  ;;  %v6976_v40 = vld [vmem:[#allocation39_spill] sm:$0xff] }
 0x14d   :  { %1016 = vmatpush.msra.mxu0 %v6895_v48  ;;  %1039 = vmatpush.msrb.mxu1 %v4246_v43  ;;  %v6978_v43 = vld [vmem:[#allocation96_spill] sm:$0xff]  ;;  %v6980_v48 = vld [vmem:[#allocation97_spill] sm:$0xff] }
 0x14e   :  { %1062 = vmatpush.msrb.mxu2 %v4244_v42  ;;  %1085 = vmatpush.msrb.mxu3 %v4252_v45  ;;  %v6977_v42 = vld [vmem:[#allocation41_spill] sm:$0xff]  ;;  %v6979_v45 = vld [vmem:[#allocation46_spill] sm:$0xff] }
 0x14f   :  { %1017 = vmatpush.msra.mxu0 %v4290_v55  ;;  %1040 = vmatpush.msrb.mxu1 %v4267_v49  ;;  %v6981_v49 = vld [vmem:[#allocation26_spill] sm:$0xff] }
 0x150   :  { %1063 = vmatpush.msrb.mxu2 %v4263_v47  ;;  %1086 = vmatpush.msrb.mxu3 %v4271_v50  ;;  %v267_v47 = vadd.f32 %v6979_v45, %v6978_v43  ;;  %v332_v50 = vadd.f32 %v6981_v49, %v6980_v48 }
 0x151   :  { %1018 = vmatpush.msra.mxu0 %v6963_v21  ;;  %1041 = vmatpush.msrb.mxu1 %v4286_v54 }
 0x152   :  { %1064 = vmatpush.msrb.mxu2 %v4284_v53  ;;  %1087 = vmatpush.msrb.mxu3 %v4292_v56 }
 0x153   :  { %1019 = vmatpush.msra.mxu0 %v4312_v61  ;;  %1042 = vmatpush.msrb.mxu1 %v4306_v59  ;;  %v6983_v61 = vld [vmem:[#allocation45_spill] sm:$0xff] }
 0x154   :  { %1065 = vmatpush.msrb.mxu2 %v4304_v58  ;;  %1088 = vmatpush.msrb.mxu3 %v4314_v62  ;;  %v6982_v58 = vld [vmem:[#allocation48_spill] sm:$0xff]  ;;  %v6984_v62 = vld [vmem:[#allocation49_spill] sm:$0xff]  ;;  %v465_v3 = vadd.f32 %v6988_v36, %v6983_v61 }
 0x155   :  { %1020 = vmatpush.msra.mxu0 %v4318_v63  ;;  %1043 = vmatpush.msrb.mxu1 %v4333_v6  ;;  %v397_v59 = vadd.f32 %v6982_v58, %v4710_v16  ;;  %v462_v63 = vadd.f32 %v6984_v62, %v6983_v61  ;;  %v6986_v6 = vld [vmem:[#allocation50_spill] sm:$0xff]  ;;  %v4898_v36 = vld [vmem:[#allocation7 + $0x170] sm:$0xff] }
 0x156   :  { %1066 = vmatpush.msrb.mxu2 %v4329_v1  ;;  %1089 = vmatpush.msrb.mxu3 %v4342_v9  ;;  %v6985_v1 = vld [vmem:[#allocation47_spill] sm:$0xff]  ;;  %v335_v9 = vadd.f32 %v6986_v6, %v6980_v48 }
 0x157   :  { %1021 = vmatpush.msra.mxu0 %v4331_v2  ;;  %1044 = vmatpush.msrb.mxu1 %v4358_v29  ;;  %v270_v2 = vadd.f32 %v6985_v1, %v6978_v43  ;;  %v4844_v1 = vld [vmem:[#allocation7 + $0x1f0] sm:$0xff] }
 0x158   :  { %1067 = vmatpush.msrb.mxu2 %v6964_v22  ;;  %1090 = vmatpush.msrb.mxu3 %v6965_v24 }
 0x159   :  { %1022 = vmatpush.msra.mxu0 %v6966_v26  ;;  %1045 = vmatpush.msrb.mxu1 %v6967_v27 }
 0x15a   :  { %1068 = vmatpush.msrb.mxu2 %v6968_v28  ;;  %1091 = vmatpush.msrb.mxu3 %v6969_v30 }
 0x15b   :  { %1023 = vmatpush.msra.mxu0 %v6970_v31  ;;  %1046 = vmatpush.msrb.mxu1 %v6971_v32 }
 0x15c   :  { %1069 = vmatpush.msrb.mxu2 %v6972_v33  ;;  %1092 = vmatpush.msrb.mxu3 %v6973_v35 }
 0x15d   :  { %1024 = vmatpush.msra.mxu0 %v6974_v37  ;;  %1047 = vmatpush.msrb.mxu1 %v6975_v38 }
 0x15e   :  { %1070 = vmatpush.msrb.mxu2 %v6976_v40  ;;  %1093 = vmatpush.msrb.mxu3 %v6977_v42 }
 0x1b8   :  { %v738_v53 = vpop.f32.mrf.mxu0  ;;  %v761_v54 = vpop.f32.mrf.mxu1 }
 0x1b9   :  { %v813_v55 = vadd.f32 %v738_v53, %v267_v47  ;;  %v814_v56 = vadd.f32 %v761_v54, %v332_v50 }
 0x1bb   :  { %3474 = vtanh.f32 %v813_v55 }
 0x1bc   :  { %3476 = vtanh.f32 %v814_v56 }
 0x1bf   :  { %v784_v29 = vpop.f32.mrf.mxu2  ;;  %v807_v8 = vpop.f32.mrf.mxu3 }
 0x1c0   :  { %v815_v11 = vadd.f32 %v784_v29, %v397_v59  ;;  %v816_v4 = vadd.f32 %v807_v8, %v462_v63  ;;  %v741_v23 = vpop.f32.mrf.mxu0  ;;  %v764_v19 = vpop.f32.mrf.mxu1  ;;  %v4841_v63 = vld [vmem:[#allocation7 + $0x1e8] sm:$0xff] }
 0x1c1   :  { %v3475_v46 = vpop.eup %3474  ;;  %v817_v39 = vadd.f32 %v741_v23, %v270_v2  ;;  %v818_v57 = vadd.f32 %v764_v19, %v335_v9  ;;  %v4847_v2 = vld [vmem:[#allocation7 + $0x1f8] sm:$0xff]  ;;  %v4850_v9 = vld [vmem:[#allocation7 + $0x1c0] sm:$0xff]  ;;  %v4853_v29 = vld [vmem:[#allocation7 + $0x1c8] sm:$0xff] }
 0x1c2   :  { %v3477_v7 = vpop.eup %3476  ;;  %3478 = vtanh.f32 %v815_v11  ;;  %v829_v34 = vmul.f32 0.5, %v3475_v46  ;;  %v4856_v11 = vld [vmem:[#allocation7 + $0x1d0] sm:$0xff]  ;;  %v4864_v19 = vld [vmem:[#allocation7 + $0x1a0] sm:$0xff]  ;;  %v4867_v46 = vld [vmem:[#allocation7 + $0x1a8] sm:$0xff] }
 0x1c3   :  { %v833_v44 = vmul.f32 0.5, %v3477_v7  ;;  %3480 = vtanh.f32 %v816_v4  ;;  %v4859_v4 = vld [vmem:[#allocation7 + $0x1d8] sm:$0xff]  ;;  %v4880_v7 = vld [vmem:[#allocation7 + $0x180] sm:$0xff] }
 0x1c4   :  { %3482 = vtanh.f32 %v817_v39  ;;  %v831_v60 = vadd.f32 0.5, %v829_v34  ;;  %v4870_v39 = vld [vmem:[#allocation7 + $0x1b0] sm:$0xff]  ;;  %v4883_v34 = vld [vmem:[#allocation7 + $0x188] sm:$0xff] }
 0x1c5   :  { %v835_v51 = vadd.f32 0.5, %v833_v44  ;;  %3484 = vtanh.f32 %v818_v57  ;;  %v4873_v57 = vld [vmem:[#allocation7 + $0x1b8] sm:$0xff]  ;;  %v4886_v44 = vld [vmem:[#allocation7 + $0x190] sm:$0xff] }
 0x1c7   :  { %v787_v41 = vpop.f32.mrf.mxu2  ;;  %v810_v17 = vpop.f32.mrf.mxu3  ;;  %v841_v18 = vmul.f32 %v835_v51, %v4726_v20  ;;  %v4889_v51 = vld [vmem:[#allocation7 + $0x198] sm:$0xff] }
 0x1c8   :  { %v3479_v13 = vpop.eup %3478  ;;  %v819_v12 = vadd.f32 %v787_v41, %v400_v25  ;;  %v820_v14 = vadd.f32 %v810_v17, %v465_v3  ;;  %v4895_v25 = vld [vmem:[#allocation7 + $0x168] sm:$0xff]  ;;  %v4901_v3 = vld [vmem:[#allocation7 + $0x178] sm:$0xff]  ;;  %v4910_v17 = vld [vmem:[#allocation7 + $0x150] sm:$0xff] }
 0x1c9   :  { %v3481_v15 = vpop.eup %3480  ;;  %v843_v21 = vmul.f32 %v3479_v13, %v831_v60  ;;  %v4904_v60 = vld [vmem:[#allocation7 + $0x140] sm:$0xff]  ;;  %v4907_v41 = vld [vmem:[#allocation7 + $0x148] sm:$0xff]  ;;  %v4913_v13 = vld [vmem:[#allocation7 + $0x158] sm:$0xff] }
 0x1ca   :  { %v3483_v22 = vpop.eup %3482  ;;  %3486 = vtanh.f32 %v819_v12  ;;  %v837_v45 = vmul.f32 0.5, %v3481_v15  ;;  %v4916_v12 = vld [vmem:[#allocation7 + $0x120] sm:$0xff]  ;;  %v4922_v15 = vld [vmem:[#allocation7 + $0x130] sm:$0xff] }
 0x1cb   :  { %v3485_v24 = vpop.eup %3484  ;;  %v4825_v26 = vadd.f32 %v843_v21, %v841_v18  ;;  %v830_v31 = vmul.f32 0.5, %v3483_v22  ;;  %3488 = vtanh.f32 %v820_v14  ;;  %v4919_v14 = vld [vmem:[#allocation7 + $0x128] sm:$0xff]  ;;  %v4925_v18 = vld [vmem:[#allocation7 + $0x138] sm:$0xff]  ;;  %v4928_v21 = vld [vmem:[#allocation7 + $0x100] sm:$0xff] }
 0x1cc   :  { %v834_v37 = vmul.f32 0.5, %v3485_v24  ;;  %v839_v20 = vadd.f32 0.5, %v837_v45  ;;  %v4931_v22 = vld [vmem:[#allocation7 + $0x108] sm:$0xff]  ;;  %v4934_v24 = vld [vmem:[#allocation7 + $0x110] sm:$0xff] }
 0x1cd   :  { %3490 = vtanh.f32 %v4825_v26  ;;  %v832_v49 = vadd.f32 0.5, %v830_v31  ;;  %v4937_v31 = vld [vmem:[#allocation7 + $0x118] sm:$0xff]  ;;  %v4943_v45 = vld [vmem:[#allocation7 + $0xe8] sm:$0xff] }
 0x1ce   :  { %v836_v47 = vadd.f32 0.5, %v834_v37  ;;  %v4940_v37 = vld [vmem:[#allocation7 + $0xe0] sm:$0xff] }
 0x1d0   :  { %v3487_v50 = vpop.eup %3486  ;;  %v842_v53 = vmul.f32 %v836_v47, %v4729_v52  ;;  %v4838_v52 = vld [vmem:[#allocation7 + $0x1e0] sm:$0xff]  ;;  %v4946_v47 = vld [vmem:[#allocation7 + $0xf0] sm:$0xff] }
 0x1d1   :  { %v844_v54 = vmul.f32 %v3487_v50, %v832_v49  ;;  %v3489_v55 = vpop.eup %3488  ;;  %v4949_v49 = vld [vmem:[#allocation7 + $0xf8] sm:$0xff]  ;;  %v4952_v50 = vld [vmem:[#allocation7 + $0xc0] sm:$0xff] }
 0x1d2   :  { %v838_v62 = vmul.f32 0.5, %v3489_v55  ;;  %v4961_v55 = vld [vmem:[#allocation7 + $0xd8] sm:$0xff] }
 0x1d3   :  { %v3491_v56 = vpop.eup %3490  ;;  %v4829_v58 = vadd.f32 %v844_v54, %v842_v53  ;;  %v4955_v53 = vld [vmem:[#allocation7 + $0xc8] sm:$0xff]  ;;  %v4958_v54 = vld [vmem:[#allocation7 + $0xd0] sm:$0xff]  ;;  %6991 = vst [vmem:[#allocation21_spill] sm:$0xff] %v4961_v55 }
 0x1d4   :  { %v4831_v59 = vmul.f32 %v3491_v56, %v839_v20  ;;  %v840_v6 = vadd.f32 0.5, %v838_v62  ;;  %v4964_v20 = vld [vmem:[#allocation7 + $0xa0] sm:$0xff]  ;;  %v4967_v56 = vld [vmem:[#allocation7 + $0xa8] sm:$0xff]  ;;  %v4970_v62 = vld [vmem:[#allocation7 + $0xb0] sm:$0xff] }
 0x1d5   :  { %3492 = vtanh.f32 %v4829_v58  ;;  %6992 = vst [vmem:[#allocation19_spill] sm:$0xff] %v4964_v20 }
 0x1d6   :  { %6989 = vst [vmem:[#allocation20_spill] sm:$0xff] %v4831_v59  ;;  %881 = vmatmul.f32.vlgmr.msrb.gmra.mxu0 %v4831_v59  ;;  %904 = vmatmul.f32.vlgmr.msra.gmra.mxu1 %v4831_v59 }
 0x1d7   :  { %927 = vmatmul.f32.vlgmr.msra.gmra.mxu2 %v4831_v59  ;;  %950 = vmatmul.f32.vlgmr.msra.gmra.mxu3 %v4831_v59  ;;  %6993 = vst [vmem:[#allocation22_spill] sm:$0xff] %v4967_v56  ;;  %v4982_v59 = vld [vmem:[#allocation7 + $0x90] sm:$0xff] }
 0x1d8   :  { %1153 = vmatpush.msrb.mxu0 %v4838_v52  ;;  %1176 = vmatpush.msra.mxu1 %v4841_v63  ;;  %6994 = vst [vmem:[#allocation23_spill] sm:$0xff] %v4970_v62 }
 0x1d9   :  { %1199 = vmatpush.msra.mxu2 %v4844_v1  ;;  %1222 = vmatpush.msra.mxu3 %v4847_v2  ;;  %6998 = vst [vmem:[#allocation31_spill] sm:$0xff] %v4982_v59 }
 0x1da   :  { %1154 = vmatpush.msrb.mxu0 %v4850_v9  ;;  %1177 = vmatpush.msra.mxu1 %v4853_v29 }
 0x1db   :  { %v3493_v8 = vpop.eup %3492  ;;  %1200 = vmatpush.msra.mxu2 %v4856_v11  ;;  %1223 = vmatpush.msra.mxu3 %v4859_v4 }
 0x1dc   :  { %v4862_v23 = vmul.f32 %v3493_v8, %v840_v6  ;;  %1155 = vmatpush.msrb.mxu0 %v4864_v19  ;;  %1178 = vmatpush.msra.mxu1 %v4867_v46  ;;  %v4973_v6 = vld [vmem:[#allocation7 + $0xb8] sm:$0xff]  ;;  %v4976_v8 = vld [vmem:[#allocation7 + $0x80] sm:$0xff] }
 0x1dd   :  { %1201 = vmatpush.msra.mxu2 %v4870_v39  ;;  %1224 = vmatpush.msra.mxu3 %v4873_v57  ;;  %6995 = vst [vmem:[#allocation24_spill] sm:$0xff] %v4973_v6 }
 0x1de   :  { %6990 = vst [vmem:[#allocation18_spill] sm:$0xff] %v4862_v23  ;;  %884 = vmatmul.f32.gmra.mxu0 %v4862_v23  ;;  %907 = vmatmul.f32.gmra.mxu1 %v4862_v23 }
 0x1df   :  { %930 = vmatmul.f32.gmra.mxu2 %v4862_v23  ;;  %953 = vmatmul.f32.gmra.mxu3 %v4862_v23  ;;  %6996 = vst [vmem:[#allocation25_spill] sm:$0xff] %v4976_v8  ;;  %v4979_v23 = vld [vmem:[#allocation7 + $0x88] sm:$0xff] }
 0x1e0   :  { %1156 = vmatpush.msrb.mxu0 %v4880_v7  ;;  %1179 = vmatpush.msra.mxu1 %v4883_v34  ;;  %6997 = vst [vmem:[#allocation27_spill] sm:$0xff] %v4979_v23 }
 0x1e1   :  { %1202 = vmatpush.msra.mxu2 %v4886_v44  ;;  %1225 = vmatpush.msra.mxu3 %v4889_v51 }
 0x1e2   :  { %1157 = vmatpush.msrb.mxu0 %v4892_v5  ;;  %1180 = vmatpush.msra.mxu1 %v4895_v25 }
 0x1e3   :  { %1203 = vmatpush.msra.mxu2 %v4898_v36  ;;  %1226 = vmatpush.msra.mxu3 %v4901_v3 }
 0x1e4   :  { %1158 = vmatpush.msrb.mxu0 %v4904_v60  ;;  %1181 = vmatpush.msra.mxu1 %v4907_v41 }
 0x1e5   :  { %1204 = vmatpush.msra.mxu2 %v4910_v17  ;;  %1227 = vmatpush.msra.mxu3 %v4913_v13 }
 0x1e6   :  { %1159 = vmatpush.msrb.mxu0 %v4916_v12  ;;  %1182 = vmatpush.msra.mxu1 %v4919_v14 }
 0x1e7   :  { %1205 = vmatpush.msra.mxu2 %v4922_v15  ;;  %1228 = vmatpush.msra.mxu3 %v4925_v18 }
 0x1e8   :  { %1160 = vmatpush.msrb.mxu0 %v4928_v21  ;;  %1183 = vmatpush.msra.mxu1 %v4931_v22 }
 0x1e9   :  { %1206 = vmatpush.msra.mxu2 %v4934_v24  ;;  %1229 = vmatpush.msra.mxu3 %v4937_v31 }
 0x1ea   :  { %1161 = vmatpush.msrb.mxu0 %v4940_v37  ;;  %1184 = vmatpush.msra.mxu1 %v4943_v45 }
 0x1eb   :  { %1207 = vmatpush.msra.mxu2 %v4946_v47  ;;  %1230 = vmatpush.msra.mxu3 %v4949_v49 }
 0x1ec   :  { %1162 = vmatpush.msrb.mxu0 %v4952_v50  ;;  %1185 = vmatpush.msra.mxu1 %v4955_v53 }
 0x1ed   :  { %1208 = vmatpush.msra.mxu2 %v4958_v54  ;;  %1231 = vmatpush.msra.mxu3 %v4961_v55 }
 0x1ee   :  { %1163 = vmatpush.msrb.mxu0 %v4964_v20  ;;  %1186 = vmatpush.msra.mxu1 %v4967_v56 }
 0x1ef   :  { %1209 = vmatpush.msra.mxu2 %v4970_v62  ;;  %1232 = vmatpush.msra.mxu3 %v4973_v6  ;;  %v4991_v6 = vld [vmem:[#allocation7 + $0x68] sm:$0xff] }
 0x1f0   :  { %1164 = vmatpush.msrb.mxu0 %v4976_v8  ;;  %1187 = vmatpush.msra.mxu1 %v4979_v23  ;;  %7001 = vst [vmem:[#allocation34_spill] sm:$0xff] %v4991_v6  ;;  %v4994_v8 = vld [vmem:[#allocation7 + $0x70] sm:$0xff]  ;;  %v4997_v23 = vld [vmem:[#allocation7 + $0x78] sm:$0xff] }
 0x1f1   :  { %1210 = vmatpush.msra.mxu2 %v4982_v59  ;;  %1233 = vmatpush.msra.mxu3 %v4985_v10  ;;  %7002 = vst [vmem:[#allocation33_spill] sm:$0xff] %v4994_v8  ;;  %v5000_v59 = vld [vmem:[#allocation7 + $0x40] sm:$0xff] }
 0x1f2   :  { %1165 = vmatpush.msrb.mxu0 %v4988_v0  ;;  %1188 = vmatpush.msra.mxu1 %v4991_v6  ;;  %7003 = vst [vmem:[#allocation35_spill] sm:$0xff] %v4997_v23  ;;  %v5006_v0 = vld [vmem:[#allocation7 + $0x20] sm:$0xff] }
 0x1f3   :  { %1211 = vmatpush.msra.mxu2 %v4994_v8  ;;  %1234 = vmatpush.msra.mxu3 %v4997_v23  ;;  %7004 = vst [vmem:[#allocation29_spill] sm:$0xff] %v5000_v59  ;;  %v5012_v23 = vld [vmem:[#allocation7] sm:$0xff] }
 0x1f4   :  { %1166 = vmatpush.msrb.mxu0 %v5000_v59  ;;  %1189 = vmatpush.msra.mxu1 %v6967_v27  ;;  %7005 = vst [vmem:[#allocation37_spill] sm:$0xff] %v5006_v0  ;;  %v7007_v27 = vld [vmem:[#allocation51_spill] sm:$0xff] }
 0x1f5   :  { %1212 = vmatpush.msra.mxu2 %v6968_v28  ;;  %1235 = vmatpush.msra.mxu3 %v6969_v30  ;;  %7006 = vst [vmem:[#allocation36_spill] sm:$0xff] %v5012_v23  ;;  %v273_v28 = vadd.f32 %v7007_v27, %v6978_v43  ;;  %v7008_v30 = vld [vmem:[#allocation54_spill] sm:$0xff] }
 0x1f6   :  { %1167 = vmatpush.msrb.mxu0 %v5006_v0  ;;  %1190 = vmatpush.msra.mxu1 %v6971_v32  ;;  %v338_v32 = vadd.f32 %v7008_v30, %v6980_v48  ;;  %v7012_v27 = vld [vmem:[#allocation58_spill] sm:$0xff] }
 0x1f7   :  { %1213 = vmatpush.msra.mxu2 %v6972_v33  ;;  %1236 = vmatpush.msra.mxu3 %v6973_v35  ;;  %v341_v10 = vadd.f32 %v7012_v27, %v6980_v48  ;;  %v7014_v48 = vld [vmem:[#allocation60_spill] sm:$0xff] }
 0x1f8   :  { %1168 = vmatpush.msrb.mxu0 %v5012_v23  ;;  %1191 = vmatpush.msra.mxu1 %v6975_v38  ;;  %v7009_v23 = vld [vmem:[#allocation55_spill] sm:$0xff]  ;;  %v7010_v38 = vld [vmem:[#allocation56_spill] sm:$0xff] }
 0x1f9   :  { %1214 = vmatpush.msra.mxu2 %v6976_v40  ;;  %1237 = vmatpush.msra.mxu3 %v6977_v42  ;;  %v403_v8 = vadd.f32 %v7009_v23, %v4710_v16  ;;  %v468_v40 = vadd.f32 %v7010_v38, %v6983_v61  ;;  %v7011_v42 = vld [vmem:[#allocation57_spill] sm:$0xff] }
 0x1fa   :  { %v276_v6 = vadd.f32 %v7011_v42, %v6978_v43  ;;  %v7013_v42 = vld [vmem:[#allocation59_spill] sm:$0xff] }
 0x1fb   :  { %v406_v27 = vadd.f32 %v7013_v42, %v4710_v16 }
 0x253   :  { %v882_v0 = vpop.f32.mrf.mxu0  ;;  %v905_v33 = vpop.f32.mrf.mxu1 }
 0x254   :  { %v957_v59 = vadd.f32 %v882_v0, %v273_v28  ;;  %v958_v35 = vadd.f32 %v905_v33, %v338_v32 }
 0x256   :  { %3494 = vtanh.f32 %v957_v59 }
 0x257   :  { %3496 = vtanh.f32 %v958_v35 }
 0x25a   :  { %v928_v62 = vpop.f32.mrf.mxu2  ;;  %v951_v30 = vpop.f32.mrf.mxu3 }
 0x25b   :  { %v959_v56 = vadd.f32 %v928_v62, %v403_v8  ;;  %v960_v20 = vadd.f32 %v951_v30, %v468_v40  ;;  %v885_v0 = vpop.f32.mrf.mxu0  ;;  %v908_v28 = vpop.f32.mrf.mxu1  ;;  %v471_v62 = vadd.f32 %v7014_v48, %v6983_v61 }
 0x25c   :  { %v3495_v59 = vpop.eup %3494  ;;  %v961_v32 = vadd.f32 %v885_v0, %v276_v6  ;;  %v962_v33 = vadd.f32 %v908_v28, %v341_v10 }
 0x25d   :  { %v3497_v35 = vpop.eup %3496  ;;  %3498 = vtanh.f32 %v959_v56  ;;  %v973_v23 = vmul.f32 0.5, %v3495_v59 }
 0x25e   :  { %v977_v55 = vmul.f32 0.5, %v3497_v35  ;;  %3500 = vtanh.f32 %v960_v20 }
 0x25f   :  { %3502 = vtanh.f32 %v961_v32  ;;  %v975_v8 = vadd.f32 0.5, %v973_v23 }
 0x260   :  { %v979_v38 = vadd.f32 0.5, %v977_v55  ;;  %3504 = vtanh.f32 %v962_v33 }
 0x262   :  { %v931_v40 = vpop.f32.mrf.mxu2  ;;  %v954_v30 = vpop.f32.mrf.mxu3  ;;  %v985_v56 = vmul.f32 %v979_v38, %v4825_v26 }
 0x263   :  { %v3499_v43 = vpop.eup %3498  ;;  %v963_v6 = vadd.f32 %v931_v40, %v406_v27  ;;  %v964_v10 = vadd.f32 %v954_v30, %v471_v62 }
 0x264   :  { %v3501_v0 = vpop.eup %3500  ;;  %v987_v28 = vmul.f32 %v3499_v43, %v975_v8 }
 0x265   :  { %v3503_v20 = vpop.eup %3502  ;;  %3506 = vtanh.f32 %v963_v6  ;;  %v981_v48 = vmul.f32 0.5, %v3501_v0  ;;  %v7017_v0 = vld [vmem:[#allocation21_spill] sm:$0xff] }
 0x266   :  { %v3505_v55 = vpop.eup %3504  ;;  %v5035_v59 = vadd.f32 %v987_v28, %v985_v56  ;;  %v974_v32 = vmul.f32 0.5, %v3503_v20  ;;  %3508 = vtanh.f32 %v964_v10  ;;  %v7018_v56 = vld [vmem:[#allocation19_spill] sm:$0xff]  ;;  %v7019_v28 = vld [vmem:[#allocation22_spill] sm:$0xff] }
 0x267   :  { %v978_v33 = vmul.f32 0.5, %v3505_v55  ;;  %v983_v26 = vadd.f32 0.5, %v981_v48  ;;  %v7020_v20 = vld [vmem:[#allocation23_spill] sm:$0xff]  ;;  %v7021_v55 = vld [vmem:[#allocation24_spill] sm:$0xff] }
 0x268   :  { %3510 = vtanh.f32 %v5035_v59  ;;  %v976_v23 = vadd.f32 0.5, %v974_v32  ;;  %v7022_v32 = vld [vmem:[#allocation25_spill] sm:$0xff]  ;;  %v7024_v48 = vld [vmem:[#allocation31_spill] sm:$0xff] }
 0x269   :  { %v980_v35 = vadd.f32 0.5, %v978_v33  ;;  %v7023_v33 = vld [vmem:[#allocation27_spill] sm:$0xff] }
 0x26b   :  { %v3507_v42 = vpop.eup %3506  ;;  %v986_v27 = vmul.f32 %v980_v35, %v4829_v58  ;;  %v7025_v35 = vld [vmem:[#allocation32_spill] sm:$0xff] }
 0x26c   :  { %v988_v62 = vmul.f32 %v3507_v42, %v976_v23  ;;  %v3509_v40 = vpop.eup %3508  ;;  %v7026_v23 = vld [vmem:[#allocation28_spill] sm:$0xff]  ;;  %v7027_v42 = vld [vmem:[#allocation34_spill] sm:$0xff] }
 0x26d   :  { %v982_v30 = vmul.f32 0.5, %v3509_v40  ;;  %v7030_v40 = vld [vmem:[#allocation29_spill] sm:$0xff] }
 0x26e   :  { %v3511_v43 = vpop.eup %3510  ;;  %v5039_v38 = vadd.f32 %v988_v62, %v986_v27  ;;  %v7028_v27 = vld [vmem:[#allocation33_spill] sm:$0xff]  ;;  %v7029_v62 = vld [vmem:[#allocation35_spill] sm:$0xff] }
 0x26f   :  { %v5041_v8 = vmul.f32 %v3511_v43, %v983_v26  ;;  %v984_v58 = vadd.f32 0.5, %v982_v30  ;;  %v5107_v26 = vld [vmem:[#allocation7 + $0x48] sm:$0xff]  ;;  %v5110_v43 = vld [vmem:[#allocation7 + $0x50] sm:$0xff]  ;;  %v5113_v30 = vld [vmem:[#allocation7 + $0x58] sm:$0xff] }
 0x270   :  { %3512 = vtanh.f32 %v5039_v38  ;;  %7031 = vst [vmem:[#allocation40_spill] sm:$0xff] %v5107_v26 }
 0x271   :  { %7015 = vst [vmem:[#allocation38_spill] sm:$0xff] %v5041_v8  ;;  %1025 = vmatmul.f32.vlgmr.msra.gmra.mxu0 %v5041_v8  ;;  %1048 = vmatmul.f32.vlgmr.msrb.gmra.mxu1 %v5041_v8 }
 0x272   :  { %1071 = vmatmul.f32.vlgmr.msrb.gmra.mxu2 %v5041_v8  ;;  %1094 = vmatmul.f32.vlgmr.msrb.gmra.mxu3 %v5041_v8  ;;  %7032 = vst [vmem:[#allocation39_spill] sm:$0xff] %v5110_v43  ;;  %v5123_v8 = vld [vmem:[#allocation7 + $0x38] sm:$0xff] }
 0x273   :  { %1297 = vmatpush.msra.mxu0 %v4838_v52  ;;  %1320 = vmatpush.msrb.mxu1 %v4841_v63  ;;  %7033 = vst [vmem:[#allocation41_spill] sm:$0xff] %v5113_v30 }
 0x274   :  { %1343 = vmatpush.msrb.mxu2 %v4844_v1  ;;  %1366 = vmatpush.msrb.mxu3 %v4847_v2  ;;  %7037 = vst [vmem:[#allocation48_spill] sm:$0xff] %v5123_v8 }
 0x275   :  { %1298 = vmatpush.msra.mxu0 %v4850_v9  ;;  %1321 = vmatpush.msrb.mxu1 %v4853_v29 }
 0x276   :  { %v3513_v6 = vpop.eup %3512  ;;  %1344 = vmatpush.msrb.mxu2 %v4856_v11  ;;  %1367 = vmatpush.msrb.mxu3 %v4859_v4 }
 0x277   :  { %v5056_v10 = vmul.f32 %v3513_v6, %v984_v58  ;;  %1299 = vmatpush.msra.mxu0 %v4864_v19  ;;  %1322 = vmatpush.msrb.mxu1 %v4867_v46  ;;  %v7034_v58 = vld [vmem:[#allocation37_spill] sm:$0xff]  ;;  %v5117_v6 = vld [vmem:[#allocation7 + $0x28] sm:$0xff] }
 0x278   :  { %1345 = vmatpush.msrb.mxu2 %v4870_v39  ;;  %1368 = vmatpush.msrb.mxu3 %v4873_v57  ;;  %7035 = vst [vmem:[#allocation46_spill] sm:$0xff] %v5117_v6 }
 0x279   :  { %7016 = vst [vmem:[#allocation30_spill] sm:$0xff] %v5056_v10  ;;  %1028 = vmatmul.f32.gmra.mxu0 %v5056_v10  ;;  %1051 = vmatmul.f32.gmra.mxu1 %v5056_v10 }
 0x27a   :  { %1074 = vmatmul.f32.gmra.mxu2 %v5056_v10  ;;  %1097 = vmatmul.f32.gmra.mxu3 %v5056_v10  ;;  %v5120_v10 = vld [vmem:[#allocation7 + $0x30] sm:$0xff] }
 0x27b   :  { %1300 = vmatpush.msra.mxu0 %v4880_v7  ;;  %1323 = vmatpush.msrb.mxu1 %v4883_v34  ;;  %7036 = vst [vmem:[#allocation26_spill] sm:$0xff] %v5120_v10 }
 0x27c   :  { %1346 = vmatpush.msrb.mxu2 %v4886_v44  ;;  %1369 = vmatpush.msrb.mxu3 %v4889_v51 }
 0x27d   :  { %1301 = vmatpush.msra.mxu0 %v4892_v5  ;;  %1324 = vmatpush.msrb.mxu1 %v4895_v25 }
 0x27e   :  { %1347 = vmatpush.msrb.mxu2 %v4898_v36  ;;  %1370 = vmatpush.msrb.mxu3 %v4901_v3 }
 0x27f   :  { %1302 = vmatpush.msra.mxu0 %v4904_v60  ;;  %1325 = vmatpush.msrb.mxu1 %v4907_v41 }
 0x280   :  { %1348 = vmatpush.msrb.mxu2 %v4910_v17  ;;  %1371 = vmatpush.msrb.mxu3 %v4913_v13 }
 0x281   :  { %1303 = vmatpush.msra.mxu0 %v4916_v12  ;;  %1326 = vmatpush.msrb.mxu1 %v4919_v14 }
 0x282   :  { %1349 = vmatpush.msrb.mxu2 %v4922_v15  ;;  %1372 = vmatpush.msrb.mxu3 %v4925_v18 }
 0x283   :  { %1304 = vmatpush.msra.mxu0 %v4928_v21  ;;  %1327 = vmatpush.msrb.mxu1 %v4931_v22 }
 0x284   :  { %1350 = vmatpush.msrb.mxu2 %v4934_v24  ;;  %1373 = vmatpush.msrb.mxu3 %v4937_v31 }
 0x285   :  { %1305 = vmatpush.msra.mxu0 %v4940_v37  ;;  %1328 = vmatpush.msrb.mxu1 %v4943_v45 }
 0x286   :  { %1351 = vmatpush.msrb.mxu2 %v4946_v47  ;;  %1374 = vmatpush.msrb.mxu3 %v4949_v49 }
 0x287   :  { %1306 = vmatpush.msra.mxu0 %v4952_v50  ;;  %1329 = vmatpush.msrb.mxu1 %v4955_v53 }
 0x288   :  { %1352 = vmatpush.msrb.mxu2 %v4958_v54  ;;  %1375 = vmatpush.msrb.mxu3 %v7017_v0 }
 0x289   :  { %1307 = vmatpush.msra.mxu0 %v7018_v56  ;;  %1330 = vmatpush.msrb.mxu1 %v7019_v28 }
 0x28a   :  { %1353 = vmatpush.msrb.mxu2 %v7020_v20  ;;  %1376 = vmatpush.msrb.mxu3 %v7021_v55 }
 0x28b   :  { %1308 = vmatpush.msra.mxu0 %v7022_v32  ;;  %1331 = vmatpush.msrb.mxu1 %v7023_v33 }
 0x28c   :  { %1354 = vmatpush.msrb.mxu2 %v7024_v48  ;;  %1377 = vmatpush.msrb.mxu3 %v7025_v35 }
 0x28d   :  { %1309 = vmatpush.msra.mxu0 %v7026_v23  ;;  %1332 = vmatpush.msrb.mxu1 %v7027_v42 }
 0x28e   :  { %1355 = vmatpush.msrb.mxu2 %v7028_v27  ;;  %1378 = vmatpush.msrb.mxu3 %v7029_v62  ;;  %v7044_v62 = vld [vmem:[#allocation97_spill] sm:$0xff] }
 0x28f   :  { %1310 = vmatpush.msra.mxu0 %v7030_v40  ;;  %1333 = vmatpush.msrb.mxu1 %v5107_v26  ;;  %v7038_v26 = vld [vmem:[#allocation36_spill] sm:$0xff]  ;;  %v7045_v27 = vld [vmem:[#allocation61_spill] sm:$0xff] }
 0x290   :  { %1356 = vmatpush.msrb.mxu2 %v5110_v43  ;;  %1379 = vmatpush.msrb.mxu3 %v5113_v30  ;;  %v5127_v43 = vld [vmem:[#allocation7 + $0x8] sm:$0xff]  ;;  %v5130_v30 = vld [vmem:[#allocation7 + $0x10] sm:$0xff] }
 0x291   :  { %1311 = vmatpush.msra.mxu0 %v7034_v58  ;;  %1334 = vmatpush.msrb.mxu1 %v5117_v6  ;;  %7039 = vst [vmem:[#allocation45_spill] sm:$0xff] %v5127_v43  ;;  %v5133_v58 = vld [vmem:[#allocation7 + $0x18] sm:$0xff]  ;;  %v7042_v6 = vld [vmem:[#allocation96_spill] sm:$0xff] }
 0x292   :  { %1357 = vmatpush.msrb.mxu2 %v5120_v10  ;;  %1380 = vmatpush.msrb.mxu3 %v5123_v8  ;;  %7040 = vst [vmem:[#allocation49_spill] sm:$0xff] %v5130_v30  ;;  %v7043_v10 = vld [vmem:[#allocation62_spill] sm:$0xff]  ;;  %v344_v8 = vadd.f32 %v7045_v27, %v7044_v62 }
 0x293   :  { %1312 = vmatpush.msra.mxu0 %v7038_v26  ;;  %1335 = vmatpush.msrb.mxu1 %v5127_v43  ;;  %7041 = vst [vmem:[#allocation47_spill] sm:$0xff] %v5133_v58  ;;  %v279_v40 = vadd.f32 %v7043_v10, %v7042_v6  ;;  %v7046_v43 = vld [vmem:[#allocation63_spill] sm:$0xff]  ;;  %v7049_v10 = vld [vmem:[#allocation65_spill] sm:$0xff] }
 0x294   :  { %1358 = vmatpush.msrb.mxu2 %v5130_v30  ;;  %1381 = vmatpush.msrb.mxu3 %v5133_v58  ;;  %v409_v48 = vadd.f32 %v7046_v43, %v4710_v16  ;;  %v7047_v30 = vld [vmem:[#allocation64_spill] sm:$0xff]  ;;  %v7048_v58 = vld [vmem:[#allocation66_spill] sm:$0xff]  ;;  %v347_v55 = vadd.f32 %v7049_v10, %v7044_v62 }
 0x295   :  { %v474_v33 = vadd.f32 %v7047_v30, %v6983_v61  ;;  %v282_v32 = vadd.f32 %v7048_v58, %v7042_v6  ;;  %v7050_v58 = vld [vmem:[#allocation67_spill] sm:$0xff]  ;;  %v7051_v62 = vld [vmem:[#allocation68_spill] sm:$0xff] }
 0x296   :  { %v412_v10 = vadd.f32 %v7050_v58, %v4710_v16 }
 0x2ee   :  { %v1026_v42 = vpop.f32.mrf.mxu0  ;;  %v1049_v26 = vpop.f32.mrf.mxu1 }
 0x2ef   :  { %v1101_v23 = vadd.f32 %v1026_v42, %v279_v40  ;;  %v1102_v35 = vadd.f32 %v1049_v26, %v344_v8 }
 0x2f1   :  { %3514 = vtanh.f32 %v1101_v23 }
 0x2f2   :  { %3516 = vtanh.f32 %v1102_v35 }
 0x2f5   :  { %v1072_v20 = vpop.f32.mrf.mxu2  ;;  %v1095_v27 = vpop.f32.mrf.mxu3 }
 0x2f6   :  { %v1103_v28 = vadd.f32 %v1072_v20, %v409_v48  ;;  %v1104_v56 = vadd.f32 %v1095_v27, %v474_v33  ;;  %v1029_v42 = vpop.f32.mrf.mxu0  ;;  %v1052_v8 = vpop.f32.mrf.mxu1  ;;  %v477_v20 = vadd.f32 %v7051_v62, %v6983_v61 }
 0x2f7   :  { %v3515_v23 = vpop.eup %3514  ;;  %v1105_v35 = vadd.f32 %v1029_v42, %v282_v32  ;;  %v1106_v40 = vadd.f32 %v1052_v8, %v347_v55 }
 0x2f8   :  { %v3517_v26 = vpop.eup %3516  ;;  %3518 = vtanh.f32 %v1103_v28  ;;  %v1117_v43 = vmul.f32 0.5, %v3515_v23 }
 0x2f9   :  { %v1121_v0 = vmul.f32 0.5, %v3517_v26  ;;  %3520 = vtanh.f32 %v1104_v56 }
 0x2fa   :  { %3522 = vtanh.f32 %v1105_v35  ;;  %v1119_v33 = vadd.f32 0.5, %v1117_v43 }
 0x2fb   :  { %v1123_v30 = vadd.f32 0.5, %v1121_v0  ;;  %3524 = vtanh.f32 %v1106_v40 }
 0x2fd   :  { %v1075_v48 = vpop.f32.mrf.mxu2  ;;  %v1098_v27 = vpop.f32.mrf.mxu3  ;;  %v1129_v28 = vmul.f32 %v1123_v30, %v5035_v59 }
 0x2fe   :  { %v3519_v6 = vpop.eup %3518  ;;  %v1107_v32 = vadd.f32 %v1075_v48, %v412_v10  ;;  %v1108_v55 = vadd.f32 %v1098_v27, %v477_v20 }
 0x2ff   :  { %v3521_v42 = vpop.eup %3520  ;;  %v1131_v8 = vmul.f32 %v3519_v6, %v1119_v33 }
 0x300   :  { %v3523_v56 = vpop.eup %3522  ;;  %3526 = vtanh.f32 %v1107_v32  ;;  %v1125_v62 = vmul.f32 0.5, %v3521_v42  ;;  %v7054_v42 = vld [vmem:[#allocation21_spill] sm:$0xff] }
 0x301   :  { %v3525_v0 = vpop.eup %3524  ;;  %v5153_v23 = vadd.f32 %v1131_v8, %v1129_v28  ;;  %v1118_v35 = vmul.f32 0.5, %v3523_v56  ;;  %3528 = vtanh.f32 %v1108_v55  ;;  %v7055_v28 = vld [vmem:[#allocation19_spill] sm:$0xff]  ;;  %v7056_v8 = vld [vmem:[#allocation22_spill] sm:$0xff] }
 0x302   :  { %v1122_v40 = vmul.f32 0.5, %v3525_v0  ;;  %v1127_v59 = vadd.f32 0.5, %v1125_v62  ;;  %v7057_v56 = vld [vmem:[#allocation23_spill] sm:$0xff]  ;;  %v7058_v0 = vld [vmem:[#allocation24_spill] sm:$0xff] }
 0x303   :  { %3530 = vtanh.f32 %v5153_v23  ;;  %v1120_v43 = vadd.f32 0.5, %v1118_v35  ;;  %v7059_v35 = vld [vmem:[#allocation25_spill] sm:$0xff]  ;;  %v7061_v62 = vld [vmem:[#allocation31_spill] sm:$0xff] }
 0x304   :  { %v1124_v26 = vadd.f32 0.5, %v1122_v40  ;;  %v7060_v40 = vld [vmem:[#allocation27_spill] sm:$0xff] }
 0x306   :  { %v3527_v58 = vpop.eup %3526  ;;  %v1130_v10 = vmul.f32 %v1124_v26, %v5039_v38  ;;  %v7062_v26 = vld [vmem:[#allocation32_spill] sm:$0xff] }
 0x307   :  { %v1132_v20 = vmul.f32 %v3527_v58, %v1120_v43  ;;  %v3529_v48 = vpop.eup %3528  ;;  %v7063_v43 = vld [vmem:[#allocation28_spill] sm:$0xff]  ;;  %v7064_v58 = vld [vmem:[#allocation34_spill] sm:$0xff] }
 0x308   :  { %v1126_v27 = vmul.f32 0.5, %v3529_v48  ;;  %v7067_v48 = vld [vmem:[#allocation29_spill] sm:$0xff] }
 0x309   :  { %v3531_v6 = vpop.eup %3530  ;;  %v5157_v30 = vadd.f32 %v1132_v20, %v1130_v10  ;;  %v7065_v10 = vld [vmem:[#allocation33_spill] sm:$0xff]  ;;  %v7066_v20 = vld [vmem:[#allocation35_spill] sm:$0xff] }
 0x30a   :  { %v5159_v33 = vmul.f32 %v3531_v6, %v1127_v59  ;;  %v1128_v38 = vadd.f32 0.5, %v1126_v27  ;;  %v7068_v59 = vld [vmem:[#allocation40_spill] sm:$0xff]  ;;  %v7069_v6 = vld [vmem:[#allocation39_spill] sm:$0xff]  ;;  %v7070_v27 = vld [vmem:[#allocation41_spill] sm:$0xff] }
 0x30b   :  { %3532 = vtanh.f32 %v5157_v30 }
 0x30c   :  { %7052 = vst [vmem:[#allocation50_spill] sm:$0xff] %v5159_v33  ;;  %1169 = vmatmul.f32.vlgmr.msrb.gmra.mxu0 %v5159_v33  ;;  %1192 = vmatmul.f32.vlgmr.msra.gmra.mxu1 %v5159_v33 }
 0x30d   :  { %1215 = vmatmul.f32.vlgmr.msra.gmra.mxu2 %v5159_v33  ;;  %1238 = vmatmul.f32.vlgmr.msra.gmra.mxu3 %v5159_v33  ;;  %v7074_v33 = vld [vmem:[#allocation48_spill] sm:$0xff] }
 0x30e   :  { %1441 = vmatpush.msrb.mxu0 %v4838_v52  ;;  %1464 = vmatpush.msra.mxu1 %v4841_v63 }
 0x30f   :  { %1487 = vmatpush.msra.mxu2 %v4844_v1  ;;  %1510 = vmatpush.msra.mxu3 %v4847_v2 }
 0x310   :  { %1442 = vmatpush.msrb.mxu0 %v4850_v9  ;;  %1465 = vmatpush.msra.mxu1 %v4853_v29 }
 0x311   :  { %v3533_v32 = vpop.eup %3532  ;;  %1488 = vmatpush.msra.mxu2 %v4856_v11  ;;  %1511 = vmatpush.msra.mxu3 %v4859_v4 }
 0x312   :  { %v5174_v55 = vmul.f32 %v3533_v32, %v1128_v38  ;;  %1443 = vmatpush.msrb.mxu0 %v4864_v19  ;;  %1466 = vmatpush.msra.mxu1 %v4867_v46  ;;  %v7071_v38 = vld [vmem:[#allocation37_spill] sm:$0xff]  ;;  %v7072_v32 = vld [vmem:[#allocation46_spill] sm:$0xff] }
 0x313   :  { %1489 = vmatpush.msra.mxu2 %v4870_v39  ;;  %1512 = vmatpush.msra.mxu3 %v4873_v57 }
 0x314   :  { %7053 = vst [vmem:[#allocation52_spill] sm:$0xff] %v5174_v55  ;;  %1172 = vmatmul.f32.gmra.mxu0 %v5174_v55  ;;  %1195 = vmatmul.f32.gmra.mxu1 %v5174_v55 }
 0x315   :  { %1218 = vmatmul.f32.gmra.mxu2 %v5174_v55  ;;  %1241 = vmatmul.f32.gmra.mxu3 %v5174_v55  ;;  %v7073_v55 = vld [vmem:[#allocation26_spill] sm:$0xff] }
 0x316   :  { %1444 = vmatpush.msrb.mxu0 %v4880_v7  ;;  %1467 = vmatpush.msra.mxu1 %v4883_v34 }
 0x317   :  { %1490 = vmatpush.msra.mxu2 %v4886_v44  ;;  %1513 = vmatpush.msra.mxu3 %v4889_v51 }
 0x318   :  { %1445 = vmatpush.msrb.mxu0 %v4892_v5  ;;  %1468 = vmatpush.msra.mxu1 %v4895_v25 }
 0x319   :  { %1491 = vmatpush.msra.mxu2 %v4898_v36  ;;  %1514 = vmatpush.msra.mxu3 %v4901_v3 }
 0x31a   :  { %1446 = vmatpush.msrb.mxu0 %v4904_v60  ;;  %1469 = vmatpush.msra.mxu1 %v4907_v41 }
 0x31b   :  { %1492 = vmatpush.msra.mxu2 %v4910_v17  ;;  %1515 = vmatpush.msra.mxu3 %v4913_v13 }
 0x31c   :  { %1447 = vmatpush.msrb.mxu0 %v4916_v12  ;;  %1470 = vmatpush.msra.mxu1 %v4919_v14 }
 0x31d   :  { %1493 = vmatpush.msra.mxu2 %v4922_v15  ;;  %1516 = vmatpush.msra.mxu3 %v4925_v18 }
 0x31e   :  { %1448 = vmatpush.msrb.mxu0 %v4928_v21  ;;  %1471 = vmatpush.msra.mxu1 %v4931_v22 }
 0x31f   :  { %1494 = vmatpush.msra.mxu2 %v4934_v24  ;;  %1517 = vmatpush.msra.mxu3 %v4937_v31 }
 0x320   :  { %1449 = vmatpush.msrb.mxu0 %v4940_v37  ;;  %1472 = vmatpush.msra.mxu1 %v4943_v45 }
 0x321   :  { %1495 = vmatpush.msra.mxu2 %v4946_v47  ;;  %1518 = vmatpush.msra.mxu3 %v4949_v49 }
 0x322   :  { %1450 = vmatpush.msrb.mxu0 %v4952_v50  ;;  %1473 = vmatpush.msra.mxu1 %v4955_v53 }
 0x323   :  { %1496 = vmatpush.msra.mxu2 %v4958_v54  ;;  %1519 = vmatpush.msra.mxu3 %v7054_v42 }
 0x324   :  { %1451 = vmatpush.msrb.mxu0 %v7055_v28  ;;  %1474 = vmatpush.msra.mxu1 %v7056_v8 }
 0x325   :  { %1497 = vmatpush.msra.mxu2 %v7057_v56  ;;  %1520 = vmatpush.msra.mxu3 %v7058_v0 }
 0x326   :  { %1452 = vmatpush.msrb.mxu0 %v7059_v35  ;;  %1475 = vmatpush.msra.mxu1 %v7060_v40 }
 0x327   :  { %1498 = vmatpush.msra.mxu2 %v7061_v62  ;;  %1521 = vmatpush.msra.mxu3 %v7062_v26  ;;  %v7082_v26 = vld [vmem:[#allocation69_spill] sm:$0xff] }
 0x328   :  { %1453 = vmatpush.msrb.mxu0 %v7063_v43  ;;  %1476 = vmatpush.msra.mxu1 %v7064_v58  ;;  %v7075_v58 = vld [vmem:[#allocation36_spill] sm:$0xff] }
 0x329   :  { %1499 = vmatpush.msra.mxu2 %v7065_v10  ;;  %1522 = vmatpush.msra.mxu3 %v7066_v20  ;;  %v7076_v10 = vld [vmem:[#allocation45_spill] sm:$0xff] }
 0x32a   :  { %1454 = vmatpush.msrb.mxu0 %v7067_v48  ;;  %1477 = vmatpush.msra.mxu1 %v7068_v59  ;;  %v7077_v20 = vld [vmem:[#allocation49_spill] sm:$0xff]  ;;  %v7078_v48 = vld [vmem:[#allocation47_spill] sm:$0xff]  ;;  %v7079_v59 = vld [vmem:[#allocation96_spill] sm:$0xff] }
 0x32b   :  { %1500 = vmatpush.msra.mxu2 %v7069_v6  ;;  %1523 = vmatpush.msra.mxu3 %v7070_v27  ;;  %v7080_v6 = vld [vmem:[#allocation70_spill] sm:$0xff]  ;;  %v7081_v27 = vld [vmem:[#allocation97_spill] sm:$0xff] }
 0x32c   :  { %1455 = vmatpush.msrb.mxu0 %v7071_v38  ;;  %1478 = vmatpush.msra.mxu1 %v7072_v32  ;;  %v285_v43 = vadd.f32 %v7080_v6, %v7079_v59  ;;  %v350_v38 = vadd.f32 %v7082_v26, %v7081_v27  ;;  %v7086_v6 = vld [vmem:[#allocation73_spill] sm:$0xff] }
 0x32d   :  { %1501 = vmatpush.msra.mxu2 %v7073_v55  ;;  %1524 = vmatpush.msra.mxu3 %v7074_v33  ;;  %v353_v0 = vadd.f32 %v7086_v6, %v7081_v27  ;;  %v7088_v27 = vld [vmem:[#allocation75_spill] sm:$0xff] }
 0x32e   :  { %1456 = vmatpush.msrb.mxu0 %v7075_v58  ;;  %1479 = vmatpush.msra.mxu1 %v7076_v10  ;;  %v7083_v58 = vld [vmem:[#allocation71_spill] sm:$0xff]  ;;  %v7084_v10 = vld [vmem:[#allocation72_spill] sm:$0xff] }
 0x32f   :  { %1502 = vmatpush.msra.mxu2 %v7077_v20  ;;  %1525 = vmatpush.msra.mxu3 %v7078_v48  ;;  %v415_v33 = vadd.f32 %v7083_v58, %v4710_v16  ;;  %v480_v20 = vadd.f32 %v7084_v10, %v6983_v61  ;;  %v7085_v48 = vld [vmem:[#allocation76_spill] sm:$0xff] }
 0x330   :  { %v288_v35 = vadd.f32 %v7085_v48, %v7079_v59  ;;  %v7087_v48 = vld [vmem:[#allocation74_spill] sm:$0xff] }
 0x331   :  { %v418_v6 = vadd.f32 %v7087_v48, %v4710_v16 }
 0x389   :  { %v1170_v62 = vpop.f32.mrf.mxu0  ;;  %v1193_v32 = vpop.f32.mrf.mxu1 }
 0x38a   :  { %v1245_v40 = vadd.f32 %v1170_v62, %v285_v43  ;;  %v1246_v55 = vadd.f32 %v1193_v32, %v350_v38 }
 0x38c   :  { %3534 = vtanh.f32 %v1245_v40 }
 0x38d   :  { %3536 = vtanh.f32 %v1246_v55 }
 0x390   :  { %v1216_v56 = vpop.f32.mrf.mxu2  ;;  %v1239_v26 = vpop.f32.mrf.mxu3 }
 0x391   :  { %v1247_v8 = vadd.f32 %v1216_v56, %v415_v33  ;;  %v1248_v28 = vadd.f32 %v1239_v26, %v480_v20  ;;  %v1173_v62 = vpop.f32.mrf.mxu0  ;;  %v1196_v43 = vpop.f32.mrf.mxu1  ;;  %v483_v33 = vadd.f32 %v7088_v27, %v6983_v61 }
 0x392   :  { %v3535_v40 = vpop.eup %3534  ;;  %v1249_v55 = vadd.f32 %v1173_v62, %v288_v35  ;;  %v1250_v38 = vadd.f32 %v1196_v43, %v353_v0 }
 0x393   :  { %v3537_v32 = vpop.eup %3536  ;;  %3538 = vtanh.f32 %v1247_v8  ;;  %v1261_v58 = vmul.f32 0.5, %v3535_v40 }
 0x394   :  { %v1265_v42 = vmul.f32 0.5, %v3537_v32  ;;  %3540 = vtanh.f32 %v1248_v28 }
 0x395   :  { %3542 = vtanh.f32 %v1249_v55  ;;  %v1263_v56 = vadd.f32 0.5, %v1261_v58 }
 0x396   :  { %v1267_v10 = vadd.f32 0.5, %v1265_v42  ;;  %3544 = vtanh.f32 %v1250_v38 }
 0x398   :  { %v1219_v20 = vpop.f32.mrf.mxu2  ;;  %v1242_v26 = vpop.f32.mrf.mxu3  ;;  %v1273_v8 = vmul.f32 %v1267_v10, %v5153_v23 }
 0x399   :  { %v3539_v59 = vpop.eup %3538  ;;  %v1251_v35 = vadd.f32 %v1219_v20, %v418_v6  ;;  %v1252_v0 = vadd.f32 %v1242_v26, %v483_v33 }
 0x39a   :  { %v3541_v62 = vpop.eup %3540  ;;  %v1275_v43 = vmul.f32 %v3539_v59, %v1263_v56 }
 0x39b   :  { %v3543_v28 = vpop.eup %3542  ;;  %3546 = vtanh.f32 %v1251_v35  ;;  %v1269_v27 = vmul.f32 0.5, %v3541_v62  ;;  %v7120_v62 = vld [vmem:[#allocation85_spill] sm:$0xff] }
 0x39c   :  { %v3545_v42 = vpop.eup %3544  ;;  %v5253_v40 = vadd.f32 %v1275_v43, %v1273_v8  ;;  %v1262_v55 = vmul.f32 0.5, %v3543_v28  ;;  %3548 = vtanh.f32 %v1252_v0  ;;  %v7121_v43 = vld [vmem:[#allocation80_spill] sm:$0xff] }
 0x39d   :  { %v1266_v38 = vmul.f32 0.5, %v3545_v42  ;;  %v1271_v23 = vadd.f32 0.5, %v1269_v27 }
 0x39e   :  { %3550 = vtanh.f32 %v5253_v40  ;;  %v1264_v58 = vadd.f32 0.5, %v1262_v55 }
 0x39f   :  { %v1268_v32 = vadd.f32 0.5, %v1266_v38 }
 0x3a1   :  { %v3547_v48 = vpop.eup %3546  ;;  %v1274_v6 = vmul.f32 %v1268_v32, %v5157_v30 }
 0x3a2   :  { %v1276_v33 = vmul.f32 %v3547_v48, %v1264_v58  ;;  %v3549_v20 = vpop.eup %3548 }
 0x3a3   :  { %v1270_v26 = vmul.f32 0.5, %v3549_v20 }
 0x3a4   :  { %v3551_v59 = vpop.eup %3550  ;;  %v5257_v10 = vadd.f32 %v1276_v33, %v1274_v6 }
 0x3a5   :  { %v5259_v56 = vmul.f32 %v3551_v59, %v1271_v23  ;;  %v1272_v30 = vadd.f32 0.5, %v1270_v26 }
 0x3a6   :  { %3552 = vtanh.f32 %v5257_v10 }
 0x3a7   :  { %1313 = vmatmul.f32.vlgmr.msra.gmra.mxu0 %v5259_v56  ;;  %1336 = vmatmul.f32.vlgmr.msrb.gmra.mxu1 %v5259_v56 }
 0x3a8   :  { %1359 = vmatmul.f32.vlgmr.msrb.gmra.mxu2 %v5259_v56  ;;  %1382 = vmatmul.f32.vlgmr.msrb.gmra.mxu3 %v5259_v56 }
 0x3a9   :  { %1585 = vmatpush.msra.mxu0 %v4838_v52  ;;  %1608 = vmatpush.msrb.mxu1 %v4841_v63  ;;  %v7089_v52 = vld [vmem:[#allocation21_spill] sm:$0xff]  ;;  %v7090_v63 = vld [vmem:[#allocation19_spill] sm:$0xff] }
 0x3aa   :  { %1631 = vmatpush.msrb.mxu2 %v4844_v1  ;;  %1654 = vmatpush.msrb.mxu3 %v4847_v2  ;;  %v7091_v1 = vld [vmem:[#allocation22_spill] sm:$0xff]  ;;  %v7092_v2 = vld [vmem:[#allocation23_spill] sm:$0xff] }
 0x3ab   :  { %1586 = vmatpush.msra.mxu0 %v4850_v9  ;;  %1609 = vmatpush.msrb.mxu1 %v4853_v29  ;;  %v7093_v9 = vld [vmem:[#allocation24_spill] sm:$0xff]  ;;  %v7094_v29 = vld [vmem:[#allocation25_spill] sm:$0xff] }
 0x3ac   :  { %v3553_v35 = vpop.eup %3552  ;;  %1632 = vmatpush.msrb.mxu2 %v4856_v11  ;;  %1655 = vmatpush.msrb.mxu3 %v4859_v4  ;;  %v7095_v11 = vld [vmem:[#allocation27_spill] sm:$0xff] }
 0x3ad   :  { %v5274_v0 = vmul.f32 %v3553_v35, %v1272_v30  ;;  %1587 = vmatpush.msra.mxu0 %v4864_v19  ;;  %1610 = vmatpush.msrb.mxu1 %v4867_v46  ;;  %v7096_v4 = vld [vmem:[#allocation31_spill] sm:$0xff]  ;;  %v7097_v19 = vld [vmem:[#allocation32_spill] sm:$0xff]  ;;  %v7122_v30 = vld [vmem:[#allocation82_spill] sm:$0xff] }
 0x3ae   :  { %1633 = vmatpush.msrb.mxu2 %v4870_v39  ;;  %1656 = vmatpush.msrb.mxu3 %v4873_v57  ;;  %v7098_v46 = vld [vmem:[#allocation28_spill] sm:$0xff]  ;;  %v7099_v39 = vld [vmem:[#allocation34_spill] sm:$0xff]  ;;  %v7100_v57 = vld [vmem:[#allocation33_spill] sm:$0xff]  ;;  %v424_v35 = vadd.f32 %v7122_v30, %v4710_v16 }
 0x3af   :  { %1316 = vmatmul.f32.gmra.mxu0 %v5274_v0  ;;  %1339 = vmatmul.f32.gmra.mxu1 %v5274_v0  ;;  %v1755_v30 = vld [vmem:[#allocation9 + $0x128] sm:$0xff] }
 0x3b0   :  { %1362 = vmatmul.f32.gmra.mxu2 %v5274_v0  ;;  %1385 = vmatmul.f32.gmra.mxu3 %v5274_v0 }
 0x3b1   :  { %1588 = vmatpush.msra.mxu0 %v4880_v7  ;;  %1611 = vmatpush.msrb.mxu1 %v4883_v34  ;;  %v7101_v7 = vld [vmem:[#allocation35_spill] sm:$0xff]  ;;  %v7102_v34 = vld [vmem:[#allocation29_spill] sm:$0xff] }
 0x3b2   :  { %1634 = vmatpush.msrb.mxu2 %v4886_v44  ;;  %1657 = vmatpush.msrb.mxu3 %v4889_v51  ;;  %v7103_v44 = vld [vmem:[#allocation40_spill] sm:$0xff]  ;;  %v7104_v51 = vld [vmem:[#allocation39_spill] sm:$0xff] }
 0x3b3   :  { %1589 = vmatpush.msra.mxu0 %v4892_v5  ;;  %1612 = vmatpush.msrb.mxu1 %v4895_v25  ;;  %v7105_v5 = vld [vmem:[#allocation41_spill] sm:$0xff] }
 0x3b4   :  { %1635 = vmatpush.msrb.mxu2 %v4898_v36  ;;  %1658 = vmatpush.msrb.mxu3 %v4901_v3  ;;  %v7106_v25 = vld [vmem:[#allocation37_spill] sm:$0xff]  ;;  %v7107_v36 = vld [vmem:[#allocation46_spill] sm:$0xff] }
 0x3b5   :  { %1590 = vmatpush.msra.mxu0 %v4904_v60  ;;  %1613 = vmatpush.msrb.mxu1 %v4907_v41  ;;  %v7108_v3 = vld [vmem:[#allocation26_spill] sm:$0xff]  ;;  %v7109_v60 = vld [vmem:[#allocation48_spill] sm:$0xff] }
 0x3b6   :  { %1636 = vmatpush.msrb.mxu2 %v4910_v17  ;;  %1659 = vmatpush.msrb.mxu3 %v4913_v13  ;;  %v7110_v41 = vld [vmem:[#allocation36_spill] sm:$0xff]  ;;  %v7111_v17 = vld [vmem:[#allocation45_spill] sm:$0xff] }
 0x3b7   :  { %1591 = vmatpush.msra.mxu0 %v4916_v12  ;;  %1614 = vmatpush.msrb.mxu1 %v4919_v14  ;;  %v7112_v13 = vld [vmem:[#allocation49_spill] sm:$0xff]  ;;  %v7113_v12 = vld [vmem:[#allocation47_spill] sm:$0xff]  ;;  %v7114_v14 = vld [vmem:[#allocation96_spill] sm:$0xff] }
 0x3b8   :  { %1637 = vmatpush.msrb.mxu2 %v4922_v15  ;;  %1660 = vmatpush.msrb.mxu3 %v4925_v18  ;;  %v7115_v15 = vld [vmem:[#allocation81_spill] sm:$0xff]  ;;  %v294_v8 = vadd.f32 %v7120_v62, %v7114_v14  ;;  %v1770_v62 = vld [vmem:[#allocation9 + $0x1a0] sm:$0xff] }
 0x3b9   :  { %1592 = vmatpush.msra.mxu0 %v4928_v21  ;;  %1615 = vmatpush.msrb.mxu1 %v4931_v22  ;;  %v291_v18 = vadd.f32 %v7115_v15, %v7114_v14  ;;  %v7116_v21 = vld [vmem:[#allocation97_spill] sm:$0xff] }
 0x3ba   :  { %1638 = vmatpush.msrb.mxu2 %v4934_v24  ;;  %1661 = vmatpush.msrb.mxu3 %v4937_v31  ;;  %v7117_v22 = vld [vmem:[#allocation77_spill] sm:$0xff]  ;;  %v359_v28 = vadd.f32 %v7121_v43, %v7116_v21 }
 0x3bb   :  { %1593 = vmatpush.msra.mxu0 %v4940_v37  ;;  %1616 = vmatpush.msrb.mxu1 %v4943_v45  ;;  %v356_v24 = vadd.f32 %v7117_v22, %v7116_v21  ;;  %v1772_v43 = vld [vmem:[#allocation9 + $0x1b0] sm:$0xff] }
 0x3bc   :  { %1639 = vmatpush.msrb.mxu2 %v4946_v47  ;;  %1662 = vmatpush.msrb.mxu3 %v4949_v49  ;;  %v7118_v49 = vld [vmem:[#allocation78_spill] sm:$0xff] }
 0x3bd   :  { %1594 = vmatpush.msra.mxu0 %v4952_v50  ;;  %1617 = vmatpush.msrb.mxu1 %v4955_v53  ;;  %v421_v50 = vadd.f32 %v7118_v49, %v4710_v16  ;;  %v7119_v53 = vld [vmem:[#allocation79_spill] sm:$0xff] }
 0x3be   :  { %1640 = vmatpush.msrb.mxu2 %v4958_v54  ;;  %1663 = vmatpush.msrb.mxu3 %v7089_v52  ;;  %v486_v54 = vadd.f32 %v7119_v53, %v6983_v61  ;;  %v7123_v52 = vld [vmem:[#allocation83_spill] sm:$0xff]  ;;  %v1776_v53 = vld [vmem:[#allocation9 + $0x1d0] sm:$0xff] }
 0x3bf   :  { %1595 = vmatpush.msra.mxu0 %v7090_v63  ;;  %1618 = vmatpush.msrb.mxu1 %v7091_v1  ;;  %v489_v63 = vadd.f32 %v7123_v52, %v6983_v61  ;;  %v1774_v49 = vld [vmem:[#allocation9 + $0x1c0] sm:$0xff]  ;;  %v1757_v52 = vld [vmem:[#allocation9 + $0x138] sm:$0xff] }
 0x3c0   :  { %1641 = vmatpush.msrb.mxu2 %v7092_v2  ;;  %1664 = vmatpush.msrb.mxu3 %v7093_v9 }
 0x3c1   :  { %1596 = vmatpush.msra.mxu0 %v7094_v29  ;;  %1619 = vmatpush.msrb.mxu1 %v7095_v11 }
 0x3c2   :  { %1642 = vmatpush.msrb.mxu2 %v7096_v4  ;;  %1665 = vmatpush.msrb.mxu3 %v7097_v19 }
 0x3c3   :  { %1597 = vmatpush.msra.mxu0 %v7098_v46  ;;  %1620 = vmatpush.msrb.mxu1 %v7099_v39 }
 0x3c4   :  { %1643 = vmatpush.msrb.mxu2 %v7100_v57  ;;  %1666 = vmatpush.msrb.mxu3 %v7101_v7 }
 0x3c5   :  { %1598 = vmatpush.msra.mxu0 %v7102_v34  ;;  %1621 = vmatpush.msrb.mxu1 %v7103_v44 }
 0x3c6   :  { %1644 = vmatpush.msrb.mxu2 %v7104_v51  ;;  %1667 = vmatpush.msrb.mxu3 %v7105_v5 }
 0x3c7   :  { %1599 = vmatpush.msra.mxu0 %v7106_v25  ;;  %1622 = vmatpush.msrb.mxu1 %v7107_v36 }
 0x3c8   :  { %1645 = vmatpush.msrb.mxu2 %v7108_v3  ;;  %1668 = vmatpush.msrb.mxu3 %v7109_v60 }
 0x3c9   :  { %1600 = vmatpush.msra.mxu0 %v7110_v41  ;;  %1623 = vmatpush.msrb.mxu1 %v7111_v17 }
 0x3ca   :  { %1646 = vmatpush.msrb.mxu2 %v7112_v13  ;;  %1669 = vmatpush.msrb.mxu3 %v7113_v12 }
 0x424   :  { %v1314_v31 = vpop.f32.mrf.mxu0  ;;  %v1337_v37 = vpop.f32.mrf.mxu1 }
 0x425   :  { %v1389_v45 = vadd.f32 %v1314_v31, %v291_v18  ;;  %v1390_v47 = vadd.f32 %v1337_v37, %v356_v24  ;;  %v1778_v31 = vld [vmem:[#allocation9 + $0x1e0] sm:$0xff]  ;;  %v1779_v37 = vld [vmem:[#allocation9 + $0x1e8] sm:$0xff] }
 0x427   :  { %3554 = vtanh.f32 %v1389_v45  ;;  %v1780_v45 = vld [vmem:[#allocation9 + $0x1f0] sm:$0xff] }
 0x428   :  { %3556 = vtanh.f32 %v1390_v47  ;;  %v1781_v47 = vld [vmem:[#allocation9 + $0x1f8] sm:$0xff] }
 0x42b   :  { %v1360_v42 = vpop.f32.mrf.mxu2  ;;  %v1383_v55 = vpop.f32.mrf.mxu3 }
 0x42c   :  { %v1391_v38 = vadd.f32 %v1360_v42, %v421_v50  ;;  %v1392_v27 = vadd.f32 %v1383_v55, %v486_v54  ;;  %v1317_v32 = vpop.f32.mrf.mxu0  ;;  %v1340_v58 = vpop.f32.mrf.mxu1  ;;  %v1775_v50 = vld [vmem:[#allocation9 + $0x1c8] sm:$0xff]  ;;  %v1777_v54 = vld [vmem:[#allocation9 + $0x1d8] sm:$0xff]  ;;  %v1766_v42 = vld [vmem:[#allocation9 + $0x180] sm:$0xff] }
 0x42d   :  { %v3555_v48 = vpop.eup %3554  ;;  %v1393_v6 = vadd.f32 %v1317_v32, %v294_v8  ;;  %v1394_v33 = vadd.f32 %v1340_v58, %v359_v28  ;;  %v1771_v8 = vld [vmem:[#allocation9 + $0x1a8] sm:$0xff]  ;;  %v1773_v28 = vld [vmem:[#allocation9 + $0x1b8] sm:$0xff]  ;;  %v1762_v32 = vld [vmem:[#allocation9 + $0x160] sm:$0xff] }
 0x42e   :  { %v3557_v20 = vpop.eup %3556  ;;  %3558 = vtanh.f32 %v1391_v38  ;;  %v1405_v23 = vmul.f32 0.5, %v3555_v48  ;;  %v1767_v55 = vld [vmem:[#allocation9 + $0x188] sm:$0xff]  ;;  %v1768_v38 = vld [vmem:[#allocation9 + $0x190] sm:$0xff] }
 0x42f   :  { %v1409_v59 = vmul.f32 0.5, %v3557_v20  ;;  %3560 = vtanh.f32 %v1392_v27  ;;  %v1769_v27 = vld [vmem:[#allocation9 + $0x198] sm:$0xff]  ;;  %v1763_v58 = vld [vmem:[#allocation9 + $0x168] sm:$0xff]  ;;  %v1764_v48 = vld [vmem:[#allocation9 + $0x170] sm:$0xff] }
 0x430   :  { %3562 = vtanh.f32 %v1393_v6  ;;  %v1407_v1 = vadd.f32 0.5, %v1405_v23  ;;  %v1765_v6 = vld [vmem:[#allocation9 + $0x178] sm:$0xff]  ;;  %v1759_v20 = vld [vmem:[#allocation9 + $0x148] sm:$0xff]  ;;  %v1760_v23 = vld [vmem:[#allocation9 + $0x150] sm:$0xff] }
 0x431   :  { %v1411_v26 = vadd.f32 0.5, %v1409_v59  ;;  %3564 = vtanh.f32 %v1394_v33  ;;  %v1758_v33 = vld [vmem:[#allocation9 + $0x140] sm:$0xff]  ;;  %v1761_v59 = vld [vmem:[#allocation9 + $0x158] sm:$0xff] }
 0x433   :  { %v1363_v2 = vpop.f32.mrf.mxu2  ;;  %v1386_v9 = vpop.f32.mrf.mxu3  ;;  %v1417_v46 = vmul.f32 %v1411_v26, %v5253_v40  ;;  %v1754_v26 = vld [vmem:[#allocation9 + $0x120] sm:$0xff] }
 0x434   :  { %v3559_v29 = vpop.eup %3558  ;;  %v1395_v11 = vadd.f32 %v1363_v2, %v424_v35  ;;  %v1396_v4 = vadd.f32 %v1386_v9, %v489_v63  ;;  %v1756_v35 = vld [vmem:[#allocation9 + $0x130] sm:$0xff]  ;;  %v1750_v63 = vld [vmem:[#allocation9 + $0x100] sm:$0xff]  ;;  %v1753_v9 = vld [vmem:[#allocation9 + $0x118] sm:$0xff] }
 0x435   :  { %v3561_v19 = vpop.eup %3560  ;;  %v1419_v39 = vmul.f32 %v3559_v29, %v1407_v1  ;;  %v1751_v1 = vld [vmem:[#allocation9 + $0x108] sm:$0xff]  ;;  %v1752_v2 = vld [vmem:[#allocation9 + $0x110] sm:$0xff] }
 0x436   :  { %v3563_v57 = vpop.eup %3562  ;;  %3566 = vtanh.f32 %v1395_v11  ;;  %v1413_v5 = vmul.f32 0.5, %v3561_v19  ;;  %v7124_v29 = vld [vmem:[#allocation89_spill] sm:$0xff] }
 0x437   :  { %v3565_v7 = vpop.eup %3564  ;;  %v5353_v34 = vadd.f32 %v1419_v39, %v1417_v46  ;;  %v1406_v44 = vmul.f32 0.5, %v3563_v57  ;;  %3568 = vtanh.f32 %v1396_v4  ;;  %v297_v11 = vadd.f32 %v7124_v29, %v7114_v14  ;;  %v7125_v4 = vld [vmem:[#allocation84_spill] sm:$0xff]  ;;  %v1746_v46 = vld [vmem:[#allocation9 + $0xe0] sm:$0xff]  ;;  %v1748_v57 = vld [vmem:[#allocation9 + $0xf0] sm:$0xff] }
 0x438   :  { %v1410_v51 = vmul.f32 0.5, %v3565_v7  ;;  %v1415_v40 = vadd.f32 0.5, %v1413_v5  ;;  %v362_v19 = vadd.f32 %v7125_v4, %v7116_v21  ;;  %v1747_v39 = vld [vmem:[#allocation9 + $0xe8] sm:$0xff]  ;;  %v1718_v4 = vld [vmem:[#allocation9] sm:$0xff] }
 0x439   :  { %3570 = vtanh.f32 %v5353_v34  ;;  %v1408_v36 = vadd.f32 0.5, %v1406_v44 }
 0x43a   :  { %v1412_v25 = vadd.f32 0.5, %v1410_v51  ;;  %v1749_v51 = vld [vmem:[#allocation9 + $0xf8] sm:$0xff] }
 0x43c   :  { %v3567_v3 = vpop.eup %3566  ;;  %v1418_v60 = vmul.f32 %v1412_v25, %v5257_v10 }
 0x43d   :  { %v1420_v41 = vmul.f32 %v3567_v3, %v1408_v36  ;;  %v3569_v17 = vpop.eup %3568  ;;  %v1742_v36 = vld [vmem:[#allocation9 + $0xc0] sm:$0xff]  ;;  %v1743_v3 = vld [vmem:[#allocation9 + $0xc8] sm:$0xff] }
 0x43e   :  { %v1414_v18 = vmul.f32 0.5, %v3569_v17  ;;  %v1738_v17 = vld [vmem:[#allocation9 + $0xa0] sm:$0xff] }
 0x43f   :  { %v3571_v13 = vpop.eup %3570  ;;  %v5357_v12 = vadd.f32 %v1420_v41, %v1418_v60  ;;  %v1744_v60 = vld [vmem:[#allocation9 + $0xd0] sm:$0xff]  ;;  %v1745_v41 = vld [vmem:[#allocation9 + $0xd8] sm:$0xff] }
 0x440   :  { %v5359_v15 = vmul.f32 %v3571_v13, %v1415_v40  ;;  %v1416_v10 = vadd.f32 0.5, %v1414_v18  ;;  %v1739_v40 = vld [vmem:[#allocation9 + $0xa8] sm:$0xff]  ;;  %v1740_v13 = vld [vmem:[#allocation9 + $0xb0] sm:$0xff]  ;;  %v1741_v18 = vld [vmem:[#allocation9 + $0xb8] sm:$0xff] }
 0x441   :  { %3572 = vtanh.f32 %v5357_v12 }
 0x442   :  { %1457 = vmatmul.f32.vlgmr.msrb.gmra.mxu0 %v5359_v15  ;;  %1480 = vmatmul.f32.vlgmr.msra.gmra.mxu1 %v5359_v15 }
 0x443   :  { %1503 = vmatmul.f32.vlgmr.msra.gmra.mxu2 %v5359_v15  ;;  %1526 = vmatmul.f32.vlgmr.msra.gmra.mxu3 %v5359_v15 }
 0x444   :  { %1872 = vmatpush.msrb.mxu0 %v1778_v31  ;;  %1937 = vmatpush.msra.mxu1 %v1779_v37  ;;  %v1736_v31 = vld [vmem:[#allocation9 + $0x90] sm:$0xff]  ;;  %v1737_v37 = vld [vmem:[#allocation9 + $0x98] sm:$0xff] }
 0x445   :  { %2002 = vmatpush.msra.mxu2 %v1780_v45  ;;  %2067 = vmatpush.msra.mxu3 %v1781_v47  ;;  %v7126_v45 = vld [vmem:[#allocation86_spill] sm:$0xff] }
 0x446   :  { %1873 = vmatpush.msrb.mxu0 %v1774_v49  ;;  %1938 = vmatpush.msra.mxu1 %v1775_v50  ;;  %v427_v47 = vadd.f32 %v7126_v45, %v4710_v16  ;;  %v7127_v49 = vld [vmem:[#allocation87_spill] sm:$0xff] }
 0x447   :  { %v3573_v22 = vpop.eup %3572  ;;  %2003 = vmatpush.msra.mxu2 %v1776_v53  ;;  %2068 = vmatpush.msra.mxu3 %v1777_v54  ;;  %v492_v50 = vadd.f32 %v7127_v49, %v6983_v61  ;;  %v7128_v53 = vld [vmem:[#allocation42_spill] sm:$0xff] }
 0x448   :  { %v5366_v24 = vmul.f32 %v3573_v22, %v1416_v10  ;;  %1874 = vmatpush.msrb.mxu0 %v1770_v62  ;;  %1939 = vmatpush.msra.mxu1 %v1771_v8  ;;  %v1734_v10 = vld [vmem:[#allocation9 + $0x80] sm:$0xff]  ;;  %v1735_v22 = vld [vmem:[#allocation9 + $0x88] sm:$0xff]  ;;  %v300_v54 = vadd.f32 %v7128_v53, %v7114_v14 }
 0x449   :  { %2004 = vmatpush.msra.mxu2 %v1772_v43  ;;  %2069 = vmatpush.msra.mxu3 %v1773_v28  ;;  %v7129_v62 = vld [vmem:[#allocation88_spill] sm:$0xff] }
 0x44a   :  { %1460 = vmatmul.f32.gmra.mxu0 %v5366_v24  ;;  %1483 = vmatmul.f32.gmra.mxu1 %v5366_v24  ;;  %v365_v8 = vadd.f32 %v7129_v62, %v7116_v21 }
 0x44b   :  { %1506 = vmatmul.f32.gmra.mxu2 %v5366_v24  ;;  %1529 = vmatmul.f32.gmra.mxu3 %v5366_v24 }
 0x44c   :  { %1875 = vmatpush.msrb.mxu0 %v1766_v42  ;;  %1940 = vmatpush.msra.mxu1 %v1767_v55  ;;  %v1730_v42 = vld [vmem:[#allocation9 + $0x60] sm:$0xff]  ;;  %v1731_v55 = vld [vmem:[#allocation9 + $0x68] sm:$0xff] }
 0x44d   :  { %2005 = vmatpush.msra.mxu2 %v1768_v38  ;;  %2070 = vmatpush.msra.mxu3 %v1769_v27  ;;  %v1732_v38 = vld [vmem:[#allocation9 + $0x70] sm:$0xff] }
 0x44e   :  { %1876 = vmatpush.msrb.mxu0 %v1762_v32  ;;  %1941 = vmatpush.msra.mxu1 %v1763_v58 }
 0x44f   :  { %2006 = vmatpush.msra.mxu2 %v1764_v48  ;;  %2071 = vmatpush.msra.mxu3 %v1765_v6  ;;  %v1733_v6 = vld [vmem:[#allocation9 + $0x78] sm:$0xff] }
 0x450   :  { %1877 = vmatpush.msrb.mxu0 %v1758_v33  ;;  %1942 = vmatpush.msra.mxu1 %v1759_v20  ;;  %v1726_v33 = vld [vmem:[#allocation9 + $0x40] sm:$0xff]  ;;  %v1727_v20 = vld [vmem:[#allocation9 + $0x48] sm:$0xff] }
 0x451   :  { %2007 = vmatpush.msra.mxu2 %v1760_v23  ;;  %2072 = vmatpush.msra.mxu3 %v1761_v59 }
 0x452   :  { %1878 = vmatpush.msrb.mxu0 %v1754_v26  ;;  %1943 = vmatpush.msra.mxu1 %v1755_v30  ;;  %v1728_v30 = vld [vmem:[#allocation9 + $0x50] sm:$0xff] }
 0x453   :  { %2008 = vmatpush.msra.mxu2 %v1756_v35  ;;  %2073 = vmatpush.msra.mxu3 %v1757_v52  ;;  %v1729_v35 = vld [vmem:[#allocation9 + $0x58] sm:$0xff]  ;;  %v1722_v52 = vld [vmem:[#allocation9 + $0x20] sm:$0xff] }
 0x454   :  { %1879 = vmatpush.msrb.mxu0 %v1750_v63  ;;  %1944 = vmatpush.msra.mxu1 %v1751_v1  ;;  %v1723_v1 = vld [vmem:[#allocation9 + $0x28] sm:$0xff] }
 0x455   :  { %2009 = vmatpush.msra.mxu2 %v1752_v2  ;;  %2074 = vmatpush.msra.mxu3 %v1753_v9  ;;  %v1724_v2 = vld [vmem:[#allocation9 + $0x30] sm:$0xff]  ;;  %v1725_v9 = vld [vmem:[#allocation9 + $0x38] sm:$0xff] }
 0x456   :  { %1880 = vmatpush.msrb.mxu0 %v1746_v46  ;;  %1945 = vmatpush.msra.mxu1 %v1747_v39  ;;  %v1720_v46 = vld [vmem:[#allocation9 + $0x10] sm:$0xff]  ;;  %v1721_v39 = vld [vmem:[#allocation9 + $0x18] sm:$0xff] }
 0x457   :  { %2010 = vmatpush.msra.mxu2 %v1748_v57  ;;  %2075 = vmatpush.msra.mxu3 %v1749_v51  ;;  %v7131_v51 = vld [vmem:[#allocation91_spill] sm:$0xff] }
 0x458   :  { %1881 = vmatpush.msrb.mxu0 %v1742_v36  ;;  %1946 = vmatpush.msra.mxu1 %v1743_v3 }
 0x459   :  { %2011 = vmatpush.msra.mxu2 %v1744_v60  ;;  %2076 = vmatpush.msra.mxu3 %v1745_v41 }
 0x45a   :  { %1882 = vmatpush.msrb.mxu0 %v1738_v17  ;;  %1947 = vmatpush.msra.mxu1 %v1739_v40 }
 0x45b   :  { %2012 = vmatpush.msra.mxu2 %v1740_v13  ;;  %2077 = vmatpush.msra.mxu3 %v1741_v18 }
 0x45c   :  { %1883 = vmatpush.msrb.mxu0 %v1734_v10  ;;  %1948 = vmatpush.msra.mxu1 %v1735_v22 }
 0x45d   :  { %2013 = vmatpush.msra.mxu2 %v1736_v31  ;;  %2078 = vmatpush.msra.mxu3 %v1737_v37 }
 0x45e   :  { %1884 = vmatpush.msrb.mxu0 %v1730_v42  ;;  %1949 = vmatpush.msra.mxu1 %v1731_v55 }
 0x45f   :  { %2014 = vmatpush.msra.mxu2 %v1732_v38  ;;  %2079 = vmatpush.msra.mxu3 %v1733_v6  ;;  %v7132_v6 = vld [vmem:[#allocation100_spill] sm:$0xff] }
 0x460   :  { %1885 = vmatpush.msrb.mxu0 %v1726_v33  ;;  %1950 = vmatpush.msra.mxu1 %v1727_v20  ;;  %v5421_v33 = vld [vmem:[#allocation10 + $0x1f8] sm:$0xff]  ;;  %v5423_v20 = vld [vmem:[#allocation10 + $0x1d0] sm:$0xff] }
 0x461   :  { %2015 = vmatpush.msra.mxu2 %v1728_v30  ;;  %2080 = vmatpush.msra.mxu3 %v1729_v35  ;;  %v5437_v30 = vld [vmem:[#allocation10 + $0x1d8] sm:$0xff]  ;;  %v5439_v35 = vld [vmem:[#allocation10 + $0x1b0] sm:$0xff] }
 0x462   :  { %1886 = vmatpush.msrb.mxu0 %v1722_v52  ;;  %1951 = vmatpush.msra.mxu1 %v1723_v1  ;;  %v5441_v52 = vld [vmem:[#allocation10 + $0x1a0] sm:$0xff]  ;;  %v7134_v1 = vld [vmem:[#allocation20_spill] sm:$0xff] }
 0x463   :  { %2016 = vmatpush.msra.mxu2 %v1724_v2  ;;  %2081 = vmatpush.msra.mxu3 %v1725_v9  ;;  %v5453_v2 = vld [vmem:[#allocation10 + $0x1b8] sm:$0xff]  ;;  %v5455_v9 = vld [vmem:[#allocation10 + $0x190] sm:$0xff] }
 0x464   :  { %1887 = vmatpush.msrb.mxu0 %v1718_v4  ;;  %v7135_v4 = vld [vmem:[#allocation18_spill] sm:$0xff] }
 0x465   :  { %2017 = vmatpush.msra.mxu2 %v1720_v46  ;;  %2082 = vmatpush.msra.mxu3 %v1721_v39  ;;  %v5471_v46 = vld [vmem:[#allocation10 + $0x170] sm:$0xff]  ;;  %v5473_v39 = vld [vmem:[#allocation10 + $0x160] sm:$0xff] }
 0x4bf   :  { %v1458_v7 = vpop.f32.mrf.mxu0  ;;  %v1481_v44 = vpop.f32.mrf.mxu1 }
 0x4c0   :  { %v1533_v5 = vadd.f32 %v1458_v7, %v297_v11  ;;  %v1534_v25 = vadd.f32 %v1481_v44, %v362_v19  ;;  %v1719_v19 = vld [vmem:[#allocation9 + $0x8] sm:$0xff]  ;;  %v7130_v7 = vld [vmem:[#allocation90_spill] sm:$0xff] }
 0x4c1   :  { %v430_v44 = vadd.f32 %v7130_v7, %v4710_v16  ;;  %1952 = vmatpush.msra.mxu1 %v1719_v19  ;;  %v5469_v19 = vld [vmem:[#allocation10 + $0x198] sm:$0xff] }
 0x4c2   :  { %3574 = vtanh.f32 %v1533_v5  ;;  %v495_v5 = vadd.f32 %v7131_v51, %v6983_v61  ;;  %v7136_v7 = vld [vmem:[#allocation38_spill] sm:$0xff]  ;;  %v5487_v51 = vld [vmem:[#allocation10 + $0x150] sm:$0xff] }
 0x4c3   :  { %3576 = vtanh.f32 %v1534_v25 }
 0x4c6   :  { %v1504_v43 = vpop.f32.mrf.mxu2  ;;  %v1527_v28 = vpop.f32.mrf.mxu3 }
 0x4c7   :  { %v1535_v27 = vadd.f32 %v1504_v43, %v427_v47  ;;  %v1536_v32 = vadd.f32 %v1527_v28, %v492_v50  ;;  %v1461_v58 = vpop.f32.mrf.mxu0  ;;  %v1484_v48 = vpop.f32.mrf.mxu1 }
 0x4c8   :  { %v3575_v23 = vpop.eup %3574  ;;  %v1537_v59 = vadd.f32 %v1461_v58, %v300_v54  ;;  %v1538_v26 = vadd.f32 %v1484_v48, %v365_v8  ;;  %v5410_v58 = vld [vmem:[#allocation10 + $0x1e0] sm:$0xff]  ;;  %v5412_v48 = vld [vmem:[#allocation10 + $0x1e8] sm:$0xff] }
 0x4c9   :  { %v3577_v63 = vpop.eup %3576  ;;  %3578 = vtanh.f32 %v1535_v27  ;;  %v1549_v29 = vmul.f32 0.5, %v3575_v23  ;;  %v5425_v23 = vld [vmem:[#allocation10 + $0x1c0] sm:$0xff] }
 0x4ca   :  { %v1553_v11 = vmul.f32 0.5, %v3577_v63  ;;  %3580 = vtanh.f32 %v1536_v32  ;;  %v5408_v32 = vld [vmem:[#allocation10 + $0x1f0] sm:$0xff]  ;;  %v5445_v63 = vld [vmem:[#allocation10 + $0x1a8] sm:$0xff] }
 0x4cb   :  { %3582 = vtanh.f32 %v1537_v59  ;;  %v1551_v25 = vadd.f32 0.5, %v1549_v29  ;;  %v5429_v59 = vld [vmem:[#allocation10 + $0x1c8] sm:$0xff]  ;;  %v5457_v29 = vld [vmem:[#allocation10 + $0x180] sm:$0xff] }
 0x4cc   :  { %v1555_v57 = vadd.f32 0.5, %v1553_v11  ;;  %3584 = vtanh.f32 %v1538_v26  ;;  %v7133_v26 = vld [vmem:[#allocation17_spill] sm:$0xff]  ;;  %v5461_v11 = vld [vmem:[#allocation10 + $0x188] sm:$0xff] }
 0x4ce   :  { %v1507_v36 = vpop.f32.mrf.mxu2  ;;  %v1530_v3 = vpop.f32.mrf.mxu3  ;;  %v1561_v13 = vmul.f32 %v1555_v57, %v5353_v34  ;;  %v5477_v57 = vld [vmem:[#allocation10 + $0x168] sm:$0xff] }
 0x4cf   :  { %v3579_v60 = vpop.eup %3578  ;;  %v1539_v41 = vadd.f32 %v1507_v36, %v430_v44  ;;  %v1540_v17 = vadd.f32 %v1530_v3, %v495_v5  ;;  %v5485_v44 = vld [vmem:[#allocation10 + $0x178] sm:$0xff]  ;;  %v5489_v5 = vld [vmem:[#allocation10 + $0x140] sm:$0xff] }
 0x4d0   :  { %v3581_v40 = vpop.eup %3580  ;;  %v1563_v18 = vmul.f32 %v3579_v60, %v1551_v25  ;;  %v5493_v25 = vld [vmem:[#allocation10 + $0x148] sm:$0xff]  ;;  %v7137_v36 = vld [vmem:[#allocation30_spill] sm:$0xff]  ;;  %v5503_v60 = vld [vmem:[#allocation10 + $0x130] sm:$0xff] }
 0x4d1   :  { %v3583_v10 = vpop.eup %3582  ;;  %3586 = vtanh.f32 %v1539_v41  ;;  %v1557_v47 = vmul.f32 0.5, %v3581_v40  ;;  %v5501_v3 = vld [vmem:[#allocation10 + $0x158] sm:$0xff]  ;;  %v5505_v41 = vld [vmem:[#allocation10 + $0x120] sm:$0xff] }
 0x4d2   :  { %v3585_v22 = vpop.eup %3584  ;;  %v5389_v31 = vadd.f32 %v1563_v18, %v1561_v13  ;;  %v1550_v37 = vmul.f32 0.5, %v3583_v10  ;;  %3588 = vtanh.f32 %v1540_v17  ;;  %v5509_v17 = vld [vmem:[#allocation10 + $0x128] sm:$0xff]  ;;  %v7138_v40 = vld [vmem:[#allocation50_spill] sm:$0xff]  ;;  %v5519_v18 = vld [vmem:[#allocation10 + $0x110] sm:$0xff] }
 0x4d3   :  { %v1554_v45 = vmul.f32 0.5, %v3585_v22  ;;  %v1559_v34 = vadd.f32 0.5, %v1557_v47  ;;  %v5517_v13 = vld [vmem:[#allocation10 + $0x138] sm:$0xff]  ;;  %v5521_v10 = vld [vmem:[#allocation10 + $0x100] sm:$0xff]  ;;  %v5525_v22 = vld [vmem:[#allocation10 + $0x108] sm:$0xff] }
 0x4d4   :  { %3590 = vtanh.f32 %v5389_v31  ;;  %v1552_v50 = vadd.f32 0.5, %v1550_v37  ;;  %v7139_v37 = vld [vmem:[#allocation52_spill] sm:$0xff]  ;;  %v5535_v47 = vld [vmem:[#allocation10 + $0xf0] sm:$0xff] }
 0x4d5   :  { %v1556_v49 = vadd.f32 0.5, %v1554_v45  ;;  %v5533_v45 = vld [vmem:[#allocation10 + $0x118] sm:$0xff] }
 0x4d7   :  { %v3587_v53 = vpop.eup %3586  ;;  %v1562_v54 = vmul.f32 %v1556_v49, %v5357_v12  ;;  %v5537_v49 = vld [vmem:[#allocation10 + $0xe0] sm:$0xff] }
 0x4d8   :  { %v1564_v62 = vmul.f32 %v3587_v53, %v1552_v50  ;;  %v3589_v8 = vpop.eup %3588  ;;  %v5541_v50 = vld [vmem:[#allocation10 + $0xe8] sm:$0xff]  ;;  %v5549_v53 = vld [vmem:[#allocation10 + $0xf8] sm:$0xff] }
 0x4d9   :  { %v1558_v55 = vmul.f32 0.5, %v3589_v8  ;;  %v5557_v8 = vld [vmem:[#allocation10 + $0xc8] sm:$0xff] }
 0x4da   :  { %v3591_v43 = vpop.eup %3590  ;;  %v5393_v28 = vadd.f32 %v1564_v62, %v1562_v54  ;;  %v5551_v54 = vld [vmem:[#allocation10 + $0xd0] sm:$0xff]  ;;  %v5553_v62 = vld [vmem:[#allocation10 + $0xc0] sm:$0xff] }
 0x4db   :  { %v5395_v42 = vmul.f32 %v3591_v43, %v1559_v34  ;;  %v1560_v12 = vadd.f32 0.5, %v1558_v55  ;;  %7140 = vst [vmem:[#allocation53_spill] sm:$0xff] %v5551_v54  ;;  %v5567_v34 = vld [vmem:[#allocation10 + $0xb0] sm:$0xff]  ;;  %v5569_v43 = vld [vmem:[#allocation10 + $0xa0] sm:$0xff]  ;;  %v5573_v55 = vld [vmem:[#allocation10 + $0xa8] sm:$0xff] }
 0x4dc   :  { %3592 = vtanh.f32 %v5393_v28  ;;  %7142 = vst [vmem:[#allocation54_spill] sm:$0xff] %v5567_v34 }
 0x4dd   :  { %1601 = vmatmul.f32.vlgmr.msra.gmra.mxu0 %v5395_v42  ;;  %1624 = vmatmul.f32.vlgmr.msrb.gmra.mxu1 %v5395_v42  ;;  %7143 = vst [vmem:[#allocation55_spill] sm:$0xff] %v5569_v43 }
 0x4de   :  { %1647 = vmatmul.f32.vlgmr.msrb.gmra.mxu2 %v5395_v42  ;;  %1670 = vmatmul.f32.vlgmr.msrb.gmra.mxu3 %v5395_v42  ;;  %7144 = vst [vmem:[#allocation56_spill] sm:$0xff] %v5573_v55 }
 0x4df   :  { %2250 = vmatpush.msrb.mxu2 %v5408_v32  ;;  %2204 = vmatpush.msra.mxu0 %v5410_v58 }
 0x4e0   :  { %2227 = vmatpush.msrb.mxu1 %v5412_v48  ;;  %2273 = vmatpush.msrb.mxu3 %v5421_v33 }
 0x4e1   :  { %2251 = vmatpush.msrb.mxu2 %v5423_v20  ;;  %2205 = vmatpush.msra.mxu0 %v5425_v23 }
 0x4e2   :  { %v3593_v38 = vpop.eup %3592  ;;  %2228 = vmatpush.msrb.mxu1 %v5429_v59  ;;  %2274 = vmatpush.msrb.mxu3 %v5437_v30 }
 0x4e3   :  { %v5402_v27 = vmul.f32 %v3593_v38, %v1560_v12  ;;  %2252 = vmatpush.msrb.mxu2 %v5439_v35  ;;  %2206 = vmatpush.msra.mxu0 %v5441_v52  ;;  %v5587_v12 = vld [vmem:[#allocation10 + $0x90] sm:$0xff]  ;;  %v5603_v38 = vld [vmem:[#allocation10 + $0x98] sm:$0xff] }
 0x4e4   :  { %2229 = vmatpush.msrb.mxu1 %v5445_v63  ;;  %2275 = vmatpush.msrb.mxu3 %v5453_v2  ;;  %7146 = vst [vmem:[#allocation58_spill] sm:$0xff] %v5587_v12 }
 0x4e5   :  { %1604 = vmatmul.f32.gmra.mxu0 %v5402_v27  ;;  %1627 = vmatmul.f32.gmra.mxu1 %v5402_v27  ;;  %7149 = vst [vmem:[#allocation62_spill] sm:$0xff] %v5603_v38 }
 0x4e6   :  { %1650 = vmatmul.f32.gmra.mxu2 %v5402_v27  ;;  %1673 = vmatmul.f32.gmra.mxu3 %v5402_v27 }
 0x4e7   :  { %2253 = vmatpush.msrb.mxu2 %v5455_v9  ;;  %2207 = vmatpush.msra.mxu0 %v5457_v29 }
 0x4e8   :  { %2230 = vmatpush.msrb.mxu1 %v5461_v11  ;;  %2276 = vmatpush.msrb.mxu3 %v5469_v19 }
 0x4e9   :  { %2254 = vmatpush.msrb.mxu2 %v5471_v46  ;;  %2208 = vmatpush.msra.mxu0 %v5473_v39 }
 0x4ea   :  { %2231 = vmatpush.msrb.mxu1 %v5477_v57  ;;  %2277 = vmatpush.msrb.mxu3 %v5485_v44 }
 0x4eb   :  { %2255 = vmatpush.msrb.mxu2 %v5487_v51  ;;  %2209 = vmatpush.msra.mxu0 %v5489_v5 }
 0x4ec   :  { %2232 = vmatpush.msrb.mxu1 %v5493_v25  ;;  %2278 = vmatpush.msrb.mxu3 %v5501_v3 }
 0x4ed   :  { %1888 = vmatmul.f32.vlgmr.msrb.gmra.mxu0 %v7132_v6  ;;  %1953 = vmatmul.f32.vlgmr.msra.gmra.mxu1 %v7132_v6 }
 0x4ee   :  { %2018 = vmatmul.f32.vlgmr.msra.gmra.mxu2 %v7132_v6  ;;  %2083 = vmatmul.f32.vlgmr.msra.gmra.mxu3 %v7132_v6  ;;  %v5607_v6 = vld [vmem:[#allocation10 + $0x70] sm:$0xff] }
 0x4ef   :  { %2256 = vmatpush.msrb.mxu2 %v5503_v60  ;;  %2210 = vmatpush.msra.mxu0 %v5505_v41  ;;  %7150 = vst [vmem:[#allocation61_spill] sm:$0xff] %v5607_v6 }
 0x4f0   :  { %2233 = vmatpush.msrb.mxu1 %v5509_v17  ;;  %2279 = vmatpush.msrb.mxu3 %v5517_v13 }
 0x4f1   :  { %2257 = vmatpush.msrb.mxu2 %v5519_v18  ;;  %2211 = vmatpush.msra.mxu0 %v5521_v10 }
 0x4f2   :  { %2234 = vmatpush.msrb.mxu1 %v5525_v22  ;;  %2280 = vmatpush.msrb.mxu3 %v5533_v45 }
 0x4f3   :  { %2258 = vmatpush.msrb.mxu2 %v5535_v47  ;;  %2212 = vmatpush.msra.mxu0 %v5537_v49 }
 0x4f4   :  { %2235 = vmatpush.msrb.mxu1 %v5541_v50  ;;  %2281 = vmatpush.msrb.mxu3 %v5549_v53 }
 0x4f5   :  { %1891 = vmatmul.f32.gmra.mxu0 %v7133_v26  ;;  %1956 = vmatmul.f32.gmra.mxu1 %v7133_v26 }
 0x4f6   :  { %2021 = vmatmul.f32.gmra.mxu2 %v7133_v26  ;;  %2086 = vmatmul.f32.gmra.mxu3 %v7133_v26 }
 0x4f7   :  { %2259 = vmatpush.msrb.mxu2 %v5551_v54  ;;  %2213 = vmatpush.msra.mxu0 %v5553_v62 }
 0x4f8   :  { %2236 = vmatpush.msrb.mxu1 %v5557_v8 }
 0x4f9   :  { %2260 = vmatpush.msrb.mxu2 %v5567_v34  ;;  %2214 = vmatpush.msra.mxu0 %v5569_v43 }
 0x4fa   :  { %2237 = vmatpush.msrb.mxu1 %v5573_v55 }
 0x4fb   :  { %2261 = vmatpush.msrb.mxu2 %v5587_v12  ;;  %v5617_v12 = vld [vmem:[#allocation10 + $0x68] sm:$0xff] }
 0x4fc   :  { %7154 = vst [vmem:[#allocation64_spill] sm:$0xff] %v5617_v12 }
 0x4fd   :  { %1894 = vmatmul.f32.gmra.mxu0 %v7134_v1  ;;  %1959 = vmatmul.f32.gmra.mxu1 %v7134_v1 }
 0x4fe   :  { %2024 = vmatmul.f32.gmra.mxu2 %v7134_v1  ;;  %2089 = vmatmul.f32.gmra.mxu3 %v7134_v1 }
 0x4ff   :  { %2262 = vmatpush.msrb.mxu2 %v5607_v6  ;;  %v5625_v6 = vld [vmem:[#allocation10 + $0x40] sm:$0xff] }
 0x500   :  { %7157 = vst [vmem:[#allocation67_spill] sm:$0xff] %v5625_v6 }
 0x505   :  { %1897 = vmatmul.f32.gmra.mxu0 %v7135_v4  ;;  %1962 = vmatmul.f32.gmra.mxu1 %v7135_v4 }
 0x506   :  { %2027 = vmatmul.f32.gmra.mxu2 %v7135_v4  ;;  %2092 = vmatmul.f32.gmra.mxu3 %v7135_v4 }
 0x50d   :  { %1900 = vmatmul.f32.gmra.mxu0 %v7136_v7  ;;  %1965 = vmatmul.f32.gmra.mxu1 %v7136_v7 }
 0x50e   :  { %2030 = vmatmul.f32.gmra.mxu2 %v7136_v7  ;;  %2095 = vmatmul.f32.gmra.mxu3 %v7136_v7 }
 0x515   :  { %1903 = vmatmul.f32.gmra.mxu0 %v7137_v36  ;;  %1968 = vmatmul.f32.gmra.mxu1 %v7137_v36 }
 0x516   :  { %2033 = vmatmul.f32.gmra.mxu2 %v7137_v36  ;;  %2098 = vmatmul.f32.gmra.mxu3 %v7137_v36 }
 0x51d   :  { %1906 = vmatmul.f32.gmra.mxu0 %v7138_v40  ;;  %1971 = vmatmul.f32.gmra.mxu1 %v7138_v40 }
 0x51e   :  { %2036 = vmatmul.f32.gmra.mxu2 %v7138_v40  ;;  %2101 = vmatmul.f32.gmra.mxu3 %v7138_v40 }
 0x525   :  { %1909 = vmatmul.f32.gmra.mxu0 %v7139_v37  ;;  %1974 = vmatmul.f32.gmra.mxu1 %v7139_v37 }
 0x526   :  { %2039 = vmatmul.f32.gmra.mxu2 %v7139_v37  ;;  %2104 = vmatmul.f32.gmra.mxu3 %v7139_v37  ;;  %v5615_v37 = vld [vmem:[#allocation10 + $0x60] sm:$0xff] }
 0x527   :  { %7153 = vst [vmem:[#allocation63_spill] sm:$0xff] %v5615_v37 }
 0x52d   :  { %1912 = vmatmul.f32.gmra.mxu0 %v5259_v56  ;;  %1977 = vmatmul.f32.gmra.mxu1 %v5259_v56 }
 0x52e   :  { %2042 = vmatmul.f32.gmra.mxu2 %v5259_v56  ;;  %2107 = vmatmul.f32.gmra.mxu3 %v5259_v56  ;;  %v5565_v56 = vld [vmem:[#allocation10 + $0xd8] sm:$0xff] }
 0x52f   :  { %7141 = vst [vmem:[#allocation51_spill] sm:$0xff] %v5565_v56  ;;  %2282 = vmatpush.msrb.mxu3 %v5565_v56 }
 0x535   :  { %1915 = vmatmul.f32.gmra.mxu0 %v5274_v0  ;;  %1980 = vmatmul.f32.gmra.mxu1 %v5274_v0 }
 0x536   :  { %2045 = vmatmul.f32.gmra.mxu2 %v5274_v0  ;;  %2110 = vmatmul.f32.gmra.mxu3 %v5274_v0  ;;  %v5585_v0 = vld [vmem:[#allocation10 + $0xb8] sm:$0xff] }
 0x537   :  { %7145 = vst [vmem:[#allocation57_spill] sm:$0xff] %v5585_v0  ;;  %2283 = vmatpush.msrb.mxu3 %v5585_v0 }
 0x539   :  { %2284 = vmatpush.msrb.mxu3 %v5603_v38 }
 0x53d   :  { %1918 = vmatmul.f32.gmra.mxu0 %v5359_v15  ;;  %1983 = vmatmul.f32.gmra.mxu1 %v5359_v15 }
 0x53e   :  { %2048 = vmatmul.f32.gmra.mxu2 %v5359_v15  ;;  %2113 = vmatmul.f32.gmra.mxu3 %v5359_v15  ;;  %v5599_v15 = vld [vmem:[#allocation10 + $0x80] sm:$0xff] }
 0x53f   :  { %7147 = vst [vmem:[#allocation59_spill] sm:$0xff] %v5599_v15  ;;  %2215 = vmatpush.msra.mxu0 %v5599_v15  ;;  %v7165_v15 = vld [vmem:[#allocation95_spill] sm:$0xff] }
 0x540   :  { %v371_v0 = vadd.f32 %v7165_v15, %v7116_v21 }
 0x541   :  { %2216 = vmatpush.msra.mxu0 %v5615_v37  ;;  %v7164_v37 = vld [vmem:[#allocation44_spill] sm:$0xff] }
 0x542   :  { %v306_v38 = vadd.f32 %v7164_v37, %v7114_v14 }
 0x543   :  { %2217 = vmatpush.msra.mxu0 %v5625_v6  ;;  %v5661_v6 = vld [vmem:[#allocation10 + $0x18] sm:$0xff] }
 0x544   :  { %7171 = vst [vmem:[#allocation21_spill] sm:$0xff] %v5661_v6 }
 0x545   :  { %1921 = vmatmul.f32.gmra.mxu0 %v5366_v24  ;;  %1986 = vmatmul.f32.gmra.mxu1 %v5366_v24 }
 0x546   :  { %2051 = vmatmul.f32.gmra.mxu2 %v5366_v24  ;;  %2116 = vmatmul.f32.gmra.mxu3 %v5366_v24  ;;  %v5601_v24 = vld [vmem:[#allocation10 + $0x88] sm:$0xff] }
 0x547   :  { %7148 = vst [vmem:[#allocation60_spill] sm:$0xff] %v5601_v24  ;;  %2238 = vmatpush.msrb.mxu1 %v5601_v24  ;;  %v5619_v24 = vld [vmem:[#allocation10 + $0x78] sm:$0xff] }
 0x548   :  { %7155 = vst [vmem:[#allocation66_spill] sm:$0xff] %v5619_v24  ;;  %2285 = vmatpush.msrb.mxu3 %v5619_v24  ;;  %v5651_v24 = vld [vmem:[#allocation10 + $0x10] sm:$0xff] }
 0x549   :  { %2239 = vmatpush.msrb.mxu1 %v5617_v12  ;;  %v5639_v12 = vld [vmem:[#allocation10 + $0x20] sm:$0xff]  ;;  %7168 = vst [vmem:[#allocation73_spill] sm:$0xff] %v5651_v24 }
 0x54a   :  { %7163 = vst [vmem:[#allocation71_spill] sm:$0xff] %v5639_v12  ;;  %2218 = vmatpush.msra.mxu0 %v5639_v12 }
 0x54d   :  { %1924 = vmatmul.f32.gmra.mxu0 %v5395_v42  ;;  %1989 = vmatmul.f32.gmra.mxu1 %v5395_v42 }
 0x54e   :  { %2054 = vmatmul.f32.gmra.mxu2 %v5395_v42  ;;  %2119 = vmatmul.f32.gmra.mxu3 %v5395_v42  ;;  %v7151_v42 = vld [vmem:[#allocation43_spill] sm:$0xff] }
 0x54f   :  { %v303_v26 = vadd.f32 %v7151_v42, %v7114_v14  ;;  %v5623_v42 = vld [vmem:[#allocation10 + $0x50] sm:$0xff]  ;;  %v5655_v14 = vld [vmem:[#allocation10] sm:$0xff] }
 0x550   :  { %7156 = vst [vmem:[#allocation65_spill] sm:$0xff] %v5623_v42  ;;  %2263 = vmatpush.msrb.mxu2 %v5623_v42  ;;  %v5649_v42 = vld [vmem:[#allocation10 + $0x38] sm:$0xff]  ;;  %2219 = vmatpush.msra.mxu0 %v5655_v14 }
 0x551   :  { %7167 = vst [vmem:[#allocation76_spill] sm:$0xff] %v5649_v42 }
 0x552   :  { %7169 = vst [vmem:[#allocation74_spill] sm:$0xff] %v5655_v14  ;;  %2342 = vmatpush.msrb.mxu0 %v5410_v58 }
 0x554   :  { %2343 = vmatpush.msrb.mxu0 %v5425_v23 }
 0x555   :  { %1927 = vmatmul.f32.gmra.mxu0 %v5402_v27  ;;  %1992 = vmatmul.f32.gmra.mxu1 %v5402_v27 }
 0x556   :  { %2057 = vmatmul.f32.gmra.mxu2 %v5402_v27  ;;  %2122 = vmatmul.f32.gmra.mxu3 %v5402_v27  ;;  %v7152_v27 = vld [vmem:[#allocation92_spill] sm:$0xff] }
 0x557   :  { %v368_v1 = vadd.f32 %v7152_v27, %v7116_v21  ;;  %v5627_v27 = vld [vmem:[#allocation10 + $0x48] sm:$0xff]  ;;  %2344 = vmatpush.msrb.mxu0 %v5441_v52 }
 0x558   :  { %7158 = vst [vmem:[#allocation68_spill] sm:$0xff] %v5627_v27  ;;  %2240 = vmatpush.msrb.mxu1 %v5627_v27  ;;  %v5657_v21 = vld [vmem:[#allocation10 + $0x8] sm:$0xff] }
 0x559   :  { %7170 = vst [vmem:[#allocation75_spill] sm:$0xff] %v5657_v21  ;;  %2345 = vmatpush.msrb.mxu0 %v5457_v29 }
 0x55a   :  { %v1602_v4 = vpop.f32.mrf.mxu0  ;;  %v1625_v7 = vpop.f32.mrf.mxu1 }
 0x55b   :  { %v1677_v36 = vadd.f32 %v1602_v4, %v303_v26  ;;  %v1678_v40 = vadd.f32 %v1625_v7, %v368_v1  ;;  %v7159_v26 = vld [vmem:[#allocation93_spill] sm:$0xff]  ;;  %v7160_v4 = vld [vmem:[#allocation94_spill] sm:$0xff]  ;;  %2346 = vmatpush.msrb.mxu0 %v5473_v39 }
 0x55c   :  { %v433_v1 = vadd.f32 %v7159_v26, %v4710_v16  ;;  %v498_v7 = vadd.f32 %v7160_v4, %v6983_v61  ;;  %v5647_v4 = vld [vmem:[#allocation10 + $0x28] sm:$0xff] }
 0x55d   :  { %3594 = vtanh.f32 %v1677_v36  ;;  %v5635_v36 = vld [vmem:[#allocation10 + $0x58] sm:$0xff]  ;;  %7166 = vst [vmem:[#allocation72_spill] sm:$0xff] %v5647_v4  ;;  %2241 = vmatpush.msrb.mxu1 %v5647_v4  ;;  %2347 = vmatpush.msrb.mxu0 %v5489_v5 }
 0x55e   :  { %3596 = vtanh.f32 %v1678_v40  ;;  %7161 = vst [vmem:[#allocation70_spill] sm:$0xff] %v5635_v36  ;;  %v5637_v40 = vld [vmem:[#allocation10 + $0x30] sm:$0xff]  ;;  %2286 = vmatpush.msrb.mxu3 %v5635_v36 }
 0x55f   :  { %7162 = vst [vmem:[#allocation69_spill] sm:$0xff] %v5637_v40  ;;  %2264 = vmatpush.msrb.mxu2 %v5637_v40  ;;  %2242 = vmatpush.msrb.mxu1 %v5657_v21 }
 0x560   :  { %2287 = vmatpush.msrb.mxu3 %v5649_v42  ;;  %2348 = vmatpush.msrb.mxu0 %v5505_v41 }
 0x561   :  { %v1648_v26 = vpop.f32.mrf.mxu2  ;;  %v1671_v34 = vpop.f32.mrf.mxu3  ;;  %2265 = vmatpush.msrb.mxu2 %v5651_v24  ;;  %2365 = vmatpush.msra.mxu1 %v5412_v48 }
 0x562   :  { %v1679_v55 = vadd.f32 %v1648_v26, %v433_v1  ;;  %v1680_v43 = vadd.f32 %v1671_v34, %v498_v7  ;;  %v1605_v56 = vpop.f32.mrf.mxu0  ;;  %v1628_v54 = vpop.f32.mrf.mxu1  ;;  %2288 = vmatpush.msrb.mxu3 %v5661_v6  ;;  %2349 = vmatpush.msrb.mxu0 %v5521_v10 }
 0x563   :  { %v3595_v15 = vpop.eup %3594  ;;  %v1681_v37 = vadd.f32 %v1605_v56, %v306_v38  ;;  %v1682_v27 = vadd.f32 %v1628_v54, %v371_v0  ;;  %2388 = vmatpush.msra.mxu2 %v5408_v32  ;;  %v7172_v56 = vld [vmem:[#allocation98_spill] sm:$0xff]  ;;  %2366 = vmatpush.msra.mxu1 %v5429_v59 }
 0x564   :  { %v3597_v34 = vpop.eup %3596  ;;  %3598 = vtanh.f32 %v1679_v55  ;;  %v1693_v1 = vmul.f32 0.5, %v3595_v15  ;;  %v436_v55 = vadd.f32 %v7172_v56, %v4710_v16  ;;  %2411 = vmatpush.msra.mxu3 %v5421_v33  ;;  %2350 = vmatpush.msrb.mxu0 %v5537_v49 }
 0x565   :  { %v1697_v7 = vmul.f32 0.5, %v3597_v34  ;;  %3600 = vtanh.f32 %v1680_v43  ;;  %v7173_v43 = vld [vmem:[#allocation99_spill] sm:$0xff]  ;;  %2389 = vmatpush.msra.mxu2 %v5423_v20  ;;  %2367 = vmatpush.msra.mxu1 %v5445_v63 }
 0x566   :  { %3602 = vtanh.f32 %v1681_v37  ;;  %v501_v0 = vadd.f32 %v7173_v43, %v6983_v61  ;;  %v1695_v38 = vadd.f32 0.5, %v1693_v1  ;;  %2412 = vmatpush.msra.mxu3 %v5437_v30  ;;  %2351 = vmatpush.msrb.mxu0 %v5553_v62 }
 0x567   :  { %v1699_v54 = vadd.f32 0.5, %v1697_v7  ;;  %3604 = vtanh.f32 %v1682_v27  ;;  %2390 = vmatpush.msra.mxu2 %v5439_v35  ;;  %2368 = vmatpush.msra.mxu1 %v5461_v11 }
 0x568   :  { %2413 = vmatpush.msra.mxu3 %v5453_v2 }
 0x569   :  { %v1651_v26 = vpop.f32.mrf.mxu2  ;;  %v1674_v15 = vpop.f32.mrf.mxu3  ;;  %v1705_v61 = vmul.f32 %v1699_v54, %v5389_v31  ;;  %2391 = vmatpush.msra.mxu2 %v5455_v9  ;;  %2369 = vmatpush.msra.mxu1 %v5477_v57 }
 0x56a   :  { %v3599_v27 = vpop.eup %3598  ;;  %v1683_v37 = vadd.f32 %v1651_v26, %v436_v55  ;;  %v1684_v34 = vadd.f32 %v1674_v15, %v501_v0  ;;  %v5682_v56 = vpop.f32.mrf.mxu0  ;;  %2414 = vmatpush.msra.mxu3 %v5469_v19 }
 0x56b   :  { %v3601_v16 = vpop.eup %3600  ;;  %v1707_v7 = vmul.f32 %v3599_v27, %v1695_v38  ;;  %7174 = vst [vmem:[#allocation19_spill] sm:$0xff] %v5682_v56  ;;  %v5684_v1 = vpop.f32.mrf.mxu1  ;;  %2392 = vmatpush.msra.mxu2 %v5471_v46  ;;  %2370 = vmatpush.msra.mxu1 %v5493_v25  ;;  %v7197_v56 = vld [vmem:[#allocation66_spill] sm:$0xff] }
 0x56c   :  { %7175 = vst [vmem:[#allocation22_spill] sm:$0xff] %v5684_v1  ;;  %v3603_v43 = vpop.eup %3602  ;;  %3606 = vtanh.f32 %v1683_v37  ;;  %v1701_v54 = vmul.f32 0.5, %v3601_v16  ;;  %2415 = vmatpush.msra.mxu3 %v5485_v44  ;;  %v7194_v1 = vld [vmem:[#allocation63_spill] sm:$0xff] }
 0x56d   :  { %v3605_v55 = vpop.eup %3604  ;;  %v1709_v0 = vadd.f32 %v1707_v7, %v1705_v61  ;;  %v1694_v26 = vmul.f32 0.5, %v3603_v43  ;;  %3608 = vtanh.f32 %v1684_v34  ;;  %2393 = vmatpush.msra.mxu2 %v5487_v51  ;;  %2371 = vmatpush.msra.mxu1 %v5509_v17 }
 0x56e   :  { %v1698_v31 = vmul.f32 0.5, %v3605_v55  ;;  %2416 = vmatpush.msra.mxu3 %v5501_v3  ;;  %v1703_v43 = vadd.f32 0.5, %v1701_v54 }
 0x56f   :  { %3610 = vtanh.f32 %v1709_v0  ;;  %v1696_v15 = vadd.f32 0.5, %v1694_v26  ;;  %2394 = vmatpush.msra.mxu2 %v5503_v60  ;;  %2372 = vmatpush.msra.mxu1 %v5525_v22 }
 0x570   :  { %v1700_v38 = vadd.f32 0.5, %v1698_v31  ;;  %2417 = vmatpush.msra.mxu3 %v5517_v13 }
 0x571   :  { %v5700_v37 = vpop.f32.mrf.mxu2  ;;  %v5702_v34 = vpop.f32.mrf.mxu3  ;;  %2395 = vmatpush.msra.mxu2 %v5519_v18  ;;  %2373 = vmatpush.msra.mxu1 %v5541_v50 }
 0x572   :  { %v3607_v27 = vpop.eup %3606  ;;  %7176 = vst [vmem:[#allocation23_spill] sm:$0xff] %v5700_v37  ;;  %v1706_v16 = vmul.f32 %v1700_v38, %v5393_v28  ;;  %v5711_v26 = vpop.f32.mrf.mxu0  ;;  %2418 = vmatpush.msra.mxu3 %v5533_v45  ;;  %v7180_v38 = vld [vmem:[#allocation53_spill] sm:$0xff]  ;;  %v7193_v37 = vld [vmem:[#allocation62_spill] sm:$0xff] }
 0x573   :  { %7177 = vst [vmem:[#allocation24_spill] sm:$0xff] %v5702_v34  ;;  %v1708_v61 = vmul.f32 %v3607_v27, %v1696_v15  ;;  %v3609_v7 = vpop.eup %3608  ;;  %v5713_v31 = vpop.f32.mrf.mxu1  ;;  %2396 = vmatpush.msra.mxu2 %v5535_v47  ;;  %2374 = vmatpush.msra.mxu1 %v5557_v8 }
 0x574   :  { %7178 = vst [vmem:[#allocation25_spill] sm:$0xff] %v5711_v26  ;;  %v1702_v54 = vmul.f32 0.5, %v3609_v7  ;;  %2419 = vmatpush.msra.mxu3 %v5549_v53  ;;  %v7184_v7 = vld [vmem:[#allocation55_spill] sm:$0xff] }
 0x575   :  { %v3611_v55 = vpop.eup %3610  ;;  %v1710_v0 = vadd.f32 %v1708_v61, %v1706_v16  ;;  %7179 = vst [vmem:[#allocation27_spill] sm:$0xff] %v5713_v31  ;;  %2397 = vmatpush.msra.mxu2 %v7180_v38  ;;  %v7183_v61 = vld [vmem:[#allocation51_spill] sm:$0xff]  ;;  %2352 = vmatpush.msrb.mxu0 %v7184_v7  ;;  %v7187_v31 = vld [vmem:[#allocation57_spill] sm:$0xff] }
 0x576   :  { %v1713_v28 = vmul.f32 %v3611_v55, %v1703_v43  ;;  %v1704_v15 = vadd.f32 0.5, %v1702_v54  ;;  %2420 = vmatpush.msra.mxu3 %v7183_v61  ;;  %v7185_v55 = vld [vmem:[#allocation56_spill] sm:$0xff]  ;;  %v7188_v26 = vld [vmem:[#allocation59_spill] sm:$0xff] }
 0x577   :  { %3612 = vtanh.f32 %v1710_v0  ;;  %2375 = vmatpush.msra.mxu1 %v7185_v55  ;;  %v7186_v0 = vld [vmem:[#allocation54_spill] sm:$0xff]  ;;  %2353 = vmatpush.msrb.mxu0 %v7188_v26 }
 0x578   :  { %1930 = vmatmul.f32.gmra.mxu0 %v1713_v28  ;;  %1995 = vmatmul.f32.gmra.mxu1 %v1713_v28 }
 0x579   :  { %2060 = vmatmul.f32.gmra.mxu2 %v1713_v28  ;;  %2125 = vmatmul.f32.gmra.mxu3 %v1713_v28  ;;  %v5725_v27 = vpop.f32.mrf.mxu2  ;;  %v5727_v16 = vpop.f32.mrf.mxu3 }
 0x57a   :  { %7181 = vst [vmem:[#allocation31_spill] sm:$0xff] %v5725_v27  ;;  %2398 = vmatpush.msra.mxu2 %v7186_v0  ;;  %2421 = vmatpush.msra.mxu3 %v7187_v31  ;;  %v5735_v34 = vpop.f32.mrf.mxu0  ;;  %v7191_v27 = vld [vmem:[#allocation60_spill] sm:$0xff] }
 0x57b   :  { %7182 = vst [vmem:[#allocation32_spill] sm:$0xff] %v5727_v16  ;;  %v5737_v54 = vpop.f32.mrf.mxu1  ;;  %2376 = vmatpush.msra.mxu1 %v7191_v27  ;;  %v7192_v16 = vld [vmem:[#allocation58_spill] sm:$0xff]  ;;  %2354 = vmatpush.msrb.mxu0 %v7194_v1  ;;  %v7200_v27 = vld [vmem:[#allocation65_spill] sm:$0xff] }
 0x57c   :  { %7189 = vst [vmem:[#allocation28_spill] sm:$0xff] %v5735_v34  ;;  %2399 = vmatpush.msra.mxu2 %v7192_v16  ;;  %2422 = vmatpush.msra.mxu3 %v7193_v37  ;;  %v7198_v34 = vld [vmem:[#allocation67_spill] sm:$0xff] }
 0x57d   :  { %v3613_v43 = vpop.eup %3612  ;;  %7190 = vst [vmem:[#allocation34_spill] sm:$0xff] %v5737_v54  ;;  %2355 = vmatpush.msrb.mxu0 %v7198_v34  ;;  %v7199_v54 = vld [vmem:[#allocation68_spill] sm:$0xff] }
 0x57e   :  { %v1714_v28 = vmul.f32 %v3613_v43, %v1704_v15  ;;  %v7195_v15 = vld [vmem:[#allocation64_spill] sm:$0xff]  ;;  %v7196_v43 = vld [vmem:[#allocation61_spill] sm:$0xff]  ;;  %2423 = vmatpush.msra.mxu3 %v7197_v56 }
 0x57f   :  { %2377 = vmatpush.msra.mxu1 %v7195_v15  ;;  %2400 = vmatpush.msra.mxu2 %v7196_v43 }
 0x580   :  { %1933 = vmatmul.f32.gmra.mxu0 %v1714_v28  ;;  %1998 = vmatmul.f32.gmra.mxu1 %v1714_v28 }
 0x581   :  { %2063 = vmatmul.f32.gmra.mxu2 %v1714_v28  ;;  %2128 = vmatmul.f32.gmra.mxu3 %v1714_v28  ;;  %v5749_v16 = vpop.f32.mrf.mxu2  ;;  %v5751_v26 = vpop.f32.mrf.mxu3  ;;  %v7203_v28 = vmov 0.0  }
 0x582   :  { %2378 = vmatpush.msra.mxu1 %v7199_v54  ;;  %2401 = vmatpush.msra.mxu2 %v7200_v27  ;;  %7201 = vst [vmem:[#allocation33_spill] sm:$0xff] %v5749_v16  ;;  %v5759_v34 = vpop.f32.mrf.mxu0 }
 0x583   :  { %7202 = vst [vmem:[#allocation35_spill] sm:$0xff] %v5751_v26  ;;  %2424 = vmatpush.msra.mxu3 %v5635_v36  ;;  %2356 = vmatpush.msrb.mxu0 %v5639_v12  ;;  %v5761_v54 = vpop.f32.mrf.mxu1 }
 0x584   :  { %2379 = vmatpush.msra.mxu1 %v5647_v4  ;;  %2402 = vmatpush.msra.mxu2 %v5637_v40  ;;  %7204 = vst [vmem:[#allocation29_spill] sm:$0xff] %v5759_v34 }
 0x585   :  { %7205 = vst [vmem:[#allocation40_spill] sm:$0xff] %v5761_v54  ;;  %2425 = vmatpush.msra.mxu3 %v5649_v42  ;;  %2357 = vmatpush.msrb.mxu0 %v5655_v14 }
 0x586   :  { %2380 = vmatpush.msra.mxu1 %v5657_v21  ;;  %2403 = vmatpush.msra.mxu2 %v5651_v24 }
 0x587   :  { %2426 = vmatpush.msra.mxu3 %v5661_v6 }
 0x588   :  { %2220 = vmatmul.f32.vlgmr.msra.gmra.mxu0 %v7203_v28  ;;  %2243 = vmatmul.f32.vlgmr.msrb.gmra.mxu1 %v7203_v28 }
 0x589   :  { %2266 = vmatmul.f32.vlgmr.msrb.gmra.mxu2 %v7203_v28  ;;  %2289 = vmatmul.f32.vlgmr.msrb.gmra.mxu3 %v7203_v28  ;;  %v5777_v54 = vpop.f32.mrf.mxu2  ;;  %v5779_v34 = vpop.f32.mrf.mxu3 }
 0x58a   :  { %2480 = vmatpush.msra.mxu0 %v5410_v58  ;;  %2503 = vmatpush.msrb.mxu1 %v5412_v48  ;;  %7206 = vst [vmem:[#allocation39_spill] sm:$0xff] %v5777_v54 }
 0x58b   :  { %2526 = vmatpush.msrb.mxu2 %v5408_v32  ;;  %2549 = vmatpush.msrb.mxu3 %v5421_v33  ;;  %7207 = vst [vmem:[#allocation41_spill] sm:$0xff] %v5779_v34  ;;  %v5787_v32 = vpop.f32.mrf.mxu0  ;;  %v5789_v58 = vpop.f32.mrf.mxu1 }
 0x58c   :  { %2481 = vmatpush.msra.mxu0 %v5425_v23  ;;  %2504 = vmatpush.msrb.mxu1 %v5429_v59  ;;  %7208 = vst [vmem:[#allocation37_spill] sm:$0xff] %v5787_v32 }
 0x58d   :  { %2527 = vmatpush.msrb.mxu2 %v5423_v20  ;;  %2550 = vmatpush.msrb.mxu3 %v5437_v30  ;;  %7209 = vst [vmem:[#allocation46_spill] sm:$0xff] %v5789_v58 }
 0x58e   :  { %2482 = vmatpush.msra.mxu0 %v5441_v52  ;;  %2505 = vmatpush.msrb.mxu1 %v5445_v63  ;;  %v7217_v52 = vld [vmem:[#allocation60_spill] sm:$0xff] }
 0x58f   :  { %2528 = vmatpush.msrb.mxu2 %v5439_v35  ;;  %2551 = vmatpush.msrb.mxu3 %v5453_v2  ;;  %v7216_v35 = vld [vmem:[#allocation59_spill] sm:$0xff] }
 0x590   :  { %2223 = vmatmul.f32.gmra.mxu0 %v7203_v28  ;;  %2246 = vmatmul.f32.gmra.mxu1 %v7203_v28 }
 0x591   :  { %2269 = vmatmul.f32.gmra.mxu2 %v7203_v28  ;;  %2292 = vmatmul.f32.gmra.mxu3 %v7203_v28  ;;  %v5805_v48 = vpop.f32.mrf.mxu2  ;;  %v5807_v33 = vpop.f32.mrf.mxu3 }
 0x592   :  { %2483 = vmatpush.msra.mxu0 %v5457_v29  ;;  %2506 = vmatpush.msrb.mxu1 %v5461_v11  ;;  %7210 = vst [vmem:[#allocation26_spill] sm:$0xff] %v5805_v48 }
 0x593   :  { %2529 = vmatpush.msrb.mxu2 %v5455_v9  ;;  %2552 = vmatpush.msrb.mxu3 %v5469_v19  ;;  %7211 = vst [vmem:[#allocation48_spill] sm:$0xff] %v5807_v33  ;;  %v5815_v20 = vpop.f32.mrf.mxu0  ;;  %v5817_v23 = vpop.f32.mrf.mxu1  ;;  %v7218_v9 = vld [vmem:[#allocation58_spill] sm:$0xff] }
 0x594   :  { %2484 = vmatpush.msra.mxu0 %v5473_v39  ;;  %2507 = vmatpush.msrb.mxu1 %v5477_v57  ;;  %7212 = vst [vmem:[#allocation36_spill] sm:$0xff] %v5815_v20 }
 0x595   :  { %2530 = vmatpush.msrb.mxu2 %v5471_v46  ;;  %2553 = vmatpush.msrb.mxu3 %v5485_v44  ;;  %7213 = vst [vmem:[#allocation45_spill] sm:$0xff] %v5817_v23 }
 0x596   :  { %2485 = vmatpush.msra.mxu0 %v5489_v5  ;;  %2508 = vmatpush.msrb.mxu1 %v5493_v25 }
 0x597   :  { %2531 = vmatpush.msrb.mxu2 %v5487_v51  ;;  %2554 = vmatpush.msrb.mxu3 %v5501_v3 }
 0x598   :  { %2486 = vmatpush.msra.mxu0 %v5505_v41  ;;  %2509 = vmatpush.msrb.mxu1 %v5509_v17 }
 0x599   :  { %2532 = vmatpush.msrb.mxu2 %v5503_v60  ;;  %2555 = vmatpush.msrb.mxu3 %v5517_v13  ;;  %v5833_v59 = vpop.f32.mrf.mxu2  ;;  %v5835_v30 = vpop.f32.mrf.mxu3 }
 0x59a   :  { %2487 = vmatpush.msra.mxu0 %v5521_v10  ;;  %2510 = vmatpush.msrb.mxu1 %v5525_v22  ;;  %7214 = vst [vmem:[#allocation49_spill] sm:$0xff] %v5833_v59  ;;  %v7222_v59 = vld [vmem:[#allocation68_spill] sm:$0xff] }
 0x59b   :  { %2533 = vmatpush.msrb.mxu2 %v5519_v18  ;;  %2556 = vmatpush.msrb.mxu3 %v5533_v45  ;;  %7215 = vst [vmem:[#allocation47_spill] sm:$0xff] %v5835_v30  ;;  %v5843_v28 = vpop.f32.mrf.mxu0  ;;  %v5845_v23 = vpop.f32.mrf.mxu1  ;;  %v7221_v30 = vld [vmem:[#allocation67_spill] sm:$0xff] }
 0x59c   :  { %2488 = vmatpush.msra.mxu0 %v5537_v49  ;;  %2511 = vmatpush.msrb.mxu1 %v5541_v50  ;;  %7219 = vst [vmem:[#allocation96_spill] sm:$0xff] %v5843_v28 }
 0x59d   :  { %2534 = vmatpush.msrb.mxu2 %v5535_v47  ;;  %2557 = vmatpush.msrb.mxu3 %v5549_v53  ;;  %7220 = vst [vmem:[#allocation81_spill] sm:$0xff] %v5845_v23 }
 0x59e   :  { %2489 = vmatpush.msra.mxu0 %v5553_v62  ;;  %2512 = vmatpush.msrb.mxu1 %v5557_v8 }
 0x59f   :  { %2535 = vmatpush.msrb.mxu2 %v7180_v38  ;;  %2558 = vmatpush.msrb.mxu3 %v7183_v61 }
 0x5a0   :  { %2490 = vmatpush.msra.mxu0 %v7184_v7  ;;  %2513 = vmatpush.msrb.mxu1 %v7185_v55 }
 0x5a1   :  { %2536 = vmatpush.msrb.mxu2 %v7186_v0  ;;  %2559 = vmatpush.msrb.mxu3 %v7187_v31  ;;  %v5861_v23 = vpop.f32.mrf.mxu2  ;;  %v5863_v28 = vpop.f32.mrf.mxu3 }
 0x5a2   :  { %2491 = vmatpush.msra.mxu0 %v7216_v35  ;;  %2514 = vmatpush.msrb.mxu1 %v7217_v52  ;;  %7223 = vst [vmem:[#allocation97_spill] sm:$0xff] %v5861_v23 }
 0x5a3   :  { %2537 = vmatpush.msrb.mxu2 %v7218_v9  ;;  %2560 = vmatpush.msrb.mxu3 %v7193_v37  ;;  %7224 = vst [vmem:[#allocation77_spill] sm:$0xff] %v5863_v28  ;;  %v5866_v20 = vpop.f32.mrf.mxu0  ;;  %v5868_v33 = vpop.f32.mrf.mxu1 }
 0x5a4   :  { %2492 = vmatpush.msra.mxu0 %v7194_v1  ;;  %2515 = vmatpush.msrb.mxu1 %v7195_v15  ;;  %7225 = vst [vmem:[#allocation78_spill] sm:$0xff] %v5866_v20 }
 0x5a5   :  { %2538 = vmatpush.msrb.mxu2 %v7196_v43  ;;  %2561 = vmatpush.msrb.mxu3 %v7197_v56  ;;  %7226 = vst [vmem:[#allocation79_spill] sm:$0xff] %v5868_v33 }
 0x5a6   :  { %2493 = vmatpush.msra.mxu0 %v7221_v30  ;;  %2516 = vmatpush.msrb.mxu1 %v7222_v59 }
 0x5a7   :  { %2539 = vmatpush.msrb.mxu2 %v7200_v27  ;;  %2562 = vmatpush.msrb.mxu3 %v5635_v36 }
 0x5a8   :  { %2494 = vmatpush.msra.mxu0 %v5639_v12  ;;  %2517 = vmatpush.msrb.mxu1 %v5647_v4 }
 0x5a9   :  { %2540 = vmatpush.msrb.mxu2 %v5637_v40  ;;  %2563 = vmatpush.msrb.mxu3 %v5649_v42  ;;  %v5870_v48 = vpop.f32.mrf.mxu2  ;;  %v5872_v58 = vpop.f32.mrf.mxu3  ;;  %v7266_v42 = vld [vmem:[#allocation23_spill] sm:$0xff]  ;;  %v7267_v40 = vld [vmem:[#allocation24_spill] sm:$0xff] }
 0x5aa   :  { %2495 = vmatpush.msra.mxu0 %v5655_v14  ;;  %2518 = vmatpush.msrb.mxu1 %v5657_v21  ;;  %7227 = vst [vmem:[#allocation85_spill] sm:$0xff] %v5870_v48 }
 0x5ab   :  { %2541 = vmatpush.msrb.mxu2 %v5651_v24  ;;  %2564 = vmatpush.msrb.mxu3 %v5661_v6  ;;  %7228 = vst [vmem:[#allocation80_spill] sm:$0xff] %v5872_v58  ;;  %v5874_v32 = vpop.f32.mrf.mxu0  ;;  %v5876_v34 = vpop.f32.mrf.mxu1 }
 0x5ac   :  { %7229 = vst [vmem:[#allocation82_spill] sm:$0xff] %v5874_v32 }
 0x5ad   :  { %7230 = vst [vmem:[#allocation83_spill] sm:$0xff] %v5876_v34 }
 0x5b1   :  { %v5878_v54 = vpop.f32.mrf.mxu2  ;;  %v5880_v26 = vpop.f32.mrf.mxu3 }
 0x5b2   :  { %7231 = vst [vmem:[#allocation89_spill] sm:$0xff] %v5878_v54 }
 0x5b3   :  { %7232 = vst [vmem:[#allocation84_spill] sm:$0xff] %v5880_v26  ;;  %v5882_v23 = vpop.f32.mrf.mxu0  ;;  %v5884_v28 = vpop.f32.mrf.mxu1 }
 0x5b4   :  { %7233 = vst [vmem:[#allocation86_spill] sm:$0xff] %v5882_v23 }
 0x5b5   :  { %7234 = vst [vmem:[#allocation87_spill] sm:$0xff] %v5884_v28 }
 0x5b9   :  { %v5886_v16 = vpop.f32.mrf.mxu2  ;;  %v5888_v20 = vpop.f32.mrf.mxu3 }
 0x5ba   :  { %7235 = vst [vmem:[#allocation42_spill] sm:$0xff] %v5886_v16 }
 0x5bb   :  { %7236 = vst [vmem:[#allocation88_spill] sm:$0xff] %v5888_v20  ;;  %v5890_v33 = vpop.f32.mrf.mxu0  ;;  %v5892_v48 = vpop.f32.mrf.mxu1 }
 0x5bc   :  { %7237 = vst [vmem:[#allocation90_spill] sm:$0xff] %v5890_v33 }
 0x5bd   :  { %7238 = vst [vmem:[#allocation91_spill] sm:$0xff] %v5892_v48 }
 0x5c1   :  { %v5894_v58 = vpop.f32.mrf.mxu2  ;;  %v5896_v32 = vpop.f32.mrf.mxu3 }
 0x5c2   :  { %7239 = vst [vmem:[#allocation100_spill] sm:$0xff] %v5894_v58 }
 0x5c3   :  { %7240 = vst [vmem:[#allocation17_spill] sm:$0xff] %v5896_v32  ;;  %v5898_v34 = vpop.f32.mrf.mxu0  ;;  %v5900_v54 = vpop.f32.mrf.mxu1 }
 0x5c4   :  { %7241 = vst [vmem:[#allocation20_spill] sm:$0xff] %v5898_v34 }
 0x5c5   :  { %7242 = vst [vmem:[#allocation18_spill] sm:$0xff] %v5900_v54 }
 0x5c9   :  { %v5902_v26 = vpop.f32.mrf.mxu2  ;;  %v5904_v23 = vpop.f32.mrf.mxu3 }
 0x5ca   :  { %7243 = vst [vmem:[#allocation38_spill] sm:$0xff] %v5902_v26 }
 0x5cb   :  { %7244 = vst [vmem:[#allocation30_spill] sm:$0xff] %v5904_v23  ;;  %v5906_v28 = vpop.f32.mrf.mxu0  ;;  %v5908_v16 = vpop.f32.mrf.mxu1 }
 0x5cc   :  { %7245 = vst [vmem:[#allocation50_spill] sm:$0xff] %v5906_v28 }
 0x5cd   :  { %7246 = vst [vmem:[#allocation52_spill] sm:$0xff] %v5908_v16 }
 0x5d1   :  { %v5910_v20 = vpop.f32.mrf.mxu2  ;;  %v5912_v33 = vpop.f32.mrf.mxu3 }
 0x5d2   :  { %7247 = vst [vmem:[#allocation43_spill] sm:$0xff] %v5910_v20 }
 0x5d3   :  { %7248 = vst [vmem:[#allocation92_spill] sm:$0xff] %v5912_v33  ;;  %v5914_v48 = vpop.f32.mrf.mxu0  ;;  %v5916_v58 = vpop.f32.mrf.mxu1  ;;  %v1846_v33 = vld [vmem:[%s6630_s6] sm:$0xf] }
 0x5d4   :  { %7249 = vst [vmem:[#allocation93_spill] sm:$0xff] %v5914_v48  ;;  %v5949_v14 = vperm.slane %v1846_v33, 2 }
 0x5d5   :  { %7250 = vst [vmem:[#allocation94_spill] sm:$0xff] %v5916_v58  ;;  %v5937_v58 = vperm.slane %v1846_v33, 0 }
 0x5d7   :  { %7259 = vst [vmem:[#allocation54_spill] sm:$0xff] %v5937_v58 }
 0x5d9   :  { %v5918_v32 = vpop.f32.mrf.mxu2  ;;  %v5920_v34 = vpop.f32.mrf.mxu3 }
 0x5da   :  { %7251 = vst [vmem:[#allocation44_spill] sm:$0xff] %v5918_v32  ;;  %v5939_v32 = vperm.slane %v1846_v33, 1 }
 0x5db   :  { %7252 = vst [vmem:[#allocation95_spill] sm:$0xff] %v5920_v34 }
 0x5dc   :  { %7260 = vst [vmem:[#allocation57_spill] sm:$0xff] %v5939_v32 }
 0x5f5   :  { %v5922_v54 = vpop.f32.mrf.mxu0  ;;  %v5924_v26 = vpop.f32.mrf.mxu1 }
 0x5f6   :  { %7253 = vst [vmem:[#allocation98_spill] sm:$0xff] %v5922_v54  ;;  %v7261_v54 = vld [vmem:[#allocation19_spill] sm:$0xff] }
 0x5f7   :  { %7254 = vst [vmem:[#allocation99_spill] sm:$0xff] %v5924_v26  ;;  %v1890_v34 = vadd.f32 %v7261_v54, %v5937_v58  ;;  %v7262_v26 = vld [vmem:[#allocation22_spill] sm:$0xff]  ;;  %v2020_v54 = vadd.f32 %v7266_v42, %v5949_v14 }
 0x5fc   :  { %v5926_v23 = vpop.f32.mrf.mxu2  ;;  %v5928_v28 = vpop.f32.mrf.mxu3 }
 0x5fd   :  { %7255 = vst [vmem:[#allocation53_spill] sm:$0xff] %v5926_v23  ;;  %v5933_v20 = vpop.f32.mrf.mxu0  ;;  %v5935_v48 = vpop.f32.mrf.mxu1  ;;  %v1955_v23 = vadd.f32 %v7262_v26, %v5939_v32 }
 0x5fe   :  { %7256 = vst [vmem:[#allocation51_spill] sm:$0xff] %v5928_v28 }
 0x5ff   :  { %7257 = vst [vmem:[#allocation55_spill] sm:$0xff] %v5933_v20 }
 0x600   :  { %7258 = vst [vmem:[#allocation56_spill] sm:$0xff] %v5935_v48  ;;  %v5951_v48 = vperm.slane %v1846_v33, 3 }
 0x602   :  { %7265 = vst [vmem:[#allocation64_spill] sm:$0xff] %v5951_v48  ;;  %v2085_v26 = vadd.f32 %v7267_v40, %v5951_v48 }
 0x604   :  { %v5945_v16 = vpop.f32.mrf.mxu2  ;;  %v5947_v28 = vpop.f32.mrf.mxu3 }
 0x605   :  { %7263 = vst [vmem:[#allocation62_spill] sm:$0xff] %v5945_v16  ;;  %v2221_v6 = vpop.f32.mrf.mxu0  ;;  %v2244_v24 = vpop.f32.mrf.mxu1  ;;  %v7268_v16 = vld [vmem:[#allocation25_spill] sm:$0xff] }
 0x606   :  { %7264 = vst [vmem:[#allocation63_spill] sm:$0xff] %v5947_v28  ;;  %v2296_v21 = vadd.f32 %v2221_v6, %v1890_v34  ;;  %v2297_v20 = vadd.f32 %v2244_v24, %v1955_v23  ;;  %v1893_v4 = vadd.f32 %v7268_v16, %v5937_v58  ;;  %v7269_v28 = vld [vmem:[#allocation27_spill] sm:$0xff] }
 0x607   :  { %v1958_v12 = vadd.f32 %v7269_v28, %v5939_v32  ;;  %v7270_v16 = vld [vmem:[#allocation31_spill] sm:$0xff]  ;;  %v7271_v32 = vld [vmem:[#allocation32_spill] sm:$0xff] }
 0x608   :  { %3614 = vtanh.f32 %v2296_v21  ;;  %v2023_v28 = vadd.f32 %v7270_v16, %v5949_v14 }
 0x609   :  { %3616 = vtanh.f32 %v2297_v20 }
 0x60c   :  { %v2267_v6 = vpop.f32.mrf.mxu2  ;;  %v2290_v24 = vpop.f32.mrf.mxu3 }
 0x60d   :  { %v2298_v34 = vadd.f32 %v2267_v6, %v2020_v54  ;;  %v2299_v23 = vadd.f32 %v2290_v24, %v2085_v26  ;;  %v2224_v33 = vpop.f32.mrf.mxu0  ;;  %v2247_v36 = vpop.f32.mrf.mxu1  ;;  %v2088_v54 = vadd.f32 %v7271_v32, %v5951_v48 }
 0x60e   :  { %v3615_v21 = vpop.eup %3614  ;;  %v2300_v20 = vadd.f32 %v2224_v33, %v1893_v4  ;;  %v2301_v27 = vadd.f32 %v2247_v36, %v1958_v12 }
 0x60f   :  { %v3617_v59 = vpop.eup %3616  ;;  %3618 = vtanh.f32 %v2298_v34  ;;  %v2312_v42 = vmul.f32 0.5, %v3615_v21 }
 0x610   :  { %v2316_v30 = vmul.f32 0.5, %v3617_v59  ;;  %3620 = vtanh.f32 %v2299_v23 }
 0x611   :  { %3622 = vtanh.f32 %v2300_v20  ;;  %v2314_v26 = vadd.f32 0.5, %v2312_v42 }
 0x612   :  { %v2318_v40 = vadd.f32 0.5, %v2316_v30  ;;  %3624 = vtanh.f32 %v2301_v27 }
 0x614   :  { %v2270_v6 = vpop.f32.mrf.mxu2  ;;  %v2293_v24 = vpop.f32.mrf.mxu3  ;;  %v2324_v34 = vmul.f32 0.0, %v2318_v40 }
 0x615   :  { %v3619_v58 = vpop.eup %3618  ;;  %v2302_v4 = vadd.f32 %v2270_v6, %v2023_v28  ;;  %v2303_v12 = vadd.f32 %v2293_v24, %v2088_v54 }
 0x616   :  { %v3621_v36 = vpop.eup %3620  ;;  %v2326_v33 = vmul.f32 %v3619_v58, %v2314_v26 }
 0x617   :  { %v3623_v59 = vpop.eup %3622  ;;  %3626 = vtanh.f32 %v2302_v4  ;;  %v2320_v32 = vmul.f32 0.5, %v3621_v36  ;;  %v5971_v4 = vld [vmem:[#allocation10 + $0x1e0] sm:$0xff]  ;;  %v5977_v36 = vld [vmem:[#allocation10 + $0x1f0] sm:$0xff] }
 0x618   :  { %v3625_v23 = vpop.eup %3624  ;;  %v5965_v30 = vadd.f32 %v2326_v33, %v2324_v34  ;;  %v2313_v27 = vmul.f32 0.5, %v3623_v59  ;;  %3628 = vtanh.f32 %v2303_v12  ;;  %v5974_v12 = vld [vmem:[#allocation10 + $0x1e8] sm:$0xff]  ;;  %v5983_v33 = vld [vmem:[#allocation10 + $0x1c0] sm:$0xff] }
 0x619   :  { %v2317_v21 = vmul.f32 0.5, %v3625_v23  ;;  %v2322_v6 = vadd.f32 0.5, %v2320_v32  ;;  %v5986_v59 = vld [vmem:[#allocation10 + $0x1c8] sm:$0xff] }
 0x61a   :  { %3630 = vtanh.f32 %v5965_v30  ;;  %v2315_v42 = vadd.f32 0.5, %v2313_v27  ;;  %v5989_v27 = vld [vmem:[#allocation10 + $0x1d0] sm:$0xff] }
 0x61b   :  { %v2319_v20 = vadd.f32 0.5, %v2317_v21  ;;  %v5992_v21 = vld [vmem:[#allocation10 + $0x1d8] sm:$0xff] }
 0x61d   :  { %v3627_v16 = vpop.eup %3626  ;;  %v2325_v48 = vmul.f32 0.0, %v2319_v20  ;;  %v5995_v20 = vld [vmem:[#allocation10 + $0x1a0] sm:$0xff] }
 0x61e   :  { %v2327_v28 = vmul.f32 %v3627_v16, %v2315_v42  ;;  %v3629_v54 = vpop.eup %3628  ;;  %v5999_v42 = vld [vmem:[#allocation10 + $0x1b0] sm:$0xff] }
 0x61f   :  { %v2321_v24 = vmul.f32 0.5, %v3629_v54  ;;  %v6005_v16 = vld [vmem:[#allocation10 + $0x190] sm:$0xff] }
 0x620   :  { %v3631_v40 = vpop.eup %3630  ;;  %v5968_v58 = vadd.f32 %v2327_v28, %v2325_v48  ;;  %v5980_v48 = vld [vmem:[#allocation10 + $0x1f8] sm:$0xff] }
 0x621   :  { %v2332_v26 = vmul.f32 %v3631_v40, %v2322_v6  ;;  %v2323_v34 = vadd.f32 0.5, %v2321_v24  ;;  %v7293_v40 = vld [vmem:[#allocation39_spill] sm:$0xff]  ;;  %v7294_v24 = vld [vmem:[#allocation41_spill] sm:$0xff] }
 0x622   :  { %3632 = vtanh.f32 %v5968_v58 }
 0x623   :  { %2358 = vmatmul.f32.vlgmr.msrb.gmra.mxu0 %v2332_v26  ;;  %2381 = vmatmul.f32.vlgmr.msra.gmra.mxu1 %v2332_v26 }
 0x624   :  { %2404 = vmatmul.f32.vlgmr.msra.gmra.mxu2 %v2332_v26  ;;  %2427 = vmatmul.f32.vlgmr.msra.gmra.mxu3 %v2332_v26  ;;  %v2029_v26 = vadd.f32 %v7293_v40, %v5949_v14  ;;  %v6140_v40 = vld [vmem:[#allocation10 + $0x138] sm:$0xff] }
 0x625   :  { %2618 = vmatpush.msrb.mxu0 %v5971_v4  ;;  %2641 = vmatpush.msra.mxu1 %v5974_v12 }
 0x626   :  { %2664 = vmatpush.msra.mxu2 %v5977_v36  ;;  %2687 = vmatpush.msra.mxu3 %v5980_v48 }
 0x627   :  { %2619 = vmatpush.msrb.mxu0 %v5983_v33  ;;  %2642 = vmatpush.msra.mxu1 %v5986_v59 }
 0x628   :  { %v3633_v23 = vpop.eup %3632  ;;  %2665 = vmatpush.msra.mxu2 %v5989_v27  ;;  %2688 = vmatpush.msra.mxu3 %v5992_v21 }
 0x629   :  { %v2333_v32 = vmul.f32 %v3633_v23, %v2323_v34  ;;  %2620 = vmatpush.msrb.mxu0 %v5995_v20  ;;  %2643 = vmatpush.msra.mxu1 %v5445_v63  ;;  %v7272_v63 = vld [vmem:[#allocation67_spill] sm:$0xff] }
 0x62a   :  { %2666 = vmatpush.msra.mxu2 %v5999_v42  ;;  %2689 = vmatpush.msra.mxu3 %v5453_v2  ;;  %v7273_v2 = vld [vmem:[#allocation68_spill] sm:$0xff] }
 0x62b   :  { %2361 = vmatmul.f32.gmra.mxu0 %v2333_v32  ;;  %2384 = vmatmul.f32.gmra.mxu1 %v2333_v32 }
 0x62c   :  { %2407 = vmatmul.f32.gmra.mxu2 %v2333_v32  ;;  %2430 = vmatmul.f32.gmra.mxu3 %v2333_v32 }
 0x62d   :  { %2621 = vmatpush.msrb.mxu0 %v5457_v29  ;;  %2644 = vmatpush.msra.mxu1 %v5461_v11  ;;  %v7274_v29 = vld [vmem:[#allocation65_spill] sm:$0xff]  ;;  %v7275_v11 = vld [vmem:[#allocation70_spill] sm:$0xff] }
 0x62e   :  { %2667 = vmatpush.msra.mxu2 %v6005_v16  ;;  %2690 = vmatpush.msra.mxu3 %v5469_v19  ;;  %v7276_v19 = vld [vmem:[#allocation71_spill] sm:$0xff] }
 0x62f   :  { %2622 = vmatpush.msrb.mxu0 %v5473_v39  ;;  %2645 = vmatpush.msra.mxu1 %v5477_v57  ;;  %v7278_v39 = vld [vmem:[#allocation69_spill] sm:$0xff]  ;;  %v7279_v57 = vld [vmem:[#allocation76_spill] sm:$0xff] }
 0x630   :  { %2668 = vmatpush.msra.mxu2 %v5471_v46  ;;  %2691 = vmatpush.msra.mxu3 %v5485_v44  ;;  %v7277_v46 = vld [vmem:[#allocation72_spill] sm:$0xff]  ;;  %v7280_v44 = vld [vmem:[#allocation74_spill] sm:$0xff] }
 0x631   :  { %2623 = vmatpush.msrb.mxu0 %v5489_v5  ;;  %2646 = vmatpush.msra.mxu1 %v5493_v25  ;;  %v7282_v5 = vld [vmem:[#allocation73_spill] sm:$0xff] }
 0x632   :  { %2669 = vmatpush.msra.mxu2 %v5487_v51  ;;  %2692 = vmatpush.msra.mxu3 %v5501_v3  ;;  %v7281_v51 = vld [vmem:[#allocation75_spill] sm:$0xff]  ;;  %v7283_v25 = vld [vmem:[#allocation21_spill] sm:$0xff]  ;;  %v7284_v3 = vld [vmem:[#allocation54_spill] sm:$0xff] }
 0x633   :  { %2624 = vmatpush.msrb.mxu0 %v5505_v41  ;;  %2647 = vmatpush.msra.mxu1 %v5509_v17  ;;  %v7286_v17 = vld [vmem:[#allocation57_spill] sm:$0xff] }
 0x634   :  { %2670 = vmatpush.msra.mxu2 %v5503_v60  ;;  %2693 = vmatpush.msra.mxu3 %v5517_v13  ;;  %v7285_v60 = vld [vmem:[#allocation28_spill] sm:$0xff]  ;;  %v7287_v13 = vld [vmem:[#allocation34_spill] sm:$0xff] }
 0x635   :  { %2625 = vmatpush.msrb.mxu0 %v5521_v10  ;;  %2648 = vmatpush.msra.mxu1 %v5525_v22  ;;  %v1896_v41 = vadd.f32 %v7285_v60, %v7284_v3 }
 0x636   :  { %2671 = vmatpush.msra.mxu2 %v5519_v18  ;;  %2694 = vmatpush.msra.mxu3 %v5533_v45  ;;  %v1961_v18 = vadd.f32 %v7287_v13, %v7286_v17 }
 0x637   :  { %2626 = vmatpush.msrb.mxu0 %v5537_v49  ;;  %2649 = vmatpush.msra.mxu1 %v5541_v50  ;;  %v7288_v49 = vld [vmem:[#allocation33_spill] sm:$0xff] }
 0x638   :  { %2672 = vmatpush.msra.mxu2 %v5535_v47  ;;  %2695 = vmatpush.msra.mxu3 %v5549_v53  ;;  %v2026_v50 = vadd.f32 %v7288_v49, %v5949_v14  ;;  %v7289_v53 = vld [vmem:[#allocation64_spill] sm:$0xff] }
 0x639   :  { %2627 = vmatpush.msrb.mxu0 %v5553_v62  ;;  %2650 = vmatpush.msra.mxu1 %v5557_v8  ;;  %v7290_v62 = vld [vmem:[#allocation35_spill] sm:$0xff]  ;;  %v2094_v34 = vadd.f32 %v7294_v24, %v7289_v53  ;;  %v6146_v24 = vld [vmem:[#allocation10 + $0x108] sm:$0xff] }
 0x63a   :  { %2673 = vmatpush.msra.mxu2 %v7180_v38  ;;  %2696 = vmatpush.msra.mxu3 %v7183_v61  ;;  %v2091_v8 = vadd.f32 %v7290_v62, %v7289_v53 }
 0x63b   :  { %2628 = vmatpush.msrb.mxu0 %v7184_v7  ;;  %2651 = vmatpush.msra.mxu1 %v7185_v55 }
 0x63c   :  { %2674 = vmatpush.msra.mxu2 %v7186_v0  ;;  %2697 = vmatpush.msra.mxu3 %v7187_v31 }
 0x63d   :  { %2629 = vmatpush.msrb.mxu0 %v7216_v35  ;;  %2652 = vmatpush.msra.mxu1 %v7217_v52 }
 0x63e   :  { %2675 = vmatpush.msra.mxu2 %v7218_v9  ;;  %2698 = vmatpush.msra.mxu3 %v7193_v37  ;;  %v7292_v37 = vld [vmem:[#allocation40_spill] sm:$0xff] }
 0x63f   :  { %2630 = vmatpush.msrb.mxu0 %v7194_v1  ;;  %2653 = vmatpush.msra.mxu1 %v7195_v15  ;;  %v1964_v31 = vadd.f32 %v7292_v37, %v7286_v17  ;;  %v6094_v37 = vld [vmem:[#allocation10 + $0x1b8] sm:$0xff] }
 0x640   :  { %2676 = vmatpush.msra.mxu2 %v7196_v43  ;;  %2699 = vmatpush.msra.mxu3 %v7197_v56  ;;  %v7291_v56 = vld [vmem:[#allocation29_spill] sm:$0xff] }
 0x641   :  { %2631 = vmatpush.msrb.mxu0 %v7272_v63  ;;  %2654 = vmatpush.msra.mxu1 %v7273_v2  ;;  %v1899_v1 = vadd.f32 %v7291_v56, %v7284_v3 }
 0x642   :  { %2677 = vmatpush.msra.mxu2 %v7274_v29  ;;  %2700 = vmatpush.msra.mxu3 %v7275_v11 }
 0x643   :  { %2632 = vmatpush.msrb.mxu0 %v7276_v19  ;;  %2655 = vmatpush.msra.mxu1 %v7277_v46 }
 0x644   :  { %2678 = vmatpush.msra.mxu2 %v7278_v39  ;;  %2701 = vmatpush.msra.mxu3 %v7279_v57 }
 0x645   :  { %2633 = vmatpush.msrb.mxu0 %v7280_v44  ;;  %2656 = vmatpush.msra.mxu1 %v7281_v51 }
 0x646   :  { %2679 = vmatpush.msra.mxu2 %v7282_v5  ;;  %2702 = vmatpush.msra.mxu3 %v7283_v25 }
 0x6a0   :  { %v2359_v10 = vpop.f32.mrf.mxu0  ;;  %v2382_v22 = vpop.f32.mrf.mxu1 }
 0x6a1   :  { %v2434_v45 = vadd.f32 %v2359_v10, %v1896_v41  ;;  %v2435_v47 = vadd.f32 %v2382_v22, %v1961_v18 }
 0x6a3   :  { %3634 = vtanh.f32 %v2434_v45 }
 0x6a4   :  { %3636 = vtanh.f32 %v2435_v47 }
 0x6a7   :  { %v2405_v38 = vpop.f32.mrf.mxu2  ;;  %v2428_v61 = vpop.f32.mrf.mxu3 }
 0x6a8   :  { %v2436_v7 = vadd.f32 %v2405_v38, %v2026_v50  ;;  %v2437_v55 = vadd.f32 %v2428_v61, %v2091_v8  ;;  %v2362_v0 = vpop.f32.mrf.mxu0  ;;  %v2385_v15 = vpop.f32.mrf.mxu1  ;;  %v6100_v38 = vld [vmem:[#allocation10 + $0x188] sm:$0xff]  ;;  %v6104_v61 = vld [vmem:[#allocation10 + $0x198] sm:$0xff] }
 0x6a9   :  { %v3635_v43 = vpop.eup %3634  ;;  %v2438_v35 = vadd.f32 %v2362_v0, %v1899_v1  ;;  %v2439_v52 = vadd.f32 %v2385_v15, %v1964_v31  ;;  %v6090_v1 = vld [vmem:[#allocation10 + $0x1a8] sm:$0xff]  ;;  %v6097_v31 = vld [vmem:[#allocation10 + $0x180] sm:$0xff]  ;;  %v6113_v0 = vld [vmem:[#allocation10 + $0x170] sm:$0xff] }
 0x6aa   :  { %v3637_v9 = vpop.eup %3636  ;;  %3638 = vtanh.f32 %v2436_v7  ;;  %v2450_v28 = vmul.f32 0.5, %v3635_v43  ;;  %v6107_v7 = vld [vmem:[#allocation10 + $0x160] sm:$0xff]  ;;  %v6116_v15 = vld [vmem:[#allocation10 + $0x178] sm:$0xff] }
 0x6ab   :  { %v2454_v54 = vmul.f32 0.5, %v3637_v9  ;;  %3640 = vtanh.f32 %v2437_v55  ;;  %v6110_v55 = vld [vmem:[#allocation10 + $0x168] sm:$0xff]  ;;  %v6119_v43 = vld [vmem:[#allocation10 + $0x140] sm:$0xff]  ;;  %v6128_v9 = vld [vmem:[#allocation10 + $0x158] sm:$0xff] }
 0x6ac   :  { %3642 = vtanh.f32 %v2438_v35  ;;  %v2452_v23 = vadd.f32 0.5, %v2450_v28  ;;  %v6122_v35 = vld [vmem:[#allocation10 + $0x148] sm:$0xff]  ;;  %v6131_v28 = vld [vmem:[#allocation10 + $0x120] sm:$0xff] }
 0x6ad   :  { %v2456_v6 = vadd.f32 0.5, %v2454_v54  ;;  %3644 = vtanh.f32 %v2439_v52  ;;  %v6125_v52 = vld [vmem:[#allocation10 + $0x150] sm:$0xff]  ;;  %v6134_v54 = vld [vmem:[#allocation10 + $0x128] sm:$0xff] }
 0x6af   :  { %v2408_v32 = vpop.f32.mrf.mxu2  ;;  %v2431_v63 = vpop.f32.mrf.mxu3  ;;  %v2462_v46 = vmul.f32 %v2456_v6, %v5965_v30  ;;  %v6137_v6 = vld [vmem:[#allocation10 + $0x130] sm:$0xff] }
 0x6b0   :  { %v3639_v2 = vpop.eup %3638  ;;  %v2440_v29 = vadd.f32 %v2408_v32, %v2029_v26  ;;  %v2441_v11 = vadd.f32 %v2431_v63, %v2094_v34  ;;  %v6143_v26 = vld [vmem:[#allocation10 + $0x100] sm:$0xff]  ;;  %v6149_v34 = vld [vmem:[#allocation10 + $0x110] sm:$0xff]  ;;  %v6158_v63 = vld [vmem:[#allocation10 + $0xe8] sm:$0xff] }
 0x6b1   :  { %v3641_v19 = vpop.eup %3640  ;;  %v2464_v39 = vmul.f32 %v3639_v2, %v2452_v23  ;;  %v6152_v23 = vld [vmem:[#allocation10 + $0x118] sm:$0xff]  ;;  %v6155_v32 = vld [vmem:[#allocation10 + $0xe0] sm:$0xff]  ;;  %v6161_v2 = vld [vmem:[#allocation10 + $0xf0] sm:$0xff] }
 0x6b2   :  { %v3643_v57 = vpop.eup %3642  ;;  %3646 = vtanh.f32 %v2440_v29  ;;  %v2458_v60 = vmul.f32 0.5, %v3641_v19  ;;  %v6164_v29 = vld [vmem:[#allocation10 + $0xf8] sm:$0xff]  ;;  %v6170_v19 = vld [vmem:[#allocation10 + $0xc8] sm:$0xff] }
 0x6b3   :  { %v3645_v44 = vpop.eup %3644  ;;  %v6074_v51 = vadd.f32 %v2464_v39, %v2462_v46  ;;  %v2451_v5 = vmul.f32 0.5, %v3643_v57  ;;  %3648 = vtanh.f32 %v2441_v11  ;;  %v6167_v11 = vld [vmem:[#allocation10 + $0xc0] sm:$0xff]  ;;  %v6173_v46 = vld [vmem:[#allocation10 + $0xd0] sm:$0xff]  ;;  %v6176_v39 = vld [vmem:[#allocation10 + $0xd8] sm:$0xff] }
 0x6b4   :  { %v2455_v25 = vmul.f32 0.5, %v3645_v44  ;;  %v2460_v30 = vadd.f32 0.5, %v2458_v60  ;;  %7295 = vst [vmem:[#allocation61_spill] sm:$0xff] %v6176_v39  ;;  %v6179_v57 = vld [vmem:[#allocation10 + $0xa0] sm:$0xff]  ;;  %v6182_v44 = vld [vmem:[#allocation10 + $0xa8] sm:$0xff] }
 0x6b5   :  { %3650 = vtanh.f32 %v6074_v51  ;;  %v2453_v13 = vadd.f32 0.5, %v2451_v5  ;;  %7296 = vst [vmem:[#allocation66_spill] sm:$0xff] %v6179_v57  ;;  %v6185_v5 = vld [vmem:[#allocation10 + $0xb0] sm:$0xff]  ;;  %v6191_v60 = vld [vmem:[#allocation10 + $0x80] sm:$0xff] }
 0x6b6   :  { %v2457_v41 = vadd.f32 0.5, %v2455_v25  ;;  %7297 = vst [vmem:[#allocation59_spill] sm:$0xff] %v6182_v44  ;;  %v6188_v25 = vld [vmem:[#allocation10 + $0xb8] sm:$0xff] }
 0x6b7   :  { %7298 = vst [vmem:[#allocation60_spill] sm:$0xff] %v6185_v5 }
 0x6b8   :  { %v3647_v18 = vpop.eup %3646  ;;  %v2463_v10 = vmul.f32 %v2457_v41, %v5968_v58  ;;  %7299 = vst [vmem:[#allocation58_spill] sm:$0xff] %v6188_v25  ;;  %v6194_v41 = vld [vmem:[#allocation10 + $0x88] sm:$0xff] }
 0x6b9   :  { %v2465_v22 = vmul.f32 %v3647_v18, %v2453_v13  ;;  %v3649_v45 = vpop.eup %3648  ;;  %7300 = vst [vmem:[#allocation19_spill] sm:$0xff] %v6191_v60  ;;  %v6197_v13 = vld [vmem:[#allocation10 + $0x90] sm:$0xff]  ;;  %v6200_v18 = vld [vmem:[#allocation10 + $0x98] sm:$0xff] }
 0x6ba   :  { %v2459_v62 = vmul.f32 0.5, %v3649_v45  ;;  %7301 = vst [vmem:[#allocation22_spill] sm:$0xff] %v6194_v41  ;;  %v6209_v45 = vld [vmem:[#allocation10 + $0x70] sm:$0xff] }
 0x6bb   :  { %v3651_v47 = vpop.eup %3650  ;;  %v6078_v49 = vadd.f32 %v2465_v22, %v2463_v10  ;;  %7302 = vst [vmem:[#allocation23_spill] sm:$0xff] %v6197_v13  ;;  %v6203_v10 = vld [vmem:[#allocation10 + $0x60] sm:$0xff]  ;;  %v6206_v22 = vld [vmem:[#allocation10 + $0x68] sm:$0xff] }
 0x6bc   :  { %v2470_v50 = vmul.f32 %v3651_v47, %v2460_v30  ;;  %v2461_v58 = vadd.f32 0.5, %v2459_v62  ;;  %7303 = vst [vmem:[#allocation24_spill] sm:$0xff] %v6200_v18  ;;  %v6212_v30 = vld [vmem:[#allocation10 + $0x78] sm:$0xff]  ;;  %v6215_v47 = vld [vmem:[#allocation10 + $0x40] sm:$0xff]  ;;  %v6221_v62 = vld [vmem:[#allocation10 + $0x50] sm:$0xff] }
 0x6bd   :  { %3652 = vtanh.f32 %v6078_v49  ;;  %7304 = vst [vmem:[#allocation25_spill] sm:$0xff] %v6203_v10 }
 0x6be   :  { %2496 = vmatmul.f32.vlgmr.msra.gmra.mxu0 %v2470_v50  ;;  %2519 = vmatmul.f32.vlgmr.msrb.gmra.mxu1 %v2470_v50  ;;  %7305 = vst [vmem:[#allocation27_spill] sm:$0xff] %v6206_v22 }
 0x6bf   :  { %2542 = vmatmul.f32.vlgmr.msrb.gmra.mxu2 %v2470_v50  ;;  %2565 = vmatmul.f32.vlgmr.msrb.gmra.mxu3 %v2470_v50  ;;  %7306 = vst [vmem:[#allocation31_spill] sm:$0xff] %v6209_v45  ;;  %v6218_v50 = vld [vmem:[#allocation10 + $0x48] sm:$0xff] }
 0x6c0   :  { %2756 = vmatpush.msra.mxu0 %v5971_v4  ;;  %2779 = vmatpush.msrb.mxu1 %v5974_v12  ;;  %7307 = vst [vmem:[#allocation32_spill] sm:$0xff] %v6212_v30 }
 0x6c1   :  { %2802 = vmatpush.msrb.mxu2 %v5977_v36  ;;  %2825 = vmatpush.msrb.mxu3 %v5980_v48  ;;  %7308 = vst [vmem:[#allocation67_spill] sm:$0xff] %v6215_v47 }
 0x6c2   :  { %2757 = vmatpush.msra.mxu0 %v5983_v33  ;;  %2780 = vmatpush.msrb.mxu1 %v5986_v59  ;;  %7309 = vst [vmem:[#allocation68_spill] sm:$0xff] %v6218_v50 }
 0x6c3   :  { %v3653_v8 = vpop.eup %3652  ;;  %2803 = vmatpush.msrb.mxu2 %v5989_v27  ;;  %2826 = vmatpush.msrb.mxu3 %v5992_v21  ;;  %7310 = vst [vmem:[#allocation65_spill] sm:$0xff] %v6221_v62 }
 0x6c4   :  { %v2471_v56 = vmul.f32 %v3653_v8, %v2461_v58  ;;  %2758 = vmatpush.msra.mxu0 %v5995_v20  ;;  %2781 = vmatpush.msrb.mxu1 %v6090_v1  ;;  %v6224_v58 = vld [vmem:[#allocation10 + $0x58] sm:$0xff]  ;;  %v6227_v8 = vld [vmem:[#allocation10 + $0x20] sm:$0xff] }
 0x6c5   :  { %2804 = vmatpush.msrb.mxu2 %v5999_v42  ;;  %2827 = vmatpush.msrb.mxu3 %v6094_v37  ;;  %7311 = vst [vmem:[#allocation70_spill] sm:$0xff] %v6224_v58 }
 0x6c6   :  { %2499 = vmatmul.f32.gmra.mxu0 %v2471_v56  ;;  %2522 = vmatmul.f32.gmra.mxu1 %v2471_v56  ;;  %7312 = vst [vmem:[#allocation71_spill] sm:$0xff] %v6227_v8 }
 0x6c7   :  { %2545 = vmatmul.f32.gmra.mxu2 %v2471_v56  ;;  %2568 = vmatmul.f32.gmra.mxu3 %v2471_v56  ;;  %v6230_v56 = vld [vmem:[#allocation10 + $0x28] sm:$0xff] }
 0x6c8   :  { %2759 = vmatpush.msra.mxu0 %v6097_v31  ;;  %2782 = vmatpush.msrb.mxu1 %v6100_v38  ;;  %7313 = vst [vmem:[#allocation72_spill] sm:$0xff] %v6230_v56 }
 0x6c9   :  { %2805 = vmatpush.msrb.mxu2 %v6005_v16  ;;  %2828 = vmatpush.msrb.mxu3 %v6104_v61 }
 0x6ca   :  { %2760 = vmatpush.msra.mxu0 %v6107_v7  ;;  %2783 = vmatpush.msrb.mxu1 %v6110_v55 }
 0x6cb   :  { %2806 = vmatpush.msrb.mxu2 %v6113_v0  ;;  %2829 = vmatpush.msrb.mxu3 %v6116_v15 }
 0x6cc   :  { %2761 = vmatpush.msra.mxu0 %v6119_v43  ;;  %2784 = vmatpush.msrb.mxu1 %v6122_v35 }
 0x6cd   :  { %2807 = vmatpush.msrb.mxu2 %v6125_v52  ;;  %2830 = vmatpush.msrb.mxu3 %v6128_v9 }
 0x6ce   :  { %2762 = vmatpush.msra.mxu0 %v6131_v28  ;;  %2785 = vmatpush.msrb.mxu1 %v6134_v54 }
 0x6cf   :  { %2808 = vmatpush.msrb.mxu2 %v6137_v6  ;;  %2831 = vmatpush.msrb.mxu3 %v6140_v40 }
 0x6d0   :  { %2763 = vmatpush.msra.mxu0 %v6143_v26  ;;  %2786 = vmatpush.msrb.mxu1 %v6146_v24 }
 0x6d1   :  { %2809 = vmatpush.msrb.mxu2 %v6149_v34  ;;  %2832 = vmatpush.msrb.mxu3 %v6152_v23 }
 0x6d2   :  { %2764 = vmatpush.msra.mxu0 %v6155_v32  ;;  %2787 = vmatpush.msrb.mxu1 %v6158_v63 }
 0x6d3   :  { %2810 = vmatpush.msrb.mxu2 %v6161_v2  ;;  %2833 = vmatpush.msrb.mxu3 %v6164_v29 }
 0x6d4   :  { %2765 = vmatpush.msra.mxu0 %v6167_v11  ;;  %2788 = vmatpush.msrb.mxu1 %v6170_v19 }
 0x6d5   :  { %2811 = vmatpush.msrb.mxu2 %v6173_v46  ;;  %2834 = vmatpush.msrb.mxu3 %v6176_v39 }
 0x6d6   :  { %2766 = vmatpush.msra.mxu0 %v6179_v57  ;;  %2789 = vmatpush.msrb.mxu1 %v6182_v44 }
 0x6d7   :  { %2812 = vmatpush.msrb.mxu2 %v6185_v5  ;;  %2835 = vmatpush.msrb.mxu3 %v6188_v25 }
 0x6d8   :  { %2767 = vmatpush.msra.mxu0 %v6191_v60  ;;  %2790 = vmatpush.msrb.mxu1 %v6194_v41 }
 0x6d9   :  { %2813 = vmatpush.msrb.mxu2 %v6197_v13  ;;  %2836 = vmatpush.msrb.mxu3 %v6200_v18 }
 0x6da   :  { %2768 = vmatpush.msra.mxu0 %v6203_v10  ;;  %2791 = vmatpush.msrb.mxu1 %v6206_v22 }
 0x6db   :  { %2814 = vmatpush.msrb.mxu2 %v6209_v45  ;;  %2837 = vmatpush.msrb.mxu3 %v6212_v30 }
 0x6dc   :  { %2769 = vmatpush.msra.mxu0 %v6215_v47  ;;  %2792 = vmatpush.msrb.mxu1 %v6218_v50  ;;  %v6233_v47 = vld [vmem:[#allocation10 + $0x30] sm:$0xff]  ;;  %v6236_v50 = vld [vmem:[#allocation10 + $0x38] sm:$0xff] }
 0x6dd   :  { %2815 = vmatpush.msrb.mxu2 %v6221_v62  ;;  %2838 = vmatpush.msrb.mxu3 %v6224_v58  ;;  %7314 = vst [vmem:[#allocation69_spill] sm:$0xff] %v6233_v47  ;;  %v6239_v62 = vld [vmem:[#allocation10] sm:$0xff]  ;;  %v6242_v58 = vld [vmem:[#allocation10 + $0x8] sm:$0xff] }
 0x6de   :  { %2770 = vmatpush.msra.mxu0 %v6227_v8  ;;  %2793 = vmatpush.msrb.mxu1 %v6230_v56  ;;  %7315 = vst [vmem:[#allocation76_spill] sm:$0xff] %v6236_v50  ;;  %v6245_v8 = vld [vmem:[#allocation10 + $0x10] sm:$0xff]  ;;  %v6248_v56 = vld [vmem:[#allocation10 + $0x18] sm:$0xff] }
 0x6df   :  { %2816 = vmatpush.msrb.mxu2 %v6233_v47  ;;  %2839 = vmatpush.msrb.mxu3 %v6236_v50  ;;  %7316 = vst [vmem:[#allocation74_spill] sm:$0xff] %v6239_v62  ;;  %v7320_v47 = vld [vmem:[#allocation37_spill] sm:$0xff]  ;;  %v7321_v50 = vld [vmem:[#allocation46_spill] sm:$0xff] }
 0x6e0   :  { %2771 = vmatpush.msra.mxu0 %v6239_v62  ;;  %7317 = vst [vmem:[#allocation75_spill] sm:$0xff] %v6242_v58  ;;  %2794 = vmatpush.msrb.mxu1 %v6242_v58  ;;  %v1902_v30 = vadd.f32 %v7320_v47, %v7284_v3  ;;  %v1967_v45 = vadd.f32 %v7321_v50, %v7286_v17  ;;  %v7322_v58 = vld [vmem:[#allocation26_spill] sm:$0xff]  ;;  %v7325_v47 = vld [vmem:[#allocation45_spill] sm:$0xff] }
 0x6e1   :  { %7318 = vst [vmem:[#allocation73_spill] sm:$0xff] %v6245_v8  ;;  %2817 = vmatpush.msrb.mxu2 %v6245_v8  ;;  %2840 = vmatpush.msrb.mxu3 %v6248_v56  ;;  %v2032_v13 = vadd.f32 %v7322_v58, %v5949_v14  ;;  %v7323_v8 = vld [vmem:[#allocation48_spill] sm:$0xff]  ;;  %v1970_v25 = vadd.f32 %v7325_v47, %v7286_v17  ;;  %v7327_v17 = vld [vmem:[#allocation47_spill] sm:$0xff] }
 0x6e2   :  { %7319 = vst [vmem:[#allocation21_spill] sm:$0xff] %v6248_v56  ;;  %v2097_v41 = vadd.f32 %v7323_v8, %v7289_v53  ;;  %v7324_v56 = vld [vmem:[#allocation36_spill] sm:$0xff] }
 0x6e3   :  { %v1905_v60 = vadd.f32 %v7324_v56, %v7284_v3  ;;  %v7326_v56 = vld [vmem:[#allocation49_spill] sm:$0xff] }
 0x6e4   :  { %v2035_v47 = vadd.f32 %v7326_v56, %v5949_v14 }
 0x73b   :  { %v2497_v22 = vpop.f32.mrf.mxu0  ;;  %v2520_v62 = vpop.f32.mrf.mxu1 }
 0x73c   :  { %v2572_v10 = vadd.f32 %v2497_v22, %v1902_v30  ;;  %v2573_v18 = vadd.f32 %v2520_v62, %v1967_v45 }
 0x73e   :  { %3654 = vtanh.f32 %v2572_v10 }
 0x73f   :  { %3656 = vtanh.f32 %v2573_v18 }
 0x742   :  { %v2543_v5 = vpop.f32.mrf.mxu2  ;;  %v2566_v50 = vpop.f32.mrf.mxu3 }
 0x743   :  { %v2574_v44 = vadd.f32 %v2543_v5, %v2032_v13  ;;  %v2575_v57 = vadd.f32 %v2566_v50, %v2097_v41  ;;  %v2500_v22 = vpop.f32.mrf.mxu0  ;;  %v2523_v45 = vpop.f32.mrf.mxu1  ;;  %v2100_v5 = vadd.f32 %v7327_v17, %v7289_v53 }
 0x744   :  { %v3655_v10 = vpop.eup %3654  ;;  %v2576_v18 = vadd.f32 %v2500_v22, %v1905_v60  ;;  %v2577_v30 = vadd.f32 %v2523_v45, %v1970_v25 }
 0x745   :  { %v3657_v62 = vpop.eup %3656  ;;  %3658 = vtanh.f32 %v2574_v44  ;;  %v2588_v58 = vmul.f32 0.5, %v3655_v10 }
 0x746   :  { %v2592_v39 = vmul.f32 0.5, %v3657_v62  ;;  %3660 = vtanh.f32 %v2575_v57 }
 0x747   :  { %3662 = vtanh.f32 %v2576_v18  ;;  %v2590_v41 = vadd.f32 0.5, %v2588_v58 }
 0x748   :  { %v2594_v8 = vadd.f32 0.5, %v2592_v39  ;;  %3664 = vtanh.f32 %v2577_v30 }
 0x74a   :  { %v2546_v13 = vpop.f32.mrf.mxu2  ;;  %v2569_v50 = vpop.f32.mrf.mxu3  ;;  %v2600_v44 = vmul.f32 %v2594_v8, %v6074_v51 }
 0x74b   :  { %v3659_v3 = vpop.eup %3658  ;;  %v2578_v60 = vadd.f32 %v2546_v13, %v2035_v47  ;;  %v2579_v25 = vadd.f32 %v2569_v50, %v2100_v5 }
 0x74c   :  { %v3661_v22 = vpop.eup %3660  ;;  %v2602_v45 = vmul.f32 %v3659_v3, %v2590_v41 }
 0x74d   :  { %v3663_v57 = vpop.eup %3662  ;;  %3666 = vtanh.f32 %v2578_v60  ;;  %v2596_v17 = vmul.f32 0.5, %v3661_v22  ;;  %v7328_v22 = vld [vmem:[#allocation61_spill] sm:$0xff] }
 0x74e   :  { %v3665_v39 = vpop.eup %3664  ;;  %v6268_v10 = vadd.f32 %v2602_v45, %v2600_v44  ;;  %v2589_v18 = vmul.f32 0.5, %v3663_v57  ;;  %3668 = vtanh.f32 %v2579_v25  ;;  %v7329_v44 = vld [vmem:[#allocation66_spill] sm:$0xff]  ;;  %v7330_v45 = vld [vmem:[#allocation59_spill] sm:$0xff]  ;;  %v7331_v57 = vld [vmem:[#allocation60_spill] sm:$0xff] }
 0x74f   :  { %v2593_v30 = vmul.f32 0.5, %v3665_v39  ;;  %v2598_v51 = vadd.f32 0.5, %v2596_v17  ;;  %v7332_v39 = vld [vmem:[#allocation58_spill] sm:$0xff]  ;;  %v7335_v17 = vld [vmem:[#allocation23_spill] sm:$0xff] }
 0x750   :  { %3670 = vtanh.f32 %v6268_v10  ;;  %v2591_v58 = vadd.f32 0.5, %v2589_v18  ;;  %v7333_v18 = vld [vmem:[#allocation19_spill] sm:$0xff] }
 0x751   :  { %v2595_v62 = vadd.f32 0.5, %v2593_v30  ;;  %v7334_v30 = vld [vmem:[#allocation22_spill] sm:$0xff] }
 0x753   :  { %v3667_v56 = vpop.eup %3666  ;;  %v2601_v47 = vmul.f32 %v2595_v62, %v6078_v49  ;;  %v7336_v62 = vld [vmem:[#allocation24_spill] sm:$0xff] }
 0x754   :  { %v2603_v5 = vmul.f32 %v3667_v56, %v2591_v58  ;;  %v3669_v13 = vpop.eup %3668  ;;  %v7337_v58 = vld [vmem:[#allocation25_spill] sm:$0xff]  ;;  %v7338_v56 = vld [vmem:[#allocation27_spill] sm:$0xff] }
 0x755   :  { %v2597_v50 = vmul.f32 0.5, %v3669_v13  ;;  %v7341_v13 = vld [vmem:[#allocation67_spill] sm:$0xff] }
 0x756   :  { %v3671_v3 = vpop.eup %3670  ;;  %v6272_v8 = vadd.f32 %v2603_v5, %v2601_v47  ;;  %v7339_v47 = vld [vmem:[#allocation31_spill] sm:$0xff]  ;;  %v7340_v5 = vld [vmem:[#allocation32_spill] sm:$0xff] }
 0x757   :  { %v2608_v41 = vmul.f32 %v3671_v3, %v2598_v51  ;;  %v2599_v49 = vadd.f32 0.5, %v2597_v50  ;;  %v7342_v51 = vld [vmem:[#allocation68_spill] sm:$0xff]  ;;  %v7343_v3 = vld [vmem:[#allocation65_spill] sm:$0xff]  ;;  %v7345_v50 = vld [vmem:[#allocation71_spill] sm:$0xff] }
 0x758   :  { %3672 = vtanh.f32 %v6272_v8 }
 0x759   :  { %2634 = vmatmul.f32.vlgmr.msrb.gmra.mxu0 %v2608_v41  ;;  %2657 = vmatmul.f32.vlgmr.msra.gmra.mxu1 %v2608_v41 }
 0x75a   :  { %2680 = vmatmul.f32.vlgmr.msra.gmra.mxu2 %v2608_v41  ;;  %2703 = vmatmul.f32.vlgmr.msra.gmra.mxu3 %v2608_v41  ;;  %v7344_v41 = vld [vmem:[#allocation70_spill] sm:$0xff] }
 0x75b   :  { %2894 = vmatpush.msrb.mxu0 %v5971_v4  ;;  %2917 = vmatpush.msra.mxu1 %v5974_v12 }
 0x75c   :  { %2940 = vmatpush.msra.mxu2 %v5977_v36  ;;  %2963 = vmatpush.msra.mxu3 %v5980_v48 }
 0x75d   :  { %2895 = vmatpush.msrb.mxu0 %v5983_v33  ;;  %2918 = vmatpush.msra.mxu1 %v5986_v59 }
 0x75e   :  { %v3673_v60 = vpop.eup %3672  ;;  %2941 = vmatpush.msra.mxu2 %v5989_v27  ;;  %2964 = vmatpush.msra.mxu3 %v5992_v21 }
 0x75f   :  { %v2609_v25 = vmul.f32 %v3673_v60, %v2599_v49  ;;  %2896 = vmatpush.msrb.mxu0 %v5995_v20  ;;  %2919 = vmatpush.msra.mxu1 %v6090_v1  ;;  %v7346_v49 = vld [vmem:[#allocation72_spill] sm:$0xff]  ;;  %v7347_v60 = vld [vmem:[#allocation69_spill] sm:$0xff] }
 0x760   :  { %2942 = vmatpush.msra.mxu2 %v5999_v42  ;;  %2965 = vmatpush.msra.mxu3 %v6094_v37 }
 0x761   :  { %2637 = vmatmul.f32.gmra.mxu0 %v2609_v25  ;;  %2660 = vmatmul.f32.gmra.mxu1 %v2609_v25 }
 0x762   :  { %2683 = vmatmul.f32.gmra.mxu2 %v2609_v25  ;;  %2706 = vmatmul.f32.gmra.mxu3 %v2609_v25  ;;  %v7348_v25 = vld [vmem:[#allocation76_spill] sm:$0xff] }
 0x763   :  { %2897 = vmatpush.msrb.mxu0 %v6097_v31  ;;  %2920 = vmatpush.msra.mxu1 %v6100_v38 }
 0x764   :  { %2943 = vmatpush.msra.mxu2 %v6005_v16  ;;  %2966 = vmatpush.msra.mxu3 %v6104_v61 }
 0x765   :  { %2898 = vmatpush.msrb.mxu0 %v6107_v7  ;;  %2921 = vmatpush.msra.mxu1 %v6110_v55 }
 0x766   :  { %2944 = vmatpush.msra.mxu2 %v6113_v0  ;;  %2967 = vmatpush.msra.mxu3 %v6116_v15 }
 0x767   :  { %2899 = vmatpush.msrb.mxu0 %v6119_v43  ;;  %2922 = vmatpush.msra.mxu1 %v6122_v35 }
 0x768   :  { %2945 = vmatpush.msra.mxu2 %v6125_v52  ;;  %2968 = vmatpush.msra.mxu3 %v6128_v9 }
 0x769   :  { %2900 = vmatpush.msrb.mxu0 %v6131_v28  ;;  %2923 = vmatpush.msra.mxu1 %v6134_v54 }
 0x76a   :  { %2946 = vmatpush.msra.mxu2 %v6137_v6  ;;  %2969 = vmatpush.msra.mxu3 %v6140_v40 }
 0x76b   :  { %2901 = vmatpush.msrb.mxu0 %v6143_v26  ;;  %2924 = vmatpush.msra.mxu1 %v6146_v24 }
 0x76c   :  { %2947 = vmatpush.msra.mxu2 %v6149_v34  ;;  %2970 = vmatpush.msra.mxu3 %v6152_v23 }
 0x76d   :  { %2902 = vmatpush.msrb.mxu0 %v6155_v32  ;;  %2925 = vmatpush.msra.mxu1 %v6158_v63 }
 0x76e   :  { %2948 = vmatpush.msra.mxu2 %v6161_v2  ;;  %2971 = vmatpush.msra.mxu3 %v6164_v29 }
 0x76f   :  { %2903 = vmatpush.msrb.mxu0 %v6167_v11  ;;  %2926 = vmatpush.msra.mxu1 %v6170_v19 }
 0x770   :  { %2949 = vmatpush.msra.mxu2 %v6173_v46  ;;  %2972 = vmatpush.msra.mxu3 %v7328_v22 }
 0x771   :  { %2904 = vmatpush.msrb.mxu0 %v7329_v44  ;;  %2927 = vmatpush.msra.mxu1 %v7330_v45 }
 0x772   :  { %2950 = vmatpush.msra.mxu2 %v7331_v57  ;;  %2973 = vmatpush.msra.mxu3 %v7332_v39 }
 0x773   :  { %2905 = vmatpush.msrb.mxu0 %v7333_v18  ;;  %2928 = vmatpush.msra.mxu1 %v7334_v30 }
 0x774   :  { %2951 = vmatpush.msra.mxu2 %v7335_v17  ;;  %2974 = vmatpush.msra.mxu3 %v7336_v62  ;;  %v7356_v62 = vld [vmem:[#allocation81_spill] sm:$0xff] }
 0x775   :  { %2906 = vmatpush.msrb.mxu0 %v7337_v58  ;;  %2929 = vmatpush.msra.mxu1 %v7338_v56  ;;  %v7349_v56 = vld [vmem:[#allocation74_spill] sm:$0xff] }
 0x776   :  { %2952 = vmatpush.msra.mxu2 %v7339_v47  ;;  %2975 = vmatpush.msra.mxu3 %v7340_v5  ;;  %v7350_v47 = vld [vmem:[#allocation75_spill] sm:$0xff]  ;;  %v7351_v5 = vld [vmem:[#allocation73_spill] sm:$0xff] }
 0x777   :  { %2907 = vmatpush.msrb.mxu0 %v7341_v13  ;;  %2930 = vmatpush.msra.mxu1 %v7342_v51  ;;  %v7352_v13 = vld [vmem:[#allocation21_spill] sm:$0xff]  ;;  %v7353_v51 = vld [vmem:[#allocation54_spill] sm:$0xff] }
 0x778   :  { %2953 = vmatpush.msra.mxu2 %v7343_v3  ;;  %2976 = vmatpush.msra.mxu3 %v7344_v41  ;;  %v7354_v3 = vld [vmem:[#allocation96_spill] sm:$0xff]  ;;  %v7355_v41 = vld [vmem:[#allocation57_spill] sm:$0xff] }
 0x779   :  { %2908 = vmatpush.msrb.mxu0 %v7345_v50  ;;  %2931 = vmatpush.msra.mxu1 %v7346_v49  ;;  %v1908_v58 = vadd.f32 %v7354_v3, %v7353_v51  ;;  %v1973_v50 = vadd.f32 %v7356_v62, %v7355_v41  ;;  %v7360_v3 = vld [vmem:[#allocation79_spill] sm:$0xff] }
 0x77a   :  { %2954 = vmatpush.msra.mxu2 %v7347_v60  ;;  %2977 = vmatpush.msra.mxu3 %v7348_v25  ;;  %v1976_v39 = vadd.f32 %v7360_v3, %v7355_v41  ;;  %v7362_v41 = vld [vmem:[#allocation80_spill] sm:$0xff] }
 0x77b   :  { %2909 = vmatpush.msrb.mxu0 %v7349_v56  ;;  %2932 = vmatpush.msra.mxu1 %v7350_v47  ;;  %v7357_v56 = vld [vmem:[#allocation97_spill] sm:$0xff] }
 0x77c   :  { %2955 = vmatpush.msra.mxu2 %v7351_v5  ;;  %2978 = vmatpush.msra.mxu3 %v7352_v13  ;;  %v2038_v25 = vadd.f32 %v7357_v56, %v5949_v14  ;;  %v7358_v47 = vld [vmem:[#allocation77_spill] sm:$0xff]  ;;  %v7359_v13 = vld [vmem:[#allocation78_spill] sm:$0xff] }
 0x77d   :  { %v2103_v5 = vadd.f32 %v7358_v47, %v7289_v53  ;;  %v1911_v18 = vadd.f32 %v7359_v13, %v7353_v51  ;;  %v7361_v13 = vld [vmem:[#allocation85_spill] sm:$0xff] }
 0x77e   :  { %v2041_v3 = vadd.f32 %v7361_v13, %v5949_v14 }
 0x7d6   :  { %v2635_v17 = vpop.f32.mrf.mxu0  ;;  %v2658_v49 = vpop.f32.mrf.mxu1 }
 0x7d7   :  { %v2710_v30 = vadd.f32 %v2635_v17, %v1908_v58  ;;  %v2711_v60 = vadd.f32 %v2658_v49, %v1973_v50 }
 0x7d9   :  { %3674 = vtanh.f32 %v2710_v30 }
 0x7da   :  { %3676 = vtanh.f32 %v2711_v60 }
 0x7dd   :  { %v2681_v57 = vpop.f32.mrf.mxu2  ;;  %v2704_v62 = vpop.f32.mrf.mxu3 }
 0x7de   :  { %v2712_v45 = vadd.f32 %v2681_v57, %v2038_v25  ;;  %v2713_v44 = vadd.f32 %v2704_v62, %v2103_v5  ;;  %v2638_v17 = vpop.f32.mrf.mxu0  ;;  %v2661_v58 = vpop.f32.mrf.mxu1  ;;  %v2106_v57 = vadd.f32 %v7362_v41, %v7289_v53 }
 0x7df   :  { %v3675_v30 = vpop.eup %3674  ;;  %v2714_v50 = vadd.f32 %v2638_v17, %v1911_v18  ;;  %v2715_v49 = vadd.f32 %v2661_v58, %v1976_v39 }
 0x7e0   :  { %v3677_v60 = vpop.eup %3676  ;;  %3678 = vtanh.f32 %v2712_v45  ;;  %v2726_v56 = vmul.f32 0.5, %v3675_v30 }
 0x7e1   :  { %v2730_v22 = vmul.f32 0.5, %v3677_v60  ;;  %3680 = vtanh.f32 %v2713_v44 }
 0x7e2   :  { %3682 = vtanh.f32 %v2714_v50  ;;  %v2728_v5 = vadd.f32 0.5, %v2726_v56 }
 0x7e3   :  { %v2732_v47 = vadd.f32 0.5, %v2730_v22  ;;  %3684 = vtanh.f32 %v2715_v49 }
 0x7e5   :  { %v2684_v25 = vpop.f32.mrf.mxu2  ;;  %v2707_v62 = vpop.f32.mrf.mxu3  ;;  %v2738_v45 = vmul.f32 %v2732_v47, %v6268_v10 }
 0x7e6   :  { %v3679_v51 = vpop.eup %3678  ;;  %v2716_v18 = vadd.f32 %v2684_v25, %v2041_v3  ;;  %v2717_v39 = vadd.f32 %v2707_v62, %v2106_v57 }
 0x7e7   :  { %v3681_v17 = vpop.eup %3680  ;;  %v2740_v58 = vmul.f32 %v3679_v51, %v2728_v5 }
 0x7e8   :  { %v3683_v44 = vpop.eup %3682  ;;  %3686 = vtanh.f32 %v2716_v18  ;;  %v2734_v41 = vmul.f32 0.5, %v3681_v17  ;;  %v7374_v17 = vld [vmem:[#allocation31_spill] sm:$0xff] }
 0x7e9   :  { %v3685_v22 = vpop.eup %3684  ;;  %v6356_v30 = vadd.f32 %v2740_v58, %v2738_v45  ;;  %v2727_v50 = vmul.f32 0.5, %v3683_v44  ;;  %3688 = vtanh.f32 %v2717_v39  ;;  %v7375_v45 = vld [vmem:[#allocation32_spill] sm:$0xff]  ;;  %v7376_v58 = vld [vmem:[#allocation67_spill] sm:$0xff] }
 0x7ea   :  { %v2731_v49 = vmul.f32 0.5, %v3685_v22  ;;  %v2736_v10 = vadd.f32 0.5, %v2734_v41  ;;  %v7377_v44 = vld [vmem:[#allocation68_spill] sm:$0xff]  ;;  %v7378_v22 = vld [vmem:[#allocation65_spill] sm:$0xff] }
 0x7eb   :  { %3690 = vtanh.f32 %v6356_v30  ;;  %v2729_v56 = vadd.f32 0.5, %v2727_v50  ;;  %v7379_v50 = vld [vmem:[#allocation70_spill] sm:$0xff]  ;;  %v7381_v41 = vld [vmem:[#allocation72_spill] sm:$0xff] }
 0x7ec   :  { %v2733_v60 = vadd.f32 0.5, %v2731_v49  ;;  %v7380_v49 = vld [vmem:[#allocation71_spill] sm:$0xff] }
 0x7ee   :  { %v3687_v13 = vpop.eup %3686  ;;  %v2739_v3 = vmul.f32 %v2733_v60, %v6272_v8  ;;  %v7382_v60 = vld [vmem:[#allocation69_spill] sm:$0xff] }
 0x7ef   :  { %v2741_v57 = vmul.f32 %v3687_v13, %v2729_v56  ;;  %v3689_v25 = vpop.eup %3688  ;;  %v7383_v56 = vld [vmem:[#allocation76_spill] sm:$0xff]  ;;  %v7384_v13 = vld [vmem:[#allocation74_spill] sm:$0xff] }
 0x7f0   :  { %v2735_v62 = vmul.f32 0.5, %v3689_v25  ;;  %v7387_v25 = vld [vmem:[#allocation21_spill] sm:$0xff] }
 0x7f1   :  { %v3691_v51 = vpop.eup %3690  ;;  %v6360_v47 = vadd.f32 %v2741_v57, %v2739_v3  ;;  %v7385_v3 = vld [vmem:[#allocation75_spill] sm:$0xff]  ;;  %v7386_v57 = vld [vmem:[#allocation73_spill] sm:$0xff] }
 0x7f2   :  { %v2746_v5 = vmul.f32 %v3691_v51, %v2736_v10  ;;  %v2737_v8 = vadd.f32 0.5, %v2735_v62  ;;  %v7388_v10 = vld [vmem:[#allocation54_spill] sm:$0xff]  ;;  %v7390_v62 = vld [vmem:[#allocation57_spill] sm:$0xff] }
 0x7f3   :  { %3692 = vtanh.f32 %v6360_v47  ;;  %v7389_v51 = vld [vmem:[#allocation82_spill] sm:$0xff] }
 0x7f4   :  { %2772 = vmatmul.f32.vlgmr.msra.gmra.mxu0 %v2746_v5  ;;  %2795 = vmatmul.f32.vlgmr.msrb.gmra.mxu1 %v2746_v5 }
 0x7f5   :  { %2818 = vmatmul.f32.vlgmr.msrb.gmra.mxu2 %v2746_v5  ;;  %2841 = vmatmul.f32.vlgmr.msrb.gmra.mxu3 %v2746_v5  ;;  %v1914_v5 = vadd.f32 %v7389_v51, %v7388_v10  ;;  %v7395_v51 = vld [vmem:[#allocation87_spill] sm:$0xff] }
 0x7f6   :  { %3032 = vmatpush.msra.mxu0 %v5971_v4  ;;  %3055 = vmatpush.msrb.mxu1 %v5974_v12  ;;  %v7363_v4 = vld [vmem:[#allocation61_spill] sm:$0xff]  ;;  %v7364_v12 = vld [vmem:[#allocation66_spill] sm:$0xff] }
 0x7f7   :  { %3078 = vmatpush.msrb.mxu2 %v5977_v36  ;;  %3101 = vmatpush.msrb.mxu3 %v5980_v48  ;;  %v7365_v36 = vld [vmem:[#allocation59_spill] sm:$0xff]  ;;  %v7366_v48 = vld [vmem:[#allocation60_spill] sm:$0xff] }
 0x7f8   :  { %3033 = vmatpush.msra.mxu0 %v5983_v33  ;;  %3056 = vmatpush.msrb.mxu1 %v5986_v59  ;;  %v7367_v33 = vld [vmem:[#allocation58_spill] sm:$0xff]  ;;  %v7368_v59 = vld [vmem:[#allocation19_spill] sm:$0xff] }
 0x7f9   :  { %v3693_v18 = vpop.eup %3692  ;;  %3079 = vmatpush.msrb.mxu2 %v5989_v27  ;;  %3102 = vmatpush.msrb.mxu3 %v5992_v21  ;;  %v7369_v27 = vld [vmem:[#allocation22_spill] sm:$0xff]  ;;  %v7370_v21 = vld [vmem:[#allocation23_spill] sm:$0xff] }
 0x7fa   :  { %v2747_v39 = vmul.f32 %v3693_v18, %v2737_v8  ;;  %3034 = vmatpush.msra.mxu0 %v5995_v20  ;;  %3057 = vmatpush.msrb.mxu1 %v6090_v1  ;;  %v7371_v20 = vld [vmem:[#allocation24_spill] sm:$0xff]  ;;  %v7391_v8 = vld [vmem:[#allocation83_spill] sm:$0xff] }
 0x7fb   :  { %3080 = vmatpush.msrb.mxu2 %v5999_v42  ;;  %3103 = vmatpush.msrb.mxu3 %v6094_v37  ;;  %v7372_v42 = vld [vmem:[#allocation25_spill] sm:$0xff]  ;;  %v1979_v18 = vadd.f32 %v7391_v8, %v7390_v62 }
 0x7fc   :  { %2775 = vmatmul.f32.gmra.mxu0 %v2747_v39  ;;  %2798 = vmatmul.f32.gmra.mxu1 %v2747_v39 }
 0x7fd   :  { %2821 = vmatmul.f32.gmra.mxu2 %v2747_v39  ;;  %2844 = vmatmul.f32.gmra.mxu3 %v2747_v39 }
 0x7fe   :  { %3035 = vmatpush.msra.mxu0 %v6097_v31  ;;  %3058 = vmatpush.msrb.mxu1 %v6100_v38 }
 0x7ff   :  { %3081 = vmatpush.msrb.mxu2 %v6005_v16  ;;  %3104 = vmatpush.msrb.mxu3 %v6104_v61  ;;  %v7373_v16 = vld [vmem:[#allocation27_spill] sm:$0xff] }
 0x800   :  { %3036 = vmatpush.msra.mxu0 %v6107_v7  ;;  %3059 = vmatpush.msrb.mxu1 %v6110_v55 }
 0x801   :  { %3082 = vmatpush.msrb.mxu2 %v6113_v0  ;;  %3105 = vmatpush.msrb.mxu3 %v6116_v15 }
 0x802   :  { %3037 = vmatpush.msra.mxu0 %v6119_v43  ;;  %3060 = vmatpush.msrb.mxu1 %v6122_v35 }
 0x803   :  { %3083 = vmatpush.msrb.mxu2 %v6125_v52  ;;  %3106 = vmatpush.msrb.mxu3 %v6128_v9 }
 0x804   :  { %3038 = vmatpush.msra.mxu0 %v6131_v28  ;;  %3061 = vmatpush.msrb.mxu1 %v6134_v54 }
 0x805   :  { %3084 = vmatpush.msrb.mxu2 %v6137_v6  ;;  %3107 = vmatpush.msrb.mxu3 %v6140_v40 }
 0x806   :  { %3039 = vmatpush.msra.mxu0 %v6143_v26  ;;  %3062 = vmatpush.msrb.mxu1 %v6146_v24 }
 0x807   :  { %3085 = vmatpush.msrb.mxu2 %v6149_v34  ;;  %3108 = vmatpush.msrb.mxu3 %v6152_v23 }
 0x808   :  { %3040 = vmatpush.msra.mxu0 %v6155_v32  ;;  %3063 = vmatpush.msrb.mxu1 %v6158_v63 }
 0x809   :  { %3086 = vmatpush.msrb.mxu2 %v6161_v2  ;;  %3109 = vmatpush.msrb.mxu3 %v6164_v29 }
 0x80a   :  { %3041 = vmatpush.msra.mxu0 %v6167_v11  ;;  %3064 = vmatpush.msrb.mxu1 %v6170_v19 }
 0x80b   :  { %3087 = vmatpush.msrb.mxu2 %v6173_v46  ;;  %3110 = vmatpush.msrb.mxu3 %v7363_v4 }
 0x80c   :  { %3042 = vmatpush.msra.mxu0 %v7364_v12  ;;  %3065 = vmatpush.msrb.mxu1 %v7365_v36 }
 0x80d   :  { %3088 = vmatpush.msrb.mxu2 %v7366_v48  ;;  %3111 = vmatpush.msrb.mxu3 %v7367_v33 }
 0x80e   :  { %3043 = vmatpush.msra.mxu0 %v7368_v59  ;;  %3066 = vmatpush.msrb.mxu1 %v7369_v27 }
 0x80f   :  { %3089 = vmatpush.msrb.mxu2 %v7370_v21  ;;  %3112 = vmatpush.msrb.mxu3 %v7371_v20 }
 0x810   :  { %3044 = vmatpush.msra.mxu0 %v7372_v42  ;;  %3067 = vmatpush.msrb.mxu1 %v7373_v16 }
 0x811   :  { %3090 = vmatpush.msrb.mxu2 %v7374_v17  ;;  %3113 = vmatpush.msrb.mxu3 %v7375_v45 }
 0x812   :  { %3045 = vmatpush.msra.mxu0 %v7376_v58  ;;  %3068 = vmatpush.msrb.mxu1 %v7377_v44 }
 0x813   :  { %3091 = vmatpush.msrb.mxu2 %v7378_v22  ;;  %3114 = vmatpush.msrb.mxu3 %v7379_v50  ;;  %v1982_v22 = vadd.f32 %v7395_v51, %v7390_v62  ;;  %v7397_v62 = vld [vmem:[#allocation88_spill] sm:$0xff] }
 0x814   :  { %3046 = vmatpush.msra.mxu0 %v7380_v49  ;;  %3069 = vmatpush.msrb.mxu1 %v7381_v41 }
 0x815   :  { %3092 = vmatpush.msrb.mxu2 %v7382_v60  ;;  %3115 = vmatpush.msrb.mxu3 %v7383_v56 }
 0x816   :  { %3047 = vmatpush.msra.mxu0 %v7384_v13  ;;  %3070 = vmatpush.msrb.mxu1 %v7385_v3  ;;  %v7392_v13 = vld [vmem:[#allocation89_spill] sm:$0xff]  ;;  %v7393_v3 = vld [vmem:[#allocation84_spill] sm:$0xff] }
 0x817   :  { %3093 = vmatpush.msrb.mxu2 %v7386_v57  ;;  %3116 = vmatpush.msrb.mxu3 %v7387_v25  ;;  %v2044_v56 = vadd.f32 %v7392_v13, %v5949_v14  ;;  %v2109_v57 = vadd.f32 %v7393_v3, %v7289_v53  ;;  %v7394_v25 = vld [vmem:[#allocation86_spill] sm:$0xff] }
 0x818   :  { %v1917_v50 = vadd.f32 %v7394_v25, %v7388_v10  ;;  %v7396_v25 = vld [vmem:[#allocation42_spill] sm:$0xff] }
 0x819   :  { %v2047_v51 = vadd.f32 %v7396_v25, %v5949_v14 }
 0x871   :  { %v2773_v39 = vpop.f32.mrf.mxu0  ;;  %v2796_v41 = vpop.f32.mrf.mxu1 }
 0x872   :  { %v2848_v49 = vadd.f32 %v2773_v39, %v1914_v5  ;;  %v2849_v60 = vadd.f32 %v2796_v41, %v1979_v18 }
 0x874   :  { %3694 = vtanh.f32 %v2848_v49 }
 0x875   :  { %3696 = vtanh.f32 %v2849_v60 }
 0x878   :  { %v2819_v44 = vpop.f32.mrf.mxu2  ;;  %v2842_v8 = vpop.f32.mrf.mxu3 }
 0x879   :  { %v2850_v58 = vadd.f32 %v2819_v44, %v2044_v56  ;;  %v2851_v45 = vadd.f32 %v2842_v8, %v2109_v57  ;;  %v2776_v5 = vpop.f32.mrf.mxu0  ;;  %v2799_v41 = vpop.f32.mrf.mxu1  ;;  %v2112_v44 = vadd.f32 %v7397_v62, %v7289_v53 }
 0x87a   :  { %v3695_v49 = vpop.eup %3694  ;;  %v2852_v60 = vadd.f32 %v2776_v5, %v1917_v50  ;;  %v2853_v18 = vadd.f32 %v2799_v41, %v1982_v22 }
 0x87b   :  { %v3697_v39 = vpop.eup %3696  ;;  %3698 = vtanh.f32 %v2850_v58  ;;  %v2864_v13 = vmul.f32 0.5, %v3695_v49 }
 0x87c   :  { %v2868_v17 = vmul.f32 0.5, %v3697_v39  ;;  %3700 = vtanh.f32 %v2851_v45 }
 0x87d   :  { %3702 = vtanh.f32 %v2852_v60  ;;  %v2866_v56 = vadd.f32 0.5, %v2864_v13 }
 0x87e   :  { %v2870_v3 = vadd.f32 0.5, %v2868_v17  ;;  %3704 = vtanh.f32 %v2853_v18 }
 0x880   :  { %v2822_v57 = vpop.f32.mrf.mxu2  ;;  %v2845_v8 = vpop.f32.mrf.mxu3  ;;  %v2876_v58 = vmul.f32 %v2870_v3, %v6356_v30 }
 0x881   :  { %v3699_v10 = vpop.eup %3698  ;;  %v2854_v50 = vadd.f32 %v2822_v57, %v2047_v51  ;;  %v2855_v22 = vadd.f32 %v2845_v8, %v2112_v44 }
 0x882   :  { %v3701_v5 = vpop.eup %3700  ;;  %v2878_v41 = vmul.f32 %v3699_v10, %v2866_v56 }
 0x883   :  { %v3703_v45 = vpop.eup %3702  ;;  %3706 = vtanh.f32 %v2854_v50  ;;  %v2872_v62 = vmul.f32 0.5, %v3701_v5  ;;  %v3902_v50 = vld [vmem:[#allocation10 + $0x1e0] sm:$0xff]  ;;  %v3904_v5 = vld [vmem:[#allocation10 + $0x1f0] sm:$0xff] }
 0x884   :  { %v3705_v17 = vpop.eup %3704  ;;  %v6444_v49 = vadd.f32 %v2878_v41, %v2876_v58  ;;  %v2865_v60 = vmul.f32 0.5, %v3703_v45  ;;  %3708 = vtanh.f32 %v2855_v22  ;;  %v3903_v22 = vld [vmem:[#allocation10 + $0x1e8] sm:$0xff]  ;;  %v3906_v41 = vld [vmem:[#allocation10 + $0x1c0] sm:$0xff] }
 0x885   :  { %v2869_v18 = vmul.f32 0.5, %v3705_v17  ;;  %v2874_v30 = vadd.f32 0.5, %v2872_v62  ;;  %v3907_v45 = vld [vmem:[#allocation10 + $0x1c8] sm:$0xff] }
 0x886   :  { %3710 = vtanh.f32 %v6444_v49  ;;  %v2867_v13 = vadd.f32 0.5, %v2865_v60  ;;  %v3908_v60 = vld [vmem:[#allocation10 + $0x1d0] sm:$0xff] }
 0x887   :  { %v2871_v39 = vadd.f32 0.5, %v2869_v18  ;;  %v3909_v18 = vld [vmem:[#allocation10 + $0x1d8] sm:$0xff] }
 0x889   :  { %v3707_v25 = vpop.eup %3706  ;;  %v2877_v51 = vmul.f32 %v2871_v39, %v6360_v47  ;;  %v3905_v47 = vld [vmem:[#allocation10 + $0x1f8] sm:$0xff]  ;;  %v3910_v39 = vld [vmem:[#allocation10 + $0x1a0] sm:$0xff] }
 0x88a   :  { %v2879_v44 = vmul.f32 %v3707_v25, %v2867_v13  ;;  %v3709_v57 = vpop.eup %3708  ;;  %v3911_v13 = vld [vmem:[#allocation10 + $0x1b0] sm:$0xff] }
 0x88b   :  { %v2873_v8 = vmul.f32 0.5, %v3709_v57  ;;  %v3912_v25 = vld [vmem:[#allocation10 + $0x190] sm:$0xff] }
 0x88c   :  { %v3711_v10 = vpop.eup %3710  ;;  %v6448_v3 = vadd.f32 %v2879_v44, %v2877_v51 }
 0x88d   :  { %v2884_v56 = vmul.f32 %v3711_v10, %v2874_v30  ;;  %v2875_v58 = vadd.f32 0.5, %v2873_v8  ;;  %v7420_v8 = vld [vmem:[#allocation38_spill] sm:$0xff] }
 0x88e   :  { %3712 = vtanh.f32 %v6448_v3 }
 0x88f   :  { %2910 = vmatmul.f32.vlgmr.msrb.gmra.mxu0 %v2884_v56  ;;  %2933 = vmatmul.f32.vlgmr.msra.gmra.mxu1 %v2884_v56 }
 0x890   :  { %2956 = vmatmul.f32.vlgmr.msra.gmra.mxu2 %v2884_v56  ;;  %2979 = vmatmul.f32.vlgmr.msra.gmra.mxu3 %v2884_v56 }
 0x891   :  { %3170 = vmatpush.msrb.mxu0 %v3902_v50  ;;  %3193 = vmatpush.msra.mxu1 %v3903_v22  ;;  %v2053_v50 = vadd.f32 %v7420_v8, %v5949_v14  ;;  %v7421_v22 = vld [vmem:[#allocation30_spill] sm:$0xff] }
 0x892   :  { %3216 = vmatpush.msra.mxu2 %v3904_v5  ;;  %3239 = vmatpush.msra.mxu3 %v3905_v47  ;;  %v2118_v5 = vadd.f32 %v7421_v22, %v7289_v53 }
 0x893   :  { %3171 = vmatpush.msrb.mxu0 %v3906_v41  ;;  %3194 = vmatpush.msra.mxu1 %v3907_v45 }
 0x894   :  { %v3713_v17 = vpop.eup %3712  ;;  %3217 = vmatpush.msra.mxu2 %v3908_v60  ;;  %3240 = vmatpush.msra.mxu3 %v3909_v18 }
 0x895   :  { %v2885_v62 = vmul.f32 %v3713_v17, %v2875_v58  ;;  %3172 = vmatpush.msrb.mxu0 %v3910_v39  ;;  %3195 = vmatpush.msra.mxu1 %v6090_v1  ;;  %v7398_v1 = vld [vmem:[#allocation31_spill] sm:$0xff] }
 0x896   :  { %3218 = vmatpush.msra.mxu2 %v3911_v13  ;;  %3241 = vmatpush.msra.mxu3 %v6094_v37  ;;  %v7399_v37 = vld [vmem:[#allocation32_spill] sm:$0xff] }
 0x897   :  { %2913 = vmatmul.f32.gmra.mxu0 %v2885_v62  ;;  %2936 = vmatmul.f32.gmra.mxu1 %v2885_v62 }
 0x898   :  { %2959 = vmatmul.f32.gmra.mxu2 %v2885_v62  ;;  %2982 = vmatmul.f32.gmra.mxu3 %v2885_v62 }
 0x899   :  { %3173 = vmatpush.msrb.mxu0 %v6097_v31  ;;  %3196 = vmatpush.msra.mxu1 %v6100_v38  ;;  %v7400_v31 = vld [vmem:[#allocation67_spill] sm:$0xff]  ;;  %v7401_v38 = vld [vmem:[#allocation68_spill] sm:$0xff] }
 0x89a   :  { %3219 = vmatpush.msra.mxu2 %v3912_v25  ;;  %3242 = vmatpush.msra.mxu3 %v6104_v61  ;;  %v7402_v61 = vld [vmem:[#allocation65_spill] sm:$0xff] }
 0x89b   :  { %3174 = vmatpush.msrb.mxu0 %v6107_v7  ;;  %3197 = vmatpush.msra.mxu1 %v6110_v55  ;;  %v7403_v7 = vld [vmem:[#allocation70_spill] sm:$0xff]  ;;  %v7404_v55 = vld [vmem:[#allocation71_spill] sm:$0xff] }
 0x89c   :  { %3220 = vmatpush.msra.mxu2 %v6113_v0  ;;  %3243 = vmatpush.msra.mxu3 %v6116_v15  ;;  %v7405_v0 = vld [vmem:[#allocation72_spill] sm:$0xff]  ;;  %v7406_v15 = vld [vmem:[#allocation69_spill] sm:$0xff] }
 0x89d   :  { %3175 = vmatpush.msrb.mxu0 %v6119_v43  ;;  %3198 = vmatpush.msra.mxu1 %v6122_v35  ;;  %v7407_v43 = vld [vmem:[#allocation76_spill] sm:$0xff]  ;;  %v7408_v35 = vld [vmem:[#allocation74_spill] sm:$0xff] }
 0x89e   :  { %3221 = vmatpush.msra.mxu2 %v6125_v52  ;;  %3244 = vmatpush.msra.mxu3 %v6128_v9  ;;  %v7409_v52 = vld [vmem:[#allocation75_spill] sm:$0xff]  ;;  %v7410_v9 = vld [vmem:[#allocation73_spill] sm:$0xff] }
 0x89f   :  { %3176 = vmatpush.msrb.mxu0 %v6131_v28  ;;  %3199 = vmatpush.msra.mxu1 %v6134_v54  ;;  %v7411_v28 = vld [vmem:[#allocation21_spill] sm:$0xff]  ;;  %v7412_v54 = vld [vmem:[#allocation54_spill] sm:$0xff] }
 0x8a0   :  { %3222 = vmatpush.msra.mxu2 %v6137_v6  ;;  %3245 = vmatpush.msra.mxu3 %v6140_v40  ;;  %v7413_v6 = vld [vmem:[#allocation90_spill] sm:$0xff] }
 0x8a1   :  { %3177 = vmatpush.msrb.mxu0 %v6143_v26  ;;  %3200 = vmatpush.msra.mxu1 %v6146_v24  ;;  %v1920_v40 = vadd.f32 %v7413_v6, %v7412_v54  ;;  %v7414_v26 = vld [vmem:[#allocation57_spill] sm:$0xff]  ;;  %v7415_v24 = vld [vmem:[#allocation91_spill] sm:$0xff] }
 0x8a2   :  { %3223 = vmatpush.msra.mxu2 %v6149_v34  ;;  %3246 = vmatpush.msra.mxu3 %v6152_v23  ;;  %v1985_v34 = vadd.f32 %v7415_v24, %v7414_v26 }
 0x8a3   :  { %3178 = vmatpush.msrb.mxu0 %v6155_v32  ;;  %3201 = vmatpush.msra.mxu1 %v6158_v63 }
 0x8a4   :  { %3224 = vmatpush.msra.mxu2 %v6161_v2  ;;  %3247 = vmatpush.msra.mxu3 %v6164_v29  ;;  %v7416_v29 = vld [vmem:[#allocation100_spill] sm:$0xff] }
 0x8a5   :  { %3179 = vmatpush.msrb.mxu0 %v6167_v11  ;;  %3202 = vmatpush.msra.mxu1 %v6170_v19  ;;  %v2050_v11 = vadd.f32 %v7416_v29, %v5949_v14  ;;  %v7417_v19 = vld [vmem:[#allocation17_spill] sm:$0xff] }
 0x8a6   :  { %3225 = vmatpush.msra.mxu2 %v6173_v46  ;;  %3248 = vmatpush.msra.mxu3 %v7363_v4  ;;  %v2115_v46 = vadd.f32 %v7417_v19, %v7289_v53  ;;  %v7418_v4 = vld [vmem:[#allocation20_spill] sm:$0xff]  ;;  %v7424_v19 = vld [vmem:[#allocation43_spill] sm:$0xff] }
 0x8a7   :  { %3180 = vmatpush.msrb.mxu0 %v7364_v12  ;;  %3203 = vmatpush.msra.mxu1 %v7365_v36  ;;  %v1923_v12 = vadd.f32 %v7418_v4, %v7412_v54  ;;  %v7419_v36 = vld [vmem:[#allocation18_spill] sm:$0xff]  ;;  %v7425_v4 = vld [vmem:[#allocation92_spill] sm:$0xff] }
 0x8a8   :  { %3226 = vmatpush.msra.mxu2 %v7366_v48  ;;  %3249 = vmatpush.msra.mxu3 %v7367_v33  ;;  %v1988_v48 = vadd.f32 %v7419_v36, %v7414_v26  ;;  %v7426_v36 = vld [vmem:[#allocation93_spill] sm:$0xff] }
 0x8a9   :  { %3181 = vmatpush.msrb.mxu0 %v7368_v59  ;;  %3204 = vmatpush.msra.mxu1 %v7369_v27 }
 0x8aa   :  { %3227 = vmatpush.msra.mxu2 %v7370_v21  ;;  %3250 = vmatpush.msra.mxu3 %v7371_v20 }
 0x8ab   :  { %3182 = vmatpush.msrb.mxu0 %v7372_v42  ;;  %3205 = vmatpush.msra.mxu1 %v7373_v16 }
 0x8ac   :  { %3228 = vmatpush.msra.mxu2 %v7398_v1  ;;  %3251 = vmatpush.msra.mxu3 %v7399_v37 }
 0x8ad   :  { %3183 = vmatpush.msrb.mxu0 %v7400_v31  ;;  %3206 = vmatpush.msra.mxu1 %v7401_v38 }
 0x8ae   :  { %3229 = vmatpush.msra.mxu2 %v7402_v61  ;;  %3252 = vmatpush.msra.mxu3 %v7403_v7 }
 0x8af   :  { %3184 = vmatpush.msrb.mxu0 %v7404_v55  ;;  %3207 = vmatpush.msra.mxu1 %v7405_v0 }
 0x8b0   :  { %3230 = vmatpush.msra.mxu2 %v7406_v15  ;;  %3253 = vmatpush.msra.mxu3 %v7407_v43 }
 0x8b1   :  { %3185 = vmatpush.msrb.mxu0 %v7408_v35  ;;  %3208 = vmatpush.msra.mxu1 %v7409_v52 }
 0x8b2   :  { %3231 = vmatpush.msra.mxu2 %v7410_v9  ;;  %3254 = vmatpush.msra.mxu3 %v7411_v28 }
 0x90c   :  { %v2911_v23 = vpop.f32.mrf.mxu0  ;;  %v2934_v32 = vpop.f32.mrf.mxu1 }
 0x90d   :  { %v2986_v63 = vadd.f32 %v2911_v23, %v1920_v40  ;;  %v2987_v2 = vadd.f32 %v2934_v32, %v1985_v34  ;;  %v7423_v23 = vld [vmem:[#allocation52_spill] sm:$0xff] }
 0x90e   :  { %v1991_v32 = vadd.f32 %v7423_v23, %v7414_v26 }
 0x90f   :  { %3714 = vtanh.f32 %v2986_v63 }
 0x910   :  { %3716 = vtanh.f32 %v2987_v2 }
 0x913   :  { %v2957_v33 = vpop.f32.mrf.mxu2  ;;  %v2980_v59 = vpop.f32.mrf.mxu3 }
 0x914   :  { %v2988_v27 = vadd.f32 %v2957_v33, %v2050_v11  ;;  %v2989_v21 = vadd.f32 %v2980_v59, %v2115_v46  ;;  %v2914_v20 = vpop.f32.mrf.mxu0  ;;  %v2937_v42 = vpop.f32.mrf.mxu1  ;;  %v2056_v46 = vadd.f32 %v7424_v19, %v5949_v14  ;;  %v7427_v33 = vld [vmem:[#allocation94_spill] sm:$0xff]  ;;  %v3309_v19 = vld [vmem:[%s6631_s7 + $0x48] sm:$0xff] }
 0x915   :  { %v3715_v16 = vpop.eup %3714  ;;  %v2990_v51 = vadd.f32 %v2914_v20, %v1923_v12  ;;  %v2991_v44 = vadd.f32 %v2937_v42, %v1988_v48  ;;  %v2121_v12 = vadd.f32 %v7425_v4, %v7289_v53  ;;  %v1929_v48 = vadd.f32 %v7426_v36, %v7412_v54  ;;  %v3315_v20 = vld [vmem:[%s6631_s7 + $0x78] sm:$0xff]  ;;  %v3305_v36 = vld [vmem:[%s6631_s7 + $0x28] sm:$0xff] }
 0x916   :  { %v3717_v57 = vpop.eup %3716  ;;  %3718 = vtanh.f32 %v2988_v27  ;;  %v3002_v30 = vmul.f32 0.5, %v3715_v16  ;;  %v1994_v59 = vadd.f32 %v7427_v33, %v7414_v26  ;;  %v3307_v4 = vld [vmem:[%s6631_s7 + $0x38] sm:$0xff] }
 0x917   :  { %v3006_v10 = vmul.f32 0.5, %v3717_v57  ;;  %3720 = vtanh.f32 %v2989_v21  ;;  %v3303_v33 = vld [vmem:[%s6631_s7 + $0x18] sm:$0xff] }
 0x918   :  { %3722 = vtanh.f32 %v2990_v51  ;;  %v3004_v47 = vadd.f32 0.5, %v3002_v30 }
 0x919   :  { %v3008_v56 = vadd.f32 0.5, %v3006_v10  ;;  %3724 = vtanh.f32 %v2991_v44 }
 0x91b   :  { %v2960_v58 = vpop.f32.mrf.mxu2  ;;  %v2983_v41 = vpop.f32.mrf.mxu3  ;;  %v3014_v62 = vmul.f32 %v3008_v56, %v6444_v49 }
 0x91c   :  { %v3719_v45 = vpop.eup %3718  ;;  %v2992_v17 = vadd.f32 %v2960_v58, %v2053_v50  ;;  %v2993_v60 = vadd.f32 %v2983_v41, %v2118_v5  ;;  %v7428_v5 = vld [vmem:[#allocation44_spill] sm:$0xff]  ;;  %v7429_v58 = vld [vmem:[#allocation95_spill] sm:$0xff] }
 0x91d   :  { %v3721_v18 = vpop.eup %3720  ;;  %v3016_v39 = vmul.f32 %v3719_v45, %v3004_v47  ;;  %v2059_v47 = vadd.f32 %v7428_v5, %v5949_v14  ;;  %v2124_v41 = vadd.f32 %v7429_v58, %v7289_v53  ;;  %v7434_v5 = vld [vmem:[#allocation55_spill] sm:$0xff]  ;;  %v7435_v58 = vld [vmem:[#allocation56_spill] sm:$0xff] }
 0x91e   :  { %v3723_v13 = vpop.eup %3722  ;;  %3726 = vtanh.f32 %v2992_v17  ;;  %v3010_v38 = vmul.f32 0.5, %v3721_v18 }
 0x91f   :  { %v3725_v25 = vpop.eup %3724  ;;  %v6521_v1 = vadd.f32 %v3016_v39, %v3014_v62  ;;  %v3003_v37 = vmul.f32 0.5, %v3723_v13  ;;  %3728 = vtanh.f32 %v2993_v60 }
 0x920   :  { %v3007_v31 = vmul.f32 0.5, %v3725_v25  ;;  %v3012_v49 = vadd.f32 0.5, %v3010_v38 }
 0x921   :  { %3730 = vtanh.f32 %v6521_v1  ;;  %v3005_v7 = vadd.f32 0.5, %v3003_v37 }
 0x922   :  { %v3009_v61 = vadd.f32 0.5, %v3007_v31 }
 0x924   :  { %v3727_v55 = vpop.eup %3726  ;;  %v3015_v0 = vmul.f32 %v3009_v61, %v6448_v3  ;;  %v7422_v3 = vld [vmem:[#allocation50_spill] sm:$0xff] }
 0x925   :  { %v3017_v15 = vmul.f32 %v3727_v55, %v3005_v7  ;;  %v3729_v43 = vpop.eup %3728  ;;  %v1926_v34 = vadd.f32 %v7422_v3, %v7412_v54 }
 0x926   :  { %v3011_v28 = vmul.f32 0.5, %v3729_v43 }
 0x927   :  { %v3731_v35 = vpop.eup %3730  ;;  %v6525_v52 = vadd.f32 %v3017_v15, %v3015_v0 }
 0x928   :  { %v3022_v9 = vmul.f32 %v3731_v35, %v3012_v49  ;;  %v3013_v6 = vadd.f32 0.5, %v3011_v28 }
 0x929   :  { %3732 = vtanh.f32 %v6525_v52 }
 0x92a   :  { %3048 = vmatmul.f32.vlgmr.msra.gmra.mxu0 %v3022_v9  ;;  %3071 = vmatmul.f32.vlgmr.msrb.gmra.mxu1 %v3022_v9 }
 0x92b   :  { %3094 = vmatmul.f32.vlgmr.msrb.gmra.mxu2 %v3022_v9  ;;  %3117 = vmatmul.f32.vlgmr.msrb.gmra.mxu3 %v3022_v9 }
 0x92c   :  { %3320 = vmatpush.msra.mxu0 %v3315_v20  ;;  %v7430_v20 = vld [vmem:[#allocation98_spill] sm:$0xff] }
 0x92f   :  { %v3733_v40 = vpop.eup %3732 }
 0x930   :  { %v3023_v24 = vmul.f32 %v3733_v40, %v3013_v6 }
 0x932   :  { %3051 = vmatmul.f32.gmra.mxu0 %v3023_v24  ;;  %3074 = vmatmul.f32.gmra.mxu1 %v3023_v24 }
 0x933   :  { %3097 = vmatmul.f32.gmra.mxu2 %v3023_v24  ;;  %3120 = vmatmul.f32.gmra.mxu3 %v3023_v24 }
 0x9a7   :  { %v3049_v63 = vpop.f32.mrf.mxu0  ;;  %v3072_v2 = vpop.f32.mrf.mxu1 }
 0x9a8   :  { %v3124_v29 = vadd.f32 %v3049_v63, %v1926_v34  ;;  %v3125_v11 = vadd.f32 %v3072_v2, %v1991_v32  ;;  %v3313_v63 = vld [vmem:[%s6631_s7 + $0x68] sm:$0xff]  ;;  %v3312_v2 = vld [vmem:[%s6631_s7 + $0x60] sm:$0xff] }
 0x9aa   :  { %3734 = vtanh.f32 %v3124_v29  ;;  %v3311_v29 = vld [vmem:[%s6631_s7 + $0x58] sm:$0xff] }
 0x9ab   :  { %3736 = vtanh.f32 %v3125_v11  ;;  %v3310_v11 = vld [vmem:[%s6631_s7 + $0x50] sm:$0xff] }
 0x9ae   :  { %v3095_v27 = vpop.f32.mrf.mxu2  ;;  %v3118_v21 = vpop.f32.mrf.mxu3 }
 0x9af   :  { %v3126_v42 = vadd.f32 %v3095_v27, %v2056_v46  ;;  %v3127_v16 = vadd.f32 %v3118_v21, %v2121_v12  ;;  %v3052_v51 = vpop.f32.mrf.mxu0  ;;  %v3075_v44 = vpop.f32.mrf.mxu1  ;;  %v3308_v46 = vld [vmem:[%s6631_s7 + $0x40] sm:$0xff]  ;;  %v3306_v12 = vld [vmem:[%s6631_s7 + $0x30] sm:$0xff]  ;;  %v3301_v27 = vld [vmem:[%s6631_s7 + $0x8] sm:$0xff] }
 0x9b0   :  { %v3735_v57 = vpop.eup %3734  ;;  %v3128_v30 = vadd.f32 %v3052_v51, %v1929_v48  ;;  %v3129_v10 = vadd.f32 %v3075_v44, %v1994_v59  ;;  %v3304_v48 = vld [vmem:[%s6631_s7 + $0x20] sm:$0xff]  ;;  %v3302_v59 = vld [vmem:[%s6631_s7 + $0x10] sm:$0xff] }
 0x9b1   :  { %v3737_v56 = vpop.eup %3736  ;;  %3738 = vtanh.f32 %v3126_v42  ;;  %v3140_v8 = vmul.f32 0.5, %v3735_v57  ;;  %v3300_v21 = vld [vmem:[%s6631_s7] sm:$0xff]  ;;  %v1932_v42 = vadd.f32 %v7430_v20, %v7412_v54 }
 0x9b2   :  { %v3144_v50 = vmul.f32 0.5, %v3737_v56  ;;  %3740 = vtanh.f32 %v3127_v16  ;;  %v7431_v16 = vld [vmem:[#allocation99_spill] sm:$0xff]  ;;  %v7432_v56 = vld [vmem:[#allocation53_spill] sm:$0xff] }
 0x9b3   :  { %3742 = vtanh.f32 %v3128_v30  ;;  %v3142_v45 = vadd.f32 0.5, %v3140_v8  ;;  %v1997_v51 = vadd.f32 %v7431_v16, %v7414_v26  ;;  %v2062_v8 = vadd.f32 %v7432_v56, %v5949_v14 }
 0x9b4   :  { %v3146_v22 = vadd.f32 0.5, %v3144_v50  ;;  %3744 = vtanh.f32 %v3129_v10  ;;  %v7433_v50 = vld [vmem:[#allocation51_spill] sm:$0xff] }
 0x9b6   :  { %v3098_v17 = vpop.f32.mrf.mxu2  ;;  %v3121_v60 = vpop.f32.mrf.mxu3  ;;  %v3152_v25 = vmul.f32 %v3146_v22, %v6521_v1  ;;  %v2127_v22 = vadd.f32 %v7433_v50, %v7289_v53 }
 0x9b7   :  { %v3739_v18 = vpop.eup %3738  ;;  %v3130_v62 = vadd.f32 %v3098_v17, %v2059_v47  ;;  %v3131_v39 = vadd.f32 %v3121_v60, %v2124_v41  ;;  %v1935_v47 = vadd.f32 %v7434_v5, %v7412_v54  ;;  %v2000_v41 = vadd.f32 %v7435_v58, %v7414_v26  ;;  %v7436_v54 = vld [vmem:[#allocation62_spill] sm:$0xff] }
 0x9b8   :  { %v3741_v13 = vpop.eup %3740  ;;  %v3154_v37 = vmul.f32 %v3739_v18, %v3142_v45  ;;  %v2065_v26 = vadd.f32 %v7436_v54, %v5949_v14 }
 0x9b9   :  { %v3743_v31 = vpop.eup %3742  ;;  %3746 = vtanh.f32 %v3130_v62  ;;  %v3148_v0 = vmul.f32 0.5, %v3741_v13 }
 0x9ba   :  { %v3745_v38 = vpop.eup %3744  ;;  %v6548_v61 = vadd.f32 %v3154_v37, %v3152_v25  ;;  %v3141_v7 = vmul.f32 0.5, %v3743_v31  ;;  %3748 = vtanh.f32 %v3131_v39 }
 0x9bb   :  { %v3145_v55 = vmul.f32 0.5, %v3745_v38  ;;  %v3150_v1 = vadd.f32 0.5, %v3148_v0  ;;  %v7437_v0 = vld [vmem:[#allocation63_spill] sm:$0xff] }
 0x9bc   :  { %3750 = vtanh.f32 %v6548_v61  ;;  %v3143_v43 = vadd.f32 0.5, %v3141_v7 }
 0x9bd   :  { %v3147_v15 = vadd.f32 0.5, %v3145_v55 }
 0x9bf   :  { %v3747_v49 = vpop.eup %3746  ;;  %v3153_v35 = vmul.f32 %v3147_v15, %v6525_v52  ;;  %v3314_v52 = vld [vmem:[%s6631_s7 + $0x70] sm:$0xff]  ;;  %v2130_v15 = vadd.f32 %v7437_v0, %v7289_v53 }
 0x9c0   :  { %v3155_v9 = vmul.f32 %v3747_v49, %v3143_v43  ;;  %v3749_v28 = vpop.eup %3748  ;;  %3321 = vmatpush.msra.mxu0 %v3314_v52 }
 0x9c1   :  { %v3149_v3 = vmul.f32 0.5, %v3749_v28 }
 0x9c2   :  { %v3751_v6 = vpop.eup %3750  ;;  %v6552_v40 = vadd.f32 %v3155_v9, %v3153_v35  ;;  %3322 = vmatpush.msra.mxu0 %v3313_v63 }
 0x9c3   :  { %v3160_v24 = vmul.f32 %v3751_v6, %v3150_v1  ;;  %v3151_v34 = vadd.f32 0.5, %v3149_v3 }
 0x9c4   :  { %3752 = vtanh.f32 %v6552_v40  ;;  %3323 = vmatpush.msra.mxu0 %v3312_v2 }
 0x9c5   :  { %3186 = vmatmul.f32.vlgmr.msrb.gmra.mxu0 %v3160_v24  ;;  %3209 = vmatmul.f32.vlgmr.msra.gmra.mxu1 %v3160_v24 }
 0x9c6   :  { %3232 = vmatmul.f32.vlgmr.msra.gmra.mxu2 %v3160_v24  ;;  %3255 = vmatmul.f32.vlgmr.msra.gmra.mxu3 %v3160_v24 }
 0x9c7   :  { %3324 = vmatpush.msra.mxu0 %v3311_v29 }
 0x9c9   :  { %3325 = vmatpush.msra.mxu0 %v3310_v11 }
 0x9ca   :  { %v3753_v23 = vpop.eup %3752 }
 0x9cb   :  { %v3161_v32 = vmul.f32 %v3753_v23, %v3151_v34  ;;  %3326 = vmatpush.msra.mxu0 %v3309_v19 }
 0x9cd   :  { %3189 = vmatmul.f32.gmra.mxu0 %v3161_v32  ;;  %3212 = vmatmul.f32.gmra.mxu1 %v3161_v32 }
 0x9ce   :  { %3235 = vmatmul.f32.gmra.mxu2 %v3161_v32  ;;  %3258 = vmatmul.f32.gmra.mxu3 %v3161_v32 }
 0x9cf   :  { %3327 = vmatpush.msra.mxu0 %v3308_v46 }
 0x9d1   :  { %3328 = vmatpush.msra.mxu0 %v3307_v4 }
 0x9d3   :  { %3329 = vmatpush.msra.mxu0 %v3306_v12 }
 0x9d5   :  { %3330 = vmatpush.msra.mxu0 %v3305_v36 }
 0x9d7   :  { %3331 = vmatpush.msra.mxu0 %v3304_v48 }
 0x9d9   :  { %3332 = vmatpush.msra.mxu0 %v3303_v33 }
 0x9db   :  { %3333 = vmatpush.msra.mxu0 %v3302_v59 }
 0x9dd   :  { %3334 = vmatpush.msra.mxu0 %v3301_v27 }
 0x9df   :  { %3335 = vmatpush.msra.mxu0 %v3300_v21  ;;  %v3453_v21 = vld [vmem:[%s6632_s8] ss:$0 sm:$0xff] }
 0xa42   :  { %v3187_v44 = vpop.f32.mrf.mxu0  ;;  %v3210_v57 = vpop.f32.mrf.mxu1 }
 0xa43   :  { %v3262_v30 = vadd.f32 %v3187_v44, %v1932_v42  ;;  %v3263_v10 = vadd.f32 %v3210_v57, %v1997_v51 }
 0xa45   :  { %3754 = vtanh.f32 %v3262_v30 }
 0xa46   :  { %3756 = vtanh.f32 %v3263_v10 }
 0xa49   :  { %v3233_v45 = vpop.f32.mrf.mxu2  ;;  %v3256_v17 = vpop.f32.mrf.mxu3 }
 0xa4a   :  { %v3264_v60 = vadd.f32 %v3233_v45, %v2062_v8  ;;  %v3265_v18 = vadd.f32 %v3256_v17, %v2127_v22  ;;  %v3190_v62 = vpop.f32.mrf.mxu0  ;;  %v3213_v39 = vpop.f32.mrf.mxu1 }
 0xa4b   :  { %v3755_v13 = vpop.eup %3754  ;;  %v3266_v25 = vadd.f32 %v3190_v62, %v1935_v47  ;;  %v3267_v37 = vadd.f32 %v3213_v39, %v2000_v41 }
 0xa4c   :  { %v3757_v31 = vpop.eup %3756  ;;  %3758 = vtanh.f32 %v3264_v60  ;;  %v3278_v38 = vmul.f32 0.5, %v3755_v13 }
 0xa4d   :  { %v3282_v7 = vmul.f32 0.5, %v3757_v31  ;;  %3760 = vtanh.f32 %v3265_v18 }
 0xa4e   :  { %3762 = vtanh.f32 %v3266_v25  ;;  %v3280_v43 = vadd.f32 0.5, %v3278_v38 }
 0xa4f   :  { %v3284_v55 = vadd.f32 0.5, %v3282_v7  ;;  %3764 = vtanh.f32 %v3267_v37 }
 0xa51   :  { %v3236_v49 = vpop.f32.mrf.mxu2  ;;  %v3259_v35 = vpop.f32.mrf.mxu3  ;;  %v3290_v24 = vmul.f32 %v3284_v55, %v6548_v61 }
 0xa52   :  { %v3759_v9 = vpop.eup %3758  ;;  %v3268_v28 = vadd.f32 %v3236_v49, %v2065_v26  ;;  %v3269_v1 = vadd.f32 %v3259_v35, %v2130_v15 }
 0xa53   :  { %v3761_v6 = vpop.eup %3760  ;;  %v3292_v3 = vmul.f32 %v3759_v9, %v3280_v43 }
 0xa54   :  { %v3763_v34 = vpop.eup %3762  ;;  %3766 = vtanh.f32 %v3268_v28  ;;  %v3286_v14 = vmul.f32 0.5, %v3761_v6 }
 0xa55   :  { %v3765_v23 = vpop.eup %3764  ;;  %v3294_v32 = vadd.f32 %v3292_v3, %v3290_v24  ;;  %v3279_v52 = vmul.f32 0.5, %v3763_v34  ;;  %3768 = vtanh.f32 %v3269_v1 }
 0xa56   :  { %v3283_v63 = vmul.f32 0.5, %v3765_v23  ;;  %v3288_v4 = vadd.f32 0.5, %v3286_v14 }
 0xa57   :  { %3770 = vtanh.f32 %v3294_v32  ;;  %v3281_v2 = vadd.f32 0.5, %v3279_v52 }
 0xa58   :  { %v3285_v53 = vadd.f32 0.5, %v3283_v63 }
 0xa5a   :  { %v3767_v29 = vpop.eup %3766  ;;  %v3291_v11 = vmul.f32 %v3285_v53, %v6552_v40 }
 0xa5b   :  { %v3293_v19 = vmul.f32 %v3767_v29, %v3281_v2  ;;  %v3769_v46 = vpop.eup %3768 }
 0xa5c   :  { %v3287_v48 = vmul.f32 0.5, %v3769_v46 }
 0xa5d   :  { %v3771_v12 = vpop.eup %3770  ;;  %v3295_v61 = vadd.f32 %v3293_v19, %v3291_v11 }
 0xa5e   :  { %v3298_v36 = vmul.f32 %v3771_v12, %v3288_v4  ;;  %v3289_v33 = vadd.f32 0.5, %v3287_v48 }
 0xa5f   :  { %3772 = vtanh.f32 %v3295_v61 }
 0xa60   :  { %3336 = vmatmul.f32.vlgmr.msra.gmra.mxu0 %v3298_v36 }
 0xa65   :  { %v3773_v59 = vpop.eup %3772 }
 0xa66   :  { %v3299_v27 = vmul.f32 %v3773_v59, %v3289_v33 }
 0xa68   :  { %3339 = vmatmul.f32.gmra.mxu0 %v3299_v27 }
 0xadd   :  { %v3337_v20 = vpop.f32.mrf.mxu0 }
 0xade   :  { %v3338_v42 = vadd.f32 %v3453_v21, %v3337_v20 }
 0xae0   :  { %3343 = vst [vmem:[#allocation12] sm:$0xff] %v3338_v42 }
 0xae5   :  { %v3340_v40 = vpop.f32.mrf.mxu0 }
 0xae6   :  { %v3341_v16 = vadd.f32 %v3453_v21, %v3340_v40 }
 0xae8   :  { %3344 = vst [vmem:[#allocation12 + $0x8] sm:$0xff] %v3341_v16 }
 0xae9   :  { %3357 = dma.vmem_to_hbm [thread:$0]  %s3350_s20, 256, %s3352_s23, [#allocation6], %s4049_s2, %s4049_s2, %s4050_s24  }
 0xaea   :  { %4039 = dma.done.wait [#allocation6], 256  }
 0xaeb   :  { %4040 = vsyncadd [#allocation6], 4294967040 }
 0xaec   :  { %3362 = vsyncpa [#allocation5], 1 }
 0xaed   :  { %3363 = vsyncpa [#allocation8], 1 }
 0xaee   :  { %3364 = vsyncpa [#allocation11], 1 }
 0xaef   :  { %3365 = vsyncpa [#allocation6], 1 }

</bundles_post_ra>
